<compile_context>
chip_gen: v7x
topology: tpu7x:2x2x1
jax: 0.10.0
libtpu: 0.0.40
codegen_flags: <defaults>
</compile_context>

<pallas_src>
import functools

import jax
import jax.numpy as jnp
from jax import lax
from jax.experimental import pallas as pl
from jax.experimental.pallas import tpu as pltpu


MAX_LENGTH = 7


def _round_up(x, m):
    return (x + m - 1) // m * m


def decoder_kernel(tok0_ref, h0_ref, emb_ref, wih_ref, whh_ref,
                   bih_ref, bhh_ref, wout_ref, bout_ref,
                   logits_ref, logprobs_ref, *, num_steps, hp, vp):
    """Full greedy decode in one kernel invocation.

    tok0_ref     : (Bp, 1)     int32 start tokens (target[:, 0]), padded rows = 0
    h0_ref       : (Bp, Hp)    initial hidden (encoder output), zero-padded
    emb_ref      : (Vp, Hp)    embedding table, zero-padded
    wih_ref      : (Hp, 3*Hp)  W_ih^T, gate-aligned layout (r | z | n), zero-padded
    whh_ref      : (Hp, 3*Hp)  W_hh^T, same layout
    bih_ref      : (1, 3*Hp)   b_ih (padded entries = 0)
    bhh_ref      : (1, 3*Hp)   b_hh (padded entries = 0)
    wout_ref     : (Hp, Vp)    W_out^T, zero-padded
    bout_ref     : (1, Vp)     b_out (padded vocab entries = -1e30 so argmax skips them)
    logits_ref   : (T, Bp, Vp) per-step logits
    logprobs_ref : (T, Bp, Vp) per-step log_softmax(logits)
    """
    # Hoist all parameter loads out of the unrolled time loop.
    emb = emb_ref[...]
    wih = wih_ref[...]
    whh = whh_ref[...]
    bih = bih_ref[...]
    bhh = bhh_ref[...]
    wout = wout_ref[...]
    bout = bout_ref[...]

    h = h0_ref[...]                                              # (Bp, Hp)
    bp = h.shape[0]

    iota_i = lax.broadcasted_iota(jnp.int32, (bp, vp), 1)
    iota_f = iota_i.astype(jnp.float32)

    # in-kernel one-hot of the start token (feeds gather-free embedding lookup)
    onehot = (iota_i == tok0_ref[...]).astype(jnp.float32)       # (Bp, Vp)

    for t in range(num_steps):
        # embedding lookup (gather-free: one-hot @ table) followed by ReLU
        x = jnp.maximum(
            jnp.dot(onehot, emb, preferred_element_type=jnp.float32), 0.0)

        gi = jnp.dot(x, wih, preferred_element_type=jnp.float32) + bih
        gh = jnp.dot(h, whh, preferred_element_type=jnp.float32) + bhh

        # gate slices are 128-lane aligned (hp is a multiple of 128)
        r = jax.nn.sigmoid(gi[:, 0:hp] + gh[:, 0:hp])
        z = jax.nn.sigmoid(gi[:, hp:2 * hp] + gh[:, hp:2 * hp])
        n = jnp.tanh(gi[:, 2 * hp:3 * hp] + r * gh[:, 2 * hp:3 * hp])
        h = (1.0 - z) * n + z * h

        logits = jnp.dot(h, wout, preferred_element_type=jnp.float32) + bout  # (Bp, Vp)
        logits_ref[t] = logits

        # row max is shared between greedy argmax and log_softmax
        m = jnp.max(logits, axis=-1, keepdims=True)

        # log_softmax in-kernel (padded vocab columns are -1e30 -> exp == 0)
        lse = m + jnp.log(jnp.sum(jnp.exp(logits - m), axis=-1, keepdims=True))
        logprobs_ref[t] = logits - lse

        # greedy argmax (first-max index, matching torch.max) -> one-hot feedback
        idx = jnp.min(jnp.where(logits == m, iota_f, float(vp)),
                      axis=-1, keepdims=True)
        onehot = (iota_f == idx).astype(jnp.float32)


def decoder_rnn_forward(target, encoder_op, params):
    """Mirror DecoderRNN.forward((target, encoder_op, None)).

    target:     (B, S) int32 token ids (only target[:, 0] is used)
    encoder_op: (1, B, H) initial GRU hidden state
    returns (log_probs (B, 7, V), logits (B, 7, V), None)
    """
    emb = params["embedding"]          # (V, H)
    w_ih = params["w_ih"]              # (3H, H)  gates: r, z, n
    w_hh = params["w_hh"]              # (3H, H)
    b_ih = params["b_ih"]              # (3H,)
    b_hh = params["b_hh"]              # (3H,)
    w_out = params["w_out"]            # (V, H)
    b_out = params["b_out"]            # (V,)

    V, H = emb.shape
    B = target.shape[0]
    Hp = _round_up(H, 128)
    Vp = _round_up(V, 128)
    Bp = _round_up(B, 8)

    # --- pad / relayout parameters (lane-dense, gate-aligned) ---
    emb_p = jnp.zeros((Vp, Hp), jnp.float32).at[:V, :H].set(emb.astype(jnp.float32))

    def pack_gates_T(w, b):
        wT_p = jnp.zeros((Hp, 3 * Hp), jnp.float32)
        b_p = jnp.zeros((1, 3 * Hp), jnp.float32)
        for g in range(3):
            wT_p = wT_p.at[:H, g * Hp:g * Hp + H].set(
                w[g * H:(g + 1) * H, :].astype(jnp.float32).T)
            b_p = b_p.at[0, g * Hp:g * Hp + H].set(
                b[g * H:(g + 1) * H].astype(jnp.float32))
        return wT_p, b_p

    wih_p, bih_p = pack_gates_T(w_ih, b_ih)
    whh_p, bhh_p = pack_gates_T(w_hh, b_hh)

    wout_p = jnp.zeros((Hp, Vp), jnp.float32).at[:H, :V].set(w_out.astype(jnp.float32).T)
    # huge negative bias in padded vocab columns so in-kernel argmax never picks them
    bout_p = jnp.full((1, Vp), -1e30, jnp.float32).at[0, :V].set(b_out.astype(jnp.float32))

    h0_p = jnp.zeros((Bp, Hp), jnp.float32).at[:B, :H].set(encoder_op[0].astype(jnp.float32))
    tok0 = jnp.zeros((Bp, 1), jnp.int32).at[:B, 0].set(target[:, 0].astype(jnp.int32))

    kernel = functools.partial(decoder_kernel, num_steps=MAX_LENGTH, hp=Hp, vp=Vp)
    vmem_spec = lambda: pl.BlockSpec(memory_space=pltpu.MemorySpace.VMEM)

    logits_pad, logprobs_pad = pl.pallas_call(
        kernel,
        out_shape=(jax.ShapeDtypeStruct((MAX_LENGTH, Bp, Vp), jnp.float32),
                   jax.ShapeDtypeStruct((MAX_LENGTH, Bp, Vp), jnp.float32)),
        in_specs=[vmem_spec() for _ in range(9)],
        out_specs=(vmem_spec(), vmem_spec()),
    )(tok0, h0_p, emb_p, wih_p, whh_p, bih_p, bhh_p, wout_p, bout_p)

    logits = jnp.transpose(logits_pad[:, :B, :V], (1, 0, 2))       # (B, T, V)
    log_probs = jnp.transpose(logprobs_pad[:, :B, :V], (1, 0, 2))  # (B, T, V)
    return log_probs, logits, None


def decoder_reference(target, encoder_op, params):
    """Pure-JAX replica of the PyTorch forward for verification."""
    emb = params["embedding"]
    w_ih, w_hh = params["w_ih"], params["w_hh"]
    b_ih, b_hh = params["b_ih"], params["b_hh"]
    w_out, b_out = params["w_out"], params["b_out"]
    V, H = emb.shape

    h = encoder_op[0]                  # (B, H)
    tok = target[:, 0]                 # (B,)
    outs = []
    for _ in range(MAX_LENGTH):
        x = jax.nn.relu(jnp.take(emb, tok, axis=0))
        gi = x @ w_ih.T + b_ih
        gh = h @ w_hh.T + b_hh
        r = jax.nn.sigmoid(gi[:, :H] + gh[:, :H])
        z = jax.nn.sigmoid(gi[:, H:2 * H] + gh[:, H:2 * H])
        n = jnp.tanh(gi[:, 2 * H:] + r * gh[:, 2 * H:])
        h = (1.0 - z) * n + z * h
        logits = h @ w_out.T + b_out
        outs.append(logits)
        tok = jnp.argmax(logits, axis=-1)
    logits = jnp.stack(outs, axis=1)   # (B, T, V)
    return jax.nn.log_softmax(logits, axis=-1), logits


if __name__ == "__main__":
    HIDDEN, OUTPUT_SIZE = 32, 13
    BATCH = 2

    key = jax.random.PRNGKey(0)
    ks = jax.random.split(key, 9)
    scale = 1.0 / jnp.sqrt(HIDDEN)
    params = {
        "embedding": jax.random.normal(ks[0], (OUTPUT_SIZE, HIDDEN), jnp.float32),
        "w_ih": jax.random.uniform(ks[1], (3 * HIDDEN, HIDDEN), jnp.float32, -scale, scale),
        "w_hh": jax.random.uniform(ks[2], (3 * HIDDEN, HIDDEN), jnp.float32, -scale, scale),
        "b_ih": jax.random.uniform(ks[3], (3 * HIDDEN,), jnp.float32, -scale, scale),
        "b_hh": jax.random.uniform(ks[4], (3 * HIDDEN,), jnp.float32, -scale, scale),
        "w_out": jax.random.uniform(ks[5], (OUTPUT_SIZE, HIDDEN), jnp.float32, -scale, scale),
        "b_out": jax.random.uniform(ks[6], (OUTPUT_SIZE,), jnp.float32, -scale, scale),
    }
    target = jax.random.randint(ks[7], (BATCH, MAX_LENGTH), 0, OUTPUT_SIZE, jnp.int32)
    encoder_op = jax.random.normal(ks[8], (1, BATCH, HIDDEN), jnp.float32)

    log_probs, logits, _ = jax.jit(decoder_rnn_forward)(target, encoder_op, params)
    jax.block_until_ready((log_probs, logits))

    assert logits.shape == (BATCH, MAX_LENGTH, OUTPUT_SIZE)
    assert log_probs.shape == (BATCH, MAX_LENGTH, OUTPUT_SIZE)

    # correctness check vs pure-JAX reference of the PyTorch forward
    ref_lp, ref_logits = decoder_reference(target, encoder_op, params)
    assert jnp.allclose(logits, ref_logits, atol=2e-4, rtol=2e-4), \
        float(jnp.max(jnp.abs(logits - ref_logits)))
    assert jnp.allclose(log_probs, ref_lp, atol=2e-4, rtol=2e-4), \
        float(jnp.max(jnp.abs(log_probs - ref_lp)))

    print("KERNEL_OK")
</pallas_src>

<mosaic_0001>
module attributes {stable_mosaic.version = 11 : i64} {
  func.func @decoder_kernel(%arg0: memref<8x1xi32, #tpu.memory_space<vmem>>, %arg1: memref<8x128xf32, #tpu.memory_space<vmem>>, %arg2: memref<128x128xf32, #tpu.memory_space<vmem>>, %arg3: memref<128x384xf32, #tpu.memory_space<vmem>>, %arg4: memref<128x384xf32, #tpu.memory_space<vmem>>, %arg5: memref<1x384xf32, #tpu.memory_space<vmem>>, %arg6: memref<1x384xf32, #tpu.memory_space<vmem>>, %arg7: memref<128x128xf32, #tpu.memory_space<vmem>>, %arg8: memref<1x128xf32, #tpu.memory_space<vmem>>, %arg9: memref<7x8x128xf32, #tpu.memory_space<vmem>>, %arg10: memref<7x8x128xf32, #tpu.memory_space<vmem>>) attributes {dimension_semantics = [], scalar_prefetch = 0 : i64, scratch_operands = 0 : i64, tpu.core_type = #tpu.core_type<tc>} {
    %c0 = arith.constant 0 : index
    %c0_0 = arith.constant 0 : index
    %0 = vector.load %arg2[%c0, %c0_0] : memref<128x128xf32, #tpu.memory_space<vmem>>, vector<128x128xf32>
    %c0_1 = arith.constant 0 : index
    %c0_2 = arith.constant 0 : index
    %1 = vector.load %arg3[%c0_1, %c0_2] : memref<128x384xf32, #tpu.memory_space<vmem>>, vector<128x384xf32>
    %c0_3 = arith.constant 0 : index
    %c0_4 = arith.constant 0 : index
    %2 = vector.load %arg4[%c0_3, %c0_4] : memref<128x384xf32, #tpu.memory_space<vmem>>, vector<128x384xf32>
    %c0_5 = arith.constant 0 : index
    %c0_6 = arith.constant 0 : index
    %3 = vector.load %arg5[%c0_5, %c0_6] : memref<1x384xf32, #tpu.memory_space<vmem>>, vector<1x384xf32>
    %c0_7 = arith.constant 0 : index
    %c0_8 = arith.constant 0 : index
    %4 = vector.load %arg6[%c0_7, %c0_8] : memref<1x384xf32, #tpu.memory_space<vmem>>, vector<1x384xf32>
    %c0_9 = arith.constant 0 : index
    %c0_10 = arith.constant 0 : index
    %5 = vector.load %arg7[%c0_9, %c0_10] : memref<128x128xf32, #tpu.memory_space<vmem>>, vector<128x128xf32>
    %c0_11 = arith.constant 0 : index
    %c0_12 = arith.constant 0 : index
    %6 = vector.load %arg8[%c0_11, %c0_12] : memref<1x128xf32, #tpu.memory_space<vmem>>, vector<1x128xf32>
    %c0_13 = arith.constant 0 : index
    %c0_14 = arith.constant 0 : index
    %7 = vector.load %arg1[%c0_13, %c0_14] : memref<8x128xf32, #tpu.memory_space<vmem>>, vector<8x128xf32>
    %8 = tpu.iota {dimensions = array<i32: 1>} : vector<8x128xi32>
    %9 = arith.sitofp %8 : vector<8x128xi32> to vector<8x128xf32>
    %c0_15 = arith.constant 0 : index
    %c0_16 = arith.constant 0 : index
    %10 = vector.load %arg0[%c0_15, %c0_16] : memref<8x1xi32, #tpu.memory_space<vmem>>, vector<8x1xi32>
    %11 = vector.broadcast %10 : vector<8x1xi32> to vector<8x128xi32>
    %12 = arith.cmpi eq, %8, %11 : vector<8x128xi32>
    %13 = arith.extui %12 : vector<8x128xi1> to vector<8x128xi32>
    %14 = arith.sitofp %13 : vector<8x128xi32> to vector<8x128xf32>
    %cst = arith.constant dense<0.000000e+00> : vector<8x128xf32>
    %15 = tpu.matmul %14, %0, %cst {dimension_numbers = #tpu.dot_dimension_numbers<[1], [0], [0], [1], [0, 0, 1, 1], [], []>} : vector<8x128xf32>, vector<128x128xf32>, vector<8x128xf32> -> vector<8x128xf32>
    %cst_17 = arith.constant 0.000000e+00 : f32
    %16 = vector.broadcast %cst_17 : f32 to vector<8x128xf32>
    %17 = arith.maximumf %15, %16 : vector<8x128xf32>
    %cst_18 = arith.constant dense<0.000000e+00> : vector<8x384xf32>
    %18 = tpu.matmul %17, %1, %cst_18 {dimension_numbers = #tpu.dot_dimension_numbers<[1], [0], [0], [1], [0, 0, 1, 1], [], []>} : vector<8x128xf32>, vector<128x384xf32>, vector<8x384xf32> -> vector<8x384xf32>
    %19 = vector.broadcast %3 : vector<1x384xf32> to vector<8x384xf32>
    %20 = arith.addf %18, %19 : vector<8x384xf32>
    %cst_19 = arith.constant dense<0.000000e+00> : vector<8x384xf32>
    %21 = tpu.matmul %7, %2, %cst_19 {dimension_numbers = #tpu.dot_dimension_numbers<[1], [0], [0], [1], [0, 0, 1, 1], [], []>} : vector<8x128xf32>, vector<128x384xf32>, vector<8x384xf32> -> vector<8x384xf32>
    %22 = vector.broadcast %4 : vector<1x384xf32> to vector<8x384xf32>
    %23 = arith.addf %21, %22 : vector<8x384xf32>
    %24 = vector.extract_strided_slice %20 {offsets = [0, 0], sizes = [8, 128], strides = [1, 1]} : vector<8x384xf32> to vector<8x128xf32>
    %25 = vector.extract_strided_slice %23 {offsets = [0, 0], sizes = [8, 128], strides = [1, 1]} : vector<8x384xf32> to vector<8x128xf32>
    %26 = arith.addf %24, %25 : vector<8x128xf32>
    %27 = arith.negf %26 : vector<8x128xf32>
    %28 = math.exp %27 : vector<8x128xf32>
    %cst_20 = arith.constant 1.000000e+00 : f32
    %29 = vector.broadcast %cst_20 : f32 to vector<8x128xf32>
    %30 = arith.addf %29, %28 : vector<8x128xf32>
    %31 = arith.divf %29, %30 : vector<8x128xf32>
    %32 = vector.extract_strided_slice %20 {offsets = [0, 128], sizes = [8, 128], strides = [1, 1]} : vector<8x384xf32> to vector<8x128xf32>
    %33 = vector.extract_strided_slice %23 {offsets = [0, 128], sizes = [8, 128], strides = [1, 1]} : vector<8x384xf32> to vector<8x128xf32>
    %34 = arith.addf %32, %33 : vector<8x128xf32>
    %35 = arith.negf %34 : vector<8x128xf32>
    %36 = math.exp %35 : vector<8x128xf32>
    %cst_21 = arith.constant 1.000000e+00 : f32
    %37 = vector.broadcast %cst_21 : f32 to vector<8x128xf32>
    %38 = arith.addf %37, %36 : vector<8x128xf32>
    %39 = arith.divf %37, %38 : vector<8x128xf32>
    %40 = vector.extract_strided_slice %20 {offsets = [0, 256], sizes = [8, 128], strides = [1, 1]} : vector<8x384xf32> to vector<8x128xf32>
    %41 = vector.extract_strided_slice %23 {offsets = [0, 256], sizes = [8, 128], strides = [1, 1]} : vector<8x384xf32> to vector<8x128xf32>
    %42 = arith.mulf %31, %41 : vector<8x128xf32>
    %43 = arith.addf %40, %42 : vector<8x128xf32>
    %44 = math.tanh %43 : vector<8x128xf32>
    %cst_22 = arith.constant 1.000000e+00 : f32
    %45 = vector.broadcast %cst_22 : f32 to vector<8x128xf32>
    %46 = arith.subf %45, %39 : vector<8x128xf32>
    %47 = arith.mulf %46, %44 : vector<8x128xf32>
    %48 = arith.mulf %39, %7 : vector<8x128xf32>
    %49 = arith.addf %47, %48 : vector<8x128xf32>
    %cst_23 = arith.constant dense<0.000000e+00> : vector<8x128xf32>
    %50 = tpu.matmul %49, %5, %cst_23 {dimension_numbers = #tpu.dot_dimension_numbers<[1], [0], [0], [1], [0, 0, 1, 1], [], []>} : vector<8x128xf32>, vector<128x128xf32>, vector<8x128xf32> -> vector<8x128xf32>
    %51 = vector.broadcast %6 : vector<1x128xf32> to vector<8x128xf32>
    %52 = arith.addf %50, %51 : vector<8x128xf32>
    %c0_24 = arith.constant 0 : index
    %c0_25 = arith.constant 0 : index
    %c0_26 = arith.constant 0 : index
    %53 = vector.load %arg9[%c0_24, %c0_25, %c0_26] : memref<7x8x128xf32, #tpu.memory_space<vmem>>, vector<1x8x128xf32>
    %54 = vector.shape_cast %53 : vector<1x8x128xf32> to vector<8x128xf32>
    %55 = vector.shape_cast %52 : vector<8x128xf32> to vector<1x8x128xf32>
    tpu.vector_store %arg9[%c0_24, %c0_25, %c0_26], %55 {strides = array<i32>} : memref<7x8x128xf32, #tpu.memory_space<vmem>>, vector<1x8x128xf32>,
    %cst_27 = arith.constant dense<0xFF800000> : vector<8xf32>
    %56 = vector.multi_reduction <maximumf>, %52, %cst_27 [1] : vector<8x128xf32> to vector<8xf32>
    %57 = vector.shape_cast %56 : vector<8xf32> to vector<8x1xf32>
    %58 = vector.broadcast %57 : vector<8x1xf32> to vector<8x128xf32>
    %59 = arith.subf %52, %58 : vector<8x128xf32>
    %60 = math.exp %59 : vector<8x128xf32>
    %cst_28 = arith.constant dense<0.000000e+00> : vector<8xf32>
    %61 = vector.multi_reduction <add>, %60, %cst_28 [1] : vector<8x128xf32> to vector<8xf32>
    %62 = vector.shape_cast %61 : vector<8xf32> to vector<8x1xf32>
    %63 = math.log %62 : vector<8x1xf32>
    %64 = arith.addf %57, %63 : vector<8x1xf32>
    %65 = vector.broadcast %64 : vector<8x1xf32> to vector<8x128xf32>
    %66 = arith.subf %52, %65 : vector<8x128xf32>
    %c0_29 = arith.constant 0 : index
    %c0_30 = arith.constant 0 : index
    %c0_31 = arith.constant 0 : index
    %67 = vector.load %arg10[%c0_29, %c0_30, %c0_31] : memref<7x8x128xf32, #tpu.memory_space<vmem>>, vector<1x8x128xf32>
    %68 = vector.shape_cast %67 : vector<1x8x128xf32> to vector<8x128xf32>
    %69 = vector.shape_cast %66 : vector<8x128xf32> to vector<1x8x128xf32>
    tpu.vector_store %arg10[%c0_29, %c0_30, %c0_31], %69 {strides = array<i32>} : memref<7x8x128xf32, #tpu.memory_space<vmem>>, vector<1x8x128xf32>,
    %70 = vector.broadcast %57 : vector<8x1xf32> to vector<8x128xf32>
    %71 = arith.cmpf oeq, %52, %70 : vector<8x128xf32>
    %cst_32 = arith.constant 1.280000e+02 : f32
    %72 = vector.broadcast %cst_32 : f32 to vector<8x128xf32>
    %73 = arith.select %71, %9, %72 : vector<8x128xi1>, vector<8x128xf32>
    %cst_33 = arith.constant dense<0x7F800000> : vector<8xf32>
    %74 = vector.multi_reduction <minimumf>, %73, %cst_33 [1] : vector<8x128xf32> to vector<8xf32>
    %75 = vector.shape_cast %74 : vector<8xf32> to vector<8x1xf32>
    %76 = vector.broadcast %75 : vector<8x1xf32> to vector<8x128xf32>
    %77 = arith.cmpf oeq, %9, %76 : vector<8x128xf32>
    %78 = arith.extui %77 : vector<8x128xi1> to vector<8x128xi32>
    %79 = arith.sitofp %78 : vector<8x128xi32> to vector<8x128xf32>
    %cst_34 = arith.constant dense<0.000000e+00> : vector<8x128xf32>
    %80 = tpu.matmul %79, %0, %cst_34 {dimension_numbers = #tpu.dot_dimension_numbers<[1], [0], [0], [1], [0, 0, 1, 1], [], []>} : vector<8x128xf32>, vector<128x128xf32>, vector<8x128xf32> -> vector<8x128xf32>
    %cst_35 = arith.constant 0.000000e+00 : f32
    %81 = vector.broadcast %cst_35 : f32 to vector<8x128xf32>
    %82 = arith.maximumf %80, %81 : vector<8x128xf32>
    %cst_36 = arith.constant dense<0.000000e+00> : vector<8x384xf32>
    %83 = tpu.matmul %82, %1, %cst_36 {dimension_numbers = #tpu.dot_dimension_numbers<[1], [0], [0], [1], [0, 0, 1, 1], [], []>} : vector<8x128xf32>, vector<128x384xf32>, vector<8x384xf32> -> vector<8x384xf32>
    %84 = vector.broadcast %3 : vector<1x384xf32> to vector<8x384xf32>
    %85 = arith.addf %83, %84 : vector<8x384xf32>
    %cst_37 = arith.constant dense<0.000000e+00> : vector<8x384xf32>
    %86 = tpu.matmul %49, %2, %cst_37 {dimension_numbers = #tpu.dot_dimension_numbers<[1], [0], [0], [1], [0, 0, 1, 1], [], []>} : vector<8x128xf32>, vector<128x384xf32>, vector<8x384xf32> -> vector<8x384xf32>
    %87 = vector.broadcast %4 : vector<1x384xf32> to vector<8x384xf32>
    %88 = arith.addf %86, %87 : vector<8x384xf32>
    %89 = vector.extract_strided_slice %85 {offsets = [0, 0], sizes = [8, 128], strides = [1, 1]} : vector<8x384xf32> to vector<8x128xf32>
    %90 = vector.extract_strided_slice %88 {offsets = [0, 0], sizes = [8, 128], strides = [1, 1]} : vector<8x384xf32> to vector<8x128xf32>
    %91 = arith.addf %89, %90 : vector<8x128xf32>
    %92 = arith.negf %91 : vector<8x128xf32>
    %93 = math.exp %92 : vector<8x128xf32>
    %cst_38 = arith.constant 1.000000e+00 : f32
    %94 = vector.broadcast %cst_38 : f32 to vector<8x128xf32>
    %95 = arith.addf %94, %93 : vector<8x128xf32>
    %96 = arith.divf %94, %95 : vector<8x128xf32>
    %97 = vector.extract_strided_slice %85 {offsets = [0, 128], sizes = [8, 128], strides = [1, 1]} : vector<8x384xf32> to vector<8x128xf32>
    %98 = vector.extract_strided_slice %88 {offsets = [0, 128], sizes = [8, 128], strides = [1, 1]} : vector<8x384xf32> to vector<8x128xf32>
    %99 = arith.addf %97, %98 : vector<8x128xf32>
    %100 = arith.negf %99 : vector<8x128xf32>
    %101 = math.exp %100 : vector<8x128xf32>
    %cst_39 = arith.constant 1.000000e+00 : f32
    %102 = vector.broadcast %cst_39 : f32 to vector<8x128xf32>
    %103 = arith.addf %102, %101 : vector<8x128xf32>
    %104 = arith.divf %102, %103 : vector<8x128xf32>
    %105 = vector.extract_strided_slice %85 {offsets = [0, 256], sizes = [8, 128], strides = [1, 1]} : vector<8x384xf32> to vector<8x128xf32>
    %106 = vector.extract_strided_slice %88 {offsets = [0, 256], sizes = [8, 128], strides = [1, 1]} : vector<8x384xf32> to vector<8x128xf32>
    %107 = arith.mulf %96, %106 : vector<8x128xf32>
    %108 = arith.addf %105, %107 : vector<8x128xf32>
    %109 = math.tanh %108 : vector<8x128xf32>
    %cst_40 = arith.constant 1.000000e+00 : f32
    %110 = vector.broadcast %cst_40 : f32 to vector<8x128xf32>
    %111 = arith.subf %110, %104 : vector<8x128xf32>
    %112 = arith.mulf %111, %109 : vector<8x128xf32>
    %113 = arith.mulf %104, %49 : vector<8x128xf32>
    %114 = arith.addf %112, %113 : vector<8x128xf32>
    %cst_41 = arith.constant dense<0.000000e+00> : vector<8x128xf32>
    %115 = tpu.matmul %114, %5, %cst_41 {dimension_numbers = #tpu.dot_dimension_numbers<[1], [0], [0], [1], [0, 0, 1, 1], [], []>} : vector<8x128xf32>, vector<128x128xf32>, vector<8x128xf32> -> vector<8x128xf32>
    %116 = vector.broadcast %6 : vector<1x128xf32> to vector<8x128xf32>
    %117 = arith.addf %115, %116 : vector<8x128xf32>
    %c1 = arith.constant 1 : index
    %c0_42 = arith.constant 0 : index
    %c0_43 = arith.constant 0 : index
    %118 = vector.load %arg9[%c1, %c0_42, %c0_43] : memref<7x8x128xf32, #tpu.memory_space<vmem>>, vector<1x8x128xf32>
    %119 = vector.shape_cast %118 : vector<1x8x128xf32> to vector<8x128xf32>
    %120 = vector.shape_cast %117 : vector<8x128xf32> to vector<1x8x128xf32>
    tpu.vector_store %arg9[%c1, %c0_42, %c0_43], %120 {strides = array<i32>} : memref<7x8x128xf32, #tpu.memory_space<vmem>>, vector<1x8x128xf32>,
    %cst_44 = arith.constant dense<0xFF800000> : vector<8xf32>
    %121 = vector.multi_reduction <maximumf>, %117, %cst_44 [1] : vector<8x128xf32> to vector<8xf32>
    %122 = vector.shape_cast %121 : vector<8xf32> to vector<8x1xf32>
    %123 = vector.broadcast %122 : vector<8x1xf32> to vector<8x128xf32>
    %124 = arith.subf %117, %123 : vector<8x128xf32>
    %125 = math.exp %124 : vector<8x128xf32>
    %cst_45 = arith.constant dense<0.000000e+00> : vector<8xf32>
    %126 = vector.multi_reduction <add>, %125, %cst_45 [1] : vector<8x128xf32> to vector<8xf32>
    %127 = vector.shape_cast %126 : vector<8xf32> to vector<8x1xf32>
    %128 = math.log %127 : vector<8x1xf32>
    %129 = arith.addf %122, %128 : vector<8x1xf32>
    %130 = vector.broadcast %129 : vector<8x1xf32> to vector<8x128xf32>
    %131 = arith.subf %117, %130 : vector<8x128xf32>
    %c1_46 = arith.constant 1 : index
    %c0_47 = arith.constant 0 : index
    %c0_48 = arith.constant 0 : index
    %132 = vector.load %arg10[%c1_46, %c0_47, %c0_48] : memref<7x8x128xf32, #tpu.memory_space<vmem>>, vector<1x8x128xf32>
    %133 = vector.shape_cast %132 : vector<1x8x128xf32> to vector<8x128xf32>
    %134 = vector.shape_cast %131 : vector<8x128xf32> to vector<1x8x128xf32>
    tpu.vector_store %arg10[%c1_46, %c0_47, %c0_48], %134 {strides = array<i32>} : memref<7x8x128xf32, #tpu.memory_space<vmem>>, vector<1x8x128xf32>,
    %135 = vector.broadcast %122 : vector<8x1xf32> to vector<8x128xf32>
    %136 = arith.cmpf oeq, %117, %135 : vector<8x128xf32>
    %cst_49 = arith.constant 1.280000e+02 : f32
    %137 = vector.broadcast %cst_49 : f32 to vector<8x128xf32>
    %138 = arith.select %136, %9, %137 : vector<8x128xi1>, vector<8x128xf32>
    %cst_50 = arith.constant dense<0x7F800000> : vector<8xf32>
    %139 = vector.multi_reduction <minimumf>, %138, %cst_50 [1] : vector<8x128xf32> to vector<8xf32>
    %140 = vector.shape_cast %139 : vector<8xf32> to vector<8x1xf32>
    %141 = vector.broadcast %140 : vector<8x1xf32> to vector<8x128xf32>
    %142 = arith.cmpf oeq, %9, %141 : vector<8x128xf32>
    %143 = arith.extui %142 : vector<8x128xi1> to vector<8x128xi32>
    %144 = arith.sitofp %143 : vector<8x128xi32> to vector<8x128xf32>
    %cst_51 = arith.constant dense<0.000000e+00> : vector<8x128xf32>
    %145 = tpu.matmul %144, %0, %cst_51 {dimension_numbers = #tpu.dot_dimension_numbers<[1], [0], [0], [1], [0, 0, 1, 1], [], []>} : vector<8x128xf32>, vector<128x128xf32>, vector<8x128xf32> -> vector<8x128xf32>
    %cst_52 = arith.constant 0.000000e+00 : f32
    %146 = vector.broadcast %cst_52 : f32 to vector<8x128xf32>
    %147 = arith.maximumf %145, %146 : vector<8x128xf32>
    %cst_53 = arith.constant dense<0.000000e+00> : vector<8x384xf32>
    %148 = tpu.matmul %147, %1, %cst_53 {dimension_numbers = #tpu.dot_dimension_numbers<[1], [0], [0], [1], [0, 0, 1, 1], [], []>} : vector<8x128xf32>, vector<128x384xf32>, vector<8x384xf32> -> vector<8x384xf32>
    %149 = vector.broadcast %3 : vector<1x384xf32> to vector<8x384xf32>
    %150 = arith.addf %148, %149 : vector<8x384xf32>
    %cst_54 = arith.constant dense<0.000000e+00> : vector<8x384xf32>
    %151 = tpu.matmul %114, %2, %cst_54 {dimension_numbers = #tpu.dot_dimension_numbers<[1], [0], [0], [1], [0, 0, 1, 1], [], []>} : vector<8x128xf32>, vector<128x384xf32>, vector<8x384xf32> -> vector<8x384xf32>
    %152 = vector.broadcast %4 : vector<1x384xf32> to vector<8x384xf32>
    %153 = arith.addf %151, %152 : vector<8x384xf32>
    %154 = vector.extract_strided_slice %150 {offsets = [0, 0], sizes = [8, 128], strides = [1, 1]} : vector<8x384xf32> to vector<8x128xf32>
    %155 = vector.extract_strided_slice %153 {offsets = [0, 0], sizes = [8, 128], strides = [1, 1]} : vector<8x384xf32> to vector<8x128xf32>
    %156 = arith.addf %154, %155 : vector<8x128xf32>
    %157 = arith.negf %156 : vector<8x128xf32>
    %158 = math.exp %157 : vector<8x128xf32>
    %cst_55 = arith.constant 1.000000e+00 : f32
    %159 = vector.broadcast %cst_55 : f32 to vector<8x128xf32>
    %160 = arith.addf %159, %158 : vector<8x128xf32>
    %161 = arith.divf %159, %160 : vector<8x128xf32>
    %162 = vector.extract_strided_slice %150 {offsets = [0, 128], sizes = [8, 128], strides = [1, 1]} : vector<8x384xf32> to vector<8x128xf32>
    %163 = vector.extract_strided_slice %153 {offsets = [0, 128], sizes = [8, 128], strides = [1, 1]} : vector<8x384xf32> to vector<8x128xf32>
    %164 = arith.addf %162, %163 : vector<8x128xf32>
    %165 = arith.negf %164 : vector<8x128xf32>
    %166 = math.exp %165 : vector<8x128xf32>
    %cst_56 = arith.constant 1.000000e+00 : f32
    %167 = vector.broadcast %cst_56 : f32 to vector<8x128xf32>
    %168 = arith.addf %167, %166 : vector<8x128xf32>
    %169 = arith.divf %167, %168 : vector<8x128xf32>
    %170 = vector.extract_strided_slice %150 {offsets = [0, 256], sizes = [8, 128], strides = [1, 1]} : vector<8x384xf32> to vector<8x128xf32>
    %171 = vector.extract_strided_slice %153 {offsets = [0, 256], sizes = [8, 128], strides = [1, 1]} : vector<8x384xf32> to vector<8x128xf32>
    %172 = arith.mulf %161, %171 : vector<8x128xf32>
    %173 = arith.addf %170, %172 : vector<8x128xf32>
    %174 = math.tanh %173 : vector<8x128xf32>
    %cst_57 = arith.constant 1.000000e+00 : f32
    %175 = vector.broadcast %cst_57 : f32 to vector<8x128xf32>
    %176 = arith.subf %175, %169 : vector<8x128xf32>
    %177 = arith.mulf %176, %174 : vector<8x128xf32>
    %178 = arith.mulf %169, %114 : vector<8x128xf32>
    %179 = arith.addf %177, %178 : vector<8x128xf32>
    %cst_58 = arith.constant dense<0.000000e+00> : vector<8x128xf32>
    %180 = tpu.matmul %179, %5, %cst_58 {dimension_numbers = #tpu.dot_dimension_numbers<[1], [0], [0], [1], [0, 0, 1, 1], [], []>} : vector<8x128xf32>, vector<128x128xf32>, vector<8x128xf32> -> vector<8x128xf32>
    %181 = vector.broadcast %6 : vector<1x128xf32> to vector<8x128xf32>
    %182 = arith.addf %180, %181 : vector<8x128xf32>
    %c2 = arith.constant 2 : index
    %c0_59 = arith.constant 0 : index
    %c0_60 = arith.constant 0 : index
    %183 = vector.load %arg9[%c2, %c0_59, %c0_60] : memref<7x8x128xf32, #tpu.memory_space<vmem>>, vector<1x8x128xf32>
    %184 = vector.shape_cast %183 : vector<1x8x128xf32> to vector<8x128xf32>
    %185 = vector.shape_cast %182 : vector<8x128xf32> to vector<1x8x128xf32>
    tpu.vector_store %arg9[%c2, %c0_59, %c0_60], %185 {strides = array<i32>} : memref<7x8x128xf32, #tpu.memory_space<vmem>>, vector<1x8x128xf32>,
    %cst_61 = arith.constant dense<0xFF800000> : vector<8xf32>
    %186 = vector.multi_reduction <maximumf>, %182, %cst_61 [1] : vector<8x128xf32> to vector<8xf32>
    %187 = vector.shape_cast %186 : vector<8xf32> to vector<8x1xf32>
    %188 = vector.broadcast %187 : vector<8x1xf32> to vector<8x128xf32>
    %189 = arith.subf %182, %188 : vector<8x128xf32>
    %190 = math.exp %189 : vector<8x128xf32>
    %cst_62 = arith.constant dense<0.000000e+00> : vector<8xf32>
    %191 = vector.multi_reduction <add>, %190, %cst_62 [1] : vector<8x128xf32> to vector<8xf32>
    %192 = vector.shape_cast %191 : vector<8xf32> to vector<8x1xf32>
    %193 = math.log %192 : vector<8x1xf32>
    %194 = arith.addf %187, %193 : vector<8x1xf32>
    %195 = vector.broadcast %194 : vector<8x1xf32> to vector<8x128xf32>
    %196 = arith.subf %182, %195 : vector<8x128xf32>
    %c2_63 = arith.constant 2 : index
    %c0_64 = arith.constant 0 : index
    %c0_65 = arith.constant 0 : index
    %197 = vector.load %arg10[%c2_63, %c0_64, %c0_65] : memref<7x8x128xf32, #tpu.memory_space<vmem>>, vector<1x8x128xf32>
    %198 = vector.shape_cast %197 : vector<1x8x128xf32> to vector<8x128xf32>
    %199 = vector.shape_cast %196 : vector<8x128xf32> to vector<1x8x128xf32>
    tpu.vector_store %arg10[%c2_63, %c0_64, %c0_65], %199 {strides = array<i32>} : memref<7x8x128xf32, #tpu.memory_space<vmem>>, vector<1x8x128xf32>,
    %200 = vector.broadcast %187 : vector<8x1xf32> to vector<8x128xf32>
    %201 = arith.cmpf oeq, %182, %200 : vector<8x128xf32>
    %cst_66 = arith.constant 1.280000e+02 : f32
    %202 = vector.broadcast %cst_66 : f32 to vector<8x128xf32>
    %203 = arith.select %201, %9, %202 : vector<8x128xi1>, vector<8x128xf32>
    %cst_67 = arith.constant dense<0x7F800000> : vector<8xf32>
    %204 = vector.multi_reduction <minimumf>, %203, %cst_67 [1] : vector<8x128xf32> to vector<8xf32>
    %205 = vector.shape_cast %204 : vector<8xf32> to vector<8x1xf32>
    %206 = vector.broadcast %205 : vector<8x1xf32> to vector<8x128xf32>
    %207 = arith.cmpf oeq, %9, %206 : vector<8x128xf32>
    %208 = arith.extui %207 : vector<8x128xi1> to vector<8x128xi32>
    %209 = arith.sitofp %208 : vector<8x128xi32> to vector<8x128xf32>
    %cst_68 = arith.constant dense<0.000000e+00> : vector<8x128xf32>
    %210 = tpu.matmul %209, %0, %cst_68 {dimension_numbers = #tpu.dot_dimension_numbers<[1], [0], [0], [1], [0, 0, 1, 1], [], []>} : vector<8x128xf32>, vector<128x128xf32>, vector<8x128xf32> -> vector<8x128xf32>
    %cst_69 = arith.constant 0.000000e+00 : f32
    %211 = vector.broadcast %cst_69 : f32 to vector<8x128xf32>
    %212 = arith.maximumf %210, %211 : vector<8x128xf32>
    %cst_70 = arith.constant dense<0.000000e+00> : vector<8x384xf32>
    %213 = tpu.matmul %212, %1, %cst_70 {dimension_numbers = #tpu.dot_dimension_numbers<[1], [0], [0], [1], [0, 0, 1, 1], [], []>} : vector<8x128xf32>, vector<128x384xf32>, vector<8x384xf32> -> vector<8x384xf32>
    %214 = vector.broadcast %3 : vector<1x384xf32> to vector<8x384xf32>
    %215 = arith.addf %213, %214 : vector<8x384xf32>
    %cst_71 = arith.constant dense<0.000000e+00> : vector<8x384xf32>
    %216 = tpu.matmul %179, %2, %cst_71 {dimension_numbers = #tpu.dot_dimension_numbers<[1], [0], [0], [1], [0, 0, 1, 1], [], []>} : vector<8x128xf32>, vector<128x384xf32>, vector<8x384xf32> -> vector<8x384xf32>
    %217 = vector.broadcast %4 : vector<1x384xf32> to vector<8x384xf32>
    %218 = arith.addf %216, %217 : vector<8x384xf32>
    %219 = vector.extract_strided_slice %215 {offsets = [0, 0], sizes = [8, 128], strides = [1, 1]} : vector<8x384xf32> to vector<8x128xf32>
    %220 = vector.extract_strided_slice %218 {offsets = [0, 0], sizes = [8, 128], strides = [1, 1]} : vector<8x384xf32> to vector<8x128xf32>
    %221 = arith.addf %219, %220 : vector<8x128xf32>
    %222 = arith.negf %221 : vector<8x128xf32>
    %223 = math.exp %222 : vector<8x128xf32>
    %cst_72 = arith.constant 1.000000e+00 : f32
    %224 = vector.broadcast %cst_72 : f32 to vector<8x128xf32>
    %225 = arith.addf %224, %223 : vector<8x128xf32>
    %226 = arith.divf %224, %225 : vector<8x128xf32>
    %227 = vector.extract_strided_slice %215 {offsets = [0, 128], sizes = [8, 128], strides = [1, 1]} : vector<8x384xf32> to vector<8x128xf32>
    %228 = vector.extract_strided_slice %218 {offsets = [0, 128], sizes = [8, 128], strides = [1, 1]} : vector<8x384xf32> to vector<8x128xf32>
    %229 = arith.addf %227, %228 : vector<8x128xf32>
    %230 = arith.negf %229 : vector<8x128xf32>
    %231 = math.exp %230 : vector<8x128xf32>
    %cst_73 = arith.constant 1.000000e+00 : f32
    %232 = vector.broadcast %cst_73 : f32 to vector<8x128xf32>
    %233 = arith.addf %232, %231 : vector<8x128xf32>
    %234 = arith.divf %232, %233 : vector<8x128xf32>
    %235 = vector.extract_strided_slice %215 {offsets = [0, 256], sizes = [8, 128], strides = [1, 1]} : vector<8x384xf32> to vector<8x128xf32>
    %236 = vector.extract_strided_slice %218 {offsets = [0, 256], sizes = [8, 128], strides = [1, 1]} : vector<8x384xf32> to vector<8x128xf32>
    %237 = arith.mulf %226, %236 : vector<8x128xf32>
    %238 = arith.addf %235, %237 : vector<8x128xf32>
    %239 = math.tanh %238 : vector<8x128xf32>
    %cst_74 = arith.constant 1.000000e+00 : f32
    %240 = vector.broadcast %cst_74 : f32 to vector<8x128xf32>
    %241 = arith.subf %240, %234 : vector<8x128xf32>
    %242 = arith.mulf %241, %239 : vector<8x128xf32>
    %243 = arith.mulf %234, %179 : vector<8x128xf32>
    %244 = arith.addf %242, %243 : vector<8x128xf32>
    %cst_75 = arith.constant dense<0.000000e+00> : vector<8x128xf32>
    %245 = tpu.matmul %244, %5, %cst_75 {dimension_numbers = #tpu.dot_dimension_numbers<[1], [0], [0], [1], [0, 0, 1, 1], [], []>} : vector<8x128xf32>, vector<128x128xf32>, vector<8x128xf32> -> vector<8x128xf32>
    %246 = vector.broadcast %6 : vector<1x128xf32> to vector<8x128xf32>
    %247 = arith.addf %245, %246 : vector<8x128xf32>
    %c3 = arith.constant 3 : index
    %c0_76 = arith.constant 0 : index
    %c0_77 = arith.constant 0 : index
    %248 = vector.load %arg9[%c3, %c0_76, %c0_77] : memref<7x8x128xf32, #tpu.memory_space<vmem>>, vector<1x8x128xf32>
    %249 = vector.shape_cast %248 : vector<1x8x128xf32> to vector<8x128xf32>
    %250 = vector.shape_cast %247 : vector<8x128xf32> to vector<1x8x128xf32>
    tpu.vector_store %arg9[%c3, %c0_76, %c0_77], %250 {strides = array<i32>} : memref<7x8x128xf32, #tpu.memory_space<vmem>>, vector<1x8x128xf32>,
    %cst_78 = arith.constant dense<0xFF800000> : vector<8xf32>
    %251 = vector.multi_reduction <maximumf>, %247, %cst_78 [1] : vector<8x128xf32> to vector<8xf32>
    %252 = vector.shape_cast %251 : vector<8xf32> to vector<8x1xf32>
    %253 = vector.broadcast %252 : vector<8x1xf32> to vector<8x128xf32>
    %254 = arith.subf %247, %253 : vector<8x128xf32>
    %255 = math.exp %254 : vector<8x128xf32>
    %cst_79 = arith.constant dense<0.000000e+00> : vector<8xf32>
    %256 = vector.multi_reduction <add>, %255, %cst_79 [1] : vector<8x128xf32> to vector<8xf32>
    %257 = vector.shape_cast %256 : vector<8xf32> to vector<8x1xf32>
    %258 = math.log %257 : vector<8x1xf32>
    %259 = arith.addf %252, %258 : vector<8x1xf32>
    %260 = vector.broadcast %259 : vector<8x1xf32> to vector<8x128xf32>
    %261 = arith.subf %247, %260 : vector<8x128xf32>
    %c3_80 = arith.constant 3 : index
    %c0_81 = arith.constant 0 : index
    %c0_82 = arith.constant 0 : index
    %262 = vector.load %arg10[%c3_80, %c0_81, %c0_82] : memref<7x8x128xf32, #tpu.memory_space<vmem>>, vector<1x8x128xf32>
    %263 = vector.shape_cast %262 : vector<1x8x128xf32> to vector<8x128xf32>
    %264 = vector.shape_cast %261 : vector<8x128xf32> to vector<1x8x128xf32>
    tpu.vector_store %arg10[%c3_80, %c0_81, %c0_82], %264 {strides = array<i32>} : memref<7x8x128xf32, #tpu.memory_space<vmem>>, vector<1x8x128xf32>,
    %265 = vector.broadcast %252 : vector<8x1xf32> to vector<8x128xf32>
    %266 = arith.cmpf oeq, %247, %265 : vector<8x128xf32>
    %cst_83 = arith.constant 1.280000e+02 : f32
    %267 = vector.broadcast %cst_83 : f32 to vector<8x128xf32>
    %268 = arith.select %266, %9, %267 : vector<8x128xi1>, vector<8x128xf32>
    %cst_84 = arith.constant dense<0x7F800000> : vector<8xf32>
    %269 = vector.multi_reduction <minimumf>, %268, %cst_84 [1] : vector<8x128xf32> to vector<8xf32>
    %270 = vector.shape_cast %269 : vector<8xf32> to vector<8x1xf32>
    %271 = vector.broadcast %270 : vector<8x1xf32> to vector<8x128xf32>
    %272 = arith.cmpf oeq, %9, %271 : vector<8x128xf32>
    %273 = arith.extui %272 : vector<8x128xi1> to vector<8x128xi32>
    %274 = arith.sitofp %273 : vector<8x128xi32> to vector<8x128xf32>
    %cst_85 = arith.constant dense<0.000000e+00> : vector<8x128xf32>
    %275 = tpu.matmul %274, %0, %cst_85 {dimension_numbers = #tpu.dot_dimension_numbers<[1], [0], [0], [1], [0, 0, 1, 1], [], []>} : vector<8x128xf32>, vector<128x128xf32>, vector<8x128xf32> -> vector<8x128xf32>
    %cst_86 = arith.constant 0.000000e+00 : f32
    %276 = vector.broadcast %cst_86 : f32 to vector<8x128xf32>
    %277 = arith.maximumf %275, %276 : vector<8x128xf32>
    %cst_87 = arith.constant dense<0.000000e+00> : vector<8x384xf32>
    %278 = tpu.matmul %277, %1, %cst_87 {dimension_numbers = #tpu.dot_dimension_numbers<[1], [0], [0], [1], [0, 0, 1, 1], [], []>} : vector<8x128xf32>, vector<128x384xf32>, vector<8x384xf32> -> vector<8x384xf32>
    %279 = vector.broadcast %3 : vector<1x384xf32> to vector<8x384xf32>
    %280 = arith.addf %278, %279 : vector<8x384xf32>
    %cst_88 = arith.constant dense<0.000000e+00> : vector<8x384xf32>
    %281 = tpu.matmul %244, %2, %cst_88 {dimension_numbers = #tpu.dot_dimension_numbers<[1], [0], [0], [1], [0, 0, 1, 1], [], []>} : vector<8x128xf32>, vector<128x384xf32>, vector<8x384xf32> -> vector<8x384xf32>
    %282 = vector.broadcast %4 : vector<1x384xf32> to vector<8x384xf32>
    %283 = arith.addf %281, %282 : vector<8x384xf32>
    %284 = vector.extract_strided_slice %280 {offsets = [0, 0], sizes = [8, 128], strides = [1, 1]} : vector<8x384xf32> to vector<8x128xf32>
    %285 = vector.extract_strided_slice %283 {offsets = [0, 0], sizes = [8, 128], strides = [1, 1]} : vector<8x384xf32> to vector<8x128xf32>
    %286 = arith.addf %284, %285 : vector<8x128xf32>
    %287 = arith.negf %286 : vector<8x128xf32>
    %288 = math.exp %287 : vector<8x128xf32>
    %cst_89 = arith.constant 1.000000e+00 : f32
    %289 = vector.broadcast %cst_89 : f32 to vector<8x128xf32>
    %290 = arith.addf %289, %288 : vector<8x128xf32>
    %291 = arith.divf %289, %290 : vector<8x128xf32>
    %292 = vector.extract_strided_slice %280 {offsets = [0, 128], sizes = [8, 128], strides = [1, 1]} : vector<8x384xf32> to vector<8x128xf32>
    %293 = vector.extract_strided_slice %283 {offsets = [0, 128], sizes = [8, 128], strides = [1, 1]} : vector<8x384xf32> to vector<8x128xf32>
    %294 = arith.addf %292, %293 : vector<8x128xf32>
    %295 = arith.negf %294 : vector<8x128xf32>
    %296 = math.exp %295 : vector<8x128xf32>
    %cst_90 = arith.constant 1.000000e+00 : f32
    %297 = vector.broadcast %cst_90 : f32 to vector<8x128xf32>
    %298 = arith.addf %297, %296 : vector<8x128xf32>
    %299 = arith.divf %297, %298 : vector<8x128xf32>
    %300 = vector.extract_strided_slice %280 {offsets = [0, 256], sizes = [8, 128], strides = [1, 1]} : vector<8x384xf32> to vector<8x128xf32>
    %301 = vector.extract_strided_slice %283 {offsets = [0, 256], sizes = [8, 128], strides = [1, 1]} : vector<8x384xf32> to vector<8x128xf32>
    %302 = arith.mulf %291, %301 : vector<8x128xf32>
    %303 = arith.addf %300, %302 : vector<8x128xf32>
    %304 = math.tanh %303 : vector<8x128xf32>
    %cst_91 = arith.constant 1.000000e+00 : f32
    %305 = vector.broadcast %cst_91 : f32 to vector<8x128xf32>
    %306 = arith.subf %305, %299 : vector<8x128xf32>
    %307 = arith.mulf %306, %304 : vector<8x128xf32>
    %308 = arith.mulf %299, %244 : vector<8x128xf32>
    %309 = arith.addf %307, %308 : vector<8x128xf32>
    %cst_92 = arith.constant dense<0.000000e+00> : vector<8x128xf32>
    %310 = tpu.matmul %309, %5, %cst_92 {dimension_numbers = #tpu.dot_dimension_numbers<[1], [0], [0], [1], [0, 0, 1, 1], [], []>} : vector<8x128xf32>, vector<128x128xf32>, vector<8x128xf32> -> vector<8x128xf32>
    %311 = vector.broadcast %6 : vector<1x128xf32> to vector<8x128xf32>
    %312 = arith.addf %310, %311 : vector<8x128xf32>
    %c4 = arith.constant 4 : index
    %c0_93 = arith.constant 0 : index
    %c0_94 = arith.constant 0 : index
    %313 = vector.load %arg9[%c4, %c0_93, %c0_94] : memref<7x8x128xf32, #tpu.memory_space<vmem>>, vector<1x8x128xf32>
    %314 = vector.shape_cast %313 : vector<1x8x128xf32> to vector<8x128xf32>
    %315 = vector.shape_cast %312 : vector<8x128xf32> to vector<1x8x128xf32>
    tpu.vector_store %arg9[%c4, %c0_93, %c0_94], %315 {strides = array<i32>} : memref<7x8x128xf32, #tpu.memory_space<vmem>>, vector<1x8x128xf32>,
    %cst_95 = arith.constant dense<0xFF800000> : vector<8xf32>
    %316 = vector.multi_reduction <maximumf>, %312, %cst_95 [1] : vector<8x128xf32> to vector<8xf32>
    %317 = vector.shape_cast %316 : vector<8xf32> to vector<8x1xf32>
    %318 = vector.broadcast %317 : vector<8x1xf32> to vector<8x128xf32>
    %319 = arith.subf %312, %318 : vector<8x128xf32>
    %320 = math.exp %319 : vector<8x128xf32>
    %cst_96 = arith.constant dense<0.000000e+00> : vector<8xf32>
    %321 = vector.multi_reduction <add>, %320, %cst_96 [1] : vector<8x128xf32> to vector<8xf32>
    %322 = vector.shape_cast %321 : vector<8xf32> to vector<8x1xf32>
    %323 = math.log %322 : vector<8x1xf32>
    %324 = arith.addf %317, %323 : vector<8x1xf32>
    %325 = vector.broadcast %324 : vector<8x1xf32> to vector<8x128xf32>
    %326 = arith.subf %312, %325 : vector<8x128xf32>
    %c4_97 = arith.constant 4 : index
    %c0_98 = arith.constant 0 : index
    %c0_99 = arith.constant 0 : index
    %327 = vector.load %arg10[%c4_97, %c0_98, %c0_99] : memref<7x8x128xf32, #tpu.memory_space<vmem>>, vector<1x8x128xf32>
    %328 = vector.shape_cast %327 : vector<1x8x128xf32> to vector<8x128xf32>
    %329 = vector.shape_cast %326 : vector<8x128xf32> to vector<1x8x128xf32>
    tpu.vector_store %arg10[%c4_97, %c0_98, %c0_99], %329 {strides = array<i32>} : memref<7x8x128xf32, #tpu.memory_space<vmem>>, vector<1x8x128xf32>,
    %330 = vector.broadcast %317 : vector<8x1xf32> to vector<8x128xf32>
    %331 = arith.cmpf oeq, %312, %330 : vector<8x128xf32>
    %cst_100 = arith.constant 1.280000e+02 : f32
    %332 = vector.broadcast %cst_100 : f32 to vector<8x128xf32>
    %333 = arith.select %331, %9, %332 : vector<8x128xi1>, vector<8x128xf32>
    %cst_101 = arith.constant dense<0x7F800000> : vector<8xf32>
    %334 = vector.multi_reduction <minimumf>, %333, %cst_101 [1] : vector<8x128xf32> to vector<8xf32>
    %335 = vector.shape_cast %334 : vector<8xf32> to vector<8x1xf32>
    %336 = vector.broadcast %335 : vector<8x1xf32> to vector<8x128xf32>
    %337 = arith.cmpf oeq, %9, %336 : vector<8x128xf32>
    %338 = arith.extui %337 : vector<8x128xi1> to vector<8x128xi32>
    %339 = arith.sitofp %338 : vector<8x128xi32> to vector<8x128xf32>
    %cst_102 = arith.constant dense<0.000000e+00> : vector<8x128xf32>
    %340 = tpu.matmul %339, %0, %cst_102 {dimension_numbers = #tpu.dot_dimension_numbers<[1], [0], [0], [1], [0, 0, 1, 1], [], []>} : vector<8x128xf32>, vector<128x128xf32>, vector<8x128xf32> -> vector<8x128xf32>
    %cst_103 = arith.constant 0.000000e+00 : f32
    %341 = vector.broadcast %cst_103 : f32 to vector<8x128xf32>
    %342 = arith.maximumf %340, %341 : vector<8x128xf32>
    %cst_104 = arith.constant dense<0.000000e+00> : vector<8x384xf32>
    %343 = tpu.matmul %342, %1, %cst_104 {dimension_numbers = #tpu.dot_dimension_numbers<[1], [0], [0], [1], [0, 0, 1, 1], [], []>} : vector<8x128xf32>, vector<128x384xf32>, vector<8x384xf32> -> vector<8x384xf32>
    %344 = vector.broadcast %3 : vector<1x384xf32> to vector<8x384xf32>
    %345 = arith.addf %343, %344 : vector<8x384xf32>
    %cst_105 = arith.constant dense<0.000000e+00> : vector<8x384xf32>
    %346 = tpu.matmul %309, %2, %cst_105 {dimension_numbers = #tpu.dot_dimension_numbers<[1], [0], [0], [1], [0, 0, 1, 1], [], []>} : vector<8x128xf32>, vector<128x384xf32>, vector<8x384xf32> -> vector<8x384xf32>
    %347 = vector.broadcast %4 : vector<1x384xf32> to vector<8x384xf32>
    %348 = arith.addf %346, %347 : vector<8x384xf32>
    %349 = vector.extract_strided_slice %345 {offsets = [0, 0], sizes = [8, 128], strides = [1, 1]} : vector<8x384xf32> to vector<8x128xf32>
    %350 = vector.extract_strided_slice %348 {offsets = [0, 0], sizes = [8, 128], strides = [1, 1]} : vector<8x384xf32> to vector<8x128xf32>
    %351 = arith.addf %349, %350 : vector<8x128xf32>
    %352 = arith.negf %351 : vector<8x128xf32>
    %353 = math.exp %352 : vector<8x128xf32>
    %cst_106 = arith.constant 1.000000e+00 : f32
    %354 = vector.broadcast %cst_106 : f32 to vector<8x128xf32>
    %355 = arith.addf %354, %353 : vector<8x128xf32>
    %356 = arith.divf %354, %355 : vector<8x128xf32>
    %357 = vector.extract_strided_slice %345 {offsets = [0, 128], sizes = [8, 128], strides = [1, 1]} : vector<8x384xf32> to vector<8x128xf32>
    %358 = vector.extract_strided_slice %348 {offsets = [0, 128], sizes = [8, 128], strides = [1, 1]} : vector<8x384xf32> to vector<8x128xf32>
    %359 = arith.addf %357, %358 : vector<8x128xf32>
    %360 = arith.negf %359 : vector<8x128xf32>
    %361 = math.exp %360 : vector<8x128xf32>
    %cst_107 = arith.constant 1.000000e+00 : f32
    %362 = vector.broadcast %cst_107 : f32 to vector<8x128xf32>
    %363 = arith.addf %362, %361 : vector<8x128xf32>
    %364 = arith.divf %362, %363 : vector<8x128xf32>
    %365 = vector.extract_strided_slice %345 {offsets = [0, 256], sizes = [8, 128], strides = [1, 1]} : vector<8x384xf32> to vector<8x128xf32>
    %366 = vector.extract_strided_slice %348 {offsets = [0, 256], sizes = [8, 128], strides = [1, 1]} : vector<8x384xf32> to vector<8x128xf32>
    %367 = arith.mulf %356, %366 : vector<8x128xf32>
    %368 = arith.addf %365, %367 : vector<8x128xf32>
    %369 = math.tanh %368 : vector<8x128xf32>
    %cst_108 = arith.constant 1.000000e+00 : f32
    %370 = vector.broadcast %cst_108 : f32 to vector<8x128xf32>
    %371 = arith.subf %370, %364 : vector<8x128xf32>
    %372 = arith.mulf %371, %369 : vector<8x128xf32>
    %373 = arith.mulf %364, %309 : vector<8x128xf32>
    %374 = arith.addf %372, %373 : vector<8x128xf32>
    %cst_109 = arith.constant dense<0.000000e+00> : vector<8x128xf32>
    %375 = tpu.matmul %374, %5, %cst_109 {dimension_numbers = #tpu.dot_dimension_numbers<[1], [0], [0], [1], [0, 0, 1, 1], [], []>} : vector<8x128xf32>, vector<128x128xf32>, vector<8x128xf32> -> vector<8x128xf32>
    %376 = vector.broadcast %6 : vector<1x128xf32> to vector<8x128xf32>
    %377 = arith.addf %375, %376 : vector<8x128xf32>
    %c5 = arith.constant 5 : index
    %c0_110 = arith.constant 0 : index
    %c0_111 = arith.constant 0 : index
    %378 = vector.load %arg9[%c5, %c0_110, %c0_111] : memref<7x8x128xf32, #tpu.memory_space<vmem>>, vector<1x8x128xf32>
    %379 = vector.shape_cast %378 : vector<1x8x128xf32> to vector<8x128xf32>
    %380 = vector.shape_cast %377 : vector<8x128xf32> to vector<1x8x128xf32>
    tpu.vector_store %arg9[%c5, %c0_110, %c0_111], %380 {strides = array<i32>} : memref<7x8x128xf32, #tpu.memory_space<vmem>>, vector<1x8x128xf32>,
    %cst_112 = arith.constant dense<0xFF800000> : vector<8xf32>
    %381 = vector.multi_reduction <maximumf>, %377, %cst_112 [1] : vector<8x128xf32> to vector<8xf32>
    %382 = vector.shape_cast %381 : vector<8xf32> to vector<8x1xf32>
    %383 = vector.broadcast %382 : vector<8x1xf32> to vector<8x128xf32>
    %384 = arith.subf %377, %383 : vector<8x128xf32>
    %385 = math.exp %384 : vector<8x128xf32>
    %cst_113 = arith.constant dense<0.000000e+00> : vector<8xf32>
    %386 = vector.multi_reduction <add>, %385, %cst_113 [1] : vector<8x128xf32> to vector<8xf32>
    %387 = vector.shape_cast %386 : vector<8xf32> to vector<8x1xf32>
    %388 = math.log %387 : vector<8x1xf32>
    %389 = arith.addf %382, %388 : vector<8x1xf32>
    %390 = vector.broadcast %389 : vector<8x1xf32> to vector<8x128xf32>
    %391 = arith.subf %377, %390 : vector<8x128xf32>
    %c5_114 = arith.constant 5 : index
    %c0_115 = arith.constant 0 : index
    %c0_116 = arith.constant 0 : index
    %392 = vector.load %arg10[%c5_114, %c0_115, %c0_116] : memref<7x8x128xf32, #tpu.memory_space<vmem>>, vector<1x8x128xf32>
    %393 = vector.shape_cast %392 : vector<1x8x128xf32> to vector<8x128xf32>
    %394 = vector.shape_cast %391 : vector<8x128xf32> to vector<1x8x128xf32>
    tpu.vector_store %arg10[%c5_114, %c0_115, %c0_116], %394 {strides = array<i32>} : memref<7x8x128xf32, #tpu.memory_space<vmem>>, vector<1x8x128xf32>,
    %395 = vector.broadcast %382 : vector<8x1xf32> to vector<8x128xf32>
    %396 = arith.cmpf oeq, %377, %395 : vector<8x128xf32>
    %cst_117 = arith.constant 1.280000e+02 : f32
    %397 = vector.broadcast %cst_117 : f32 to vector<8x128xf32>
    %398 = arith.select %396, %9, %397 : vector<8x128xi1>, vector<8x128xf32>
    %cst_118 = arith.constant dense<0x7F800000> : vector<8xf32>
    %399 = vector.multi_reduction <minimumf>, %398, %cst_118 [1] : vector<8x128xf32> to vector<8xf32>
    %400 = vector.shape_cast %399 : vector<8xf32> to vector<8x1xf32>
    %401 = vector.broadcast %400 : vector<8x1xf32> to vector<8x128xf32>
    %402 = arith.cmpf oeq, %9, %401 : vector<8x128xf32>
    %403 = arith.extui %402 : vector<8x128xi1> to vector<8x128xi32>
    %404 = arith.sitofp %403 : vector<8x128xi32> to vector<8x128xf32>
    %cst_119 = arith.constant dense<0.000000e+00> : vector<8x128xf32>
    %405 = tpu.matmul %404, %0, %cst_119 {dimension_numbers = #tpu.dot_dimension_numbers<[1], [0], [0], [1], [0, 0, 1, 1], [], []>} : vector<8x128xf32>, vector<128x128xf32>, vector<8x128xf32> -> vector<8x128xf32>
    %cst_120 = arith.constant 0.000000e+00 : f32
    %406 = vector.broadcast %cst_120 : f32 to vector<8x128xf32>
    %407 = arith.maximumf %405, %406 : vector<8x128xf32>
    %cst_121 = arith.constant dense<0.000000e+00> : vector<8x384xf32>
    %408 = tpu.matmul %407, %1, %cst_121 {dimension_numbers = #tpu.dot_dimension_numbers<[1], [0], [0], [1], [0, 0, 1, 1], [], []>} : vector<8x128xf32>, vector<128x384xf32>, vector<8x384xf32> -> vector<8x384xf32>
    %409 = vector.broadcast %3 : vector<1x384xf32> to vector<8x384xf32>
    %410 = arith.addf %408, %409 : vector<8x384xf32>
    %cst_122 = arith.constant dense<0.000000e+00> : vector<8x384xf32>
    %411 = tpu.matmul %374, %2, %cst_122 {dimension_numbers = #tpu.dot_dimension_numbers<[1], [0], [0], [1], [0, 0, 1, 1], [], []>} : vector<8x128xf32>, vector<128x384xf32>, vector<8x384xf32> -> vector<8x384xf32>
    %412 = vector.broadcast %4 : vector<1x384xf32> to vector<8x384xf32>
    %413 = arith.addf %411, %412 : vector<8x384xf32>
    %414 = vector.extract_strided_slice %410 {offsets = [0, 0], sizes = [8, 128], strides = [1, 1]} : vector<8x384xf32> to vector<8x128xf32>
    %415 = vector.extract_strided_slice %413 {offsets = [0, 0], sizes = [8, 128], strides = [1, 1]} : vector<8x384xf32> to vector<8x128xf32>
    %416 = arith.addf %414, %415 : vector<8x128xf32>
    %417 = arith.negf %416 : vector<8x128xf32>
    %418 = math.exp %417 : vector<8x128xf32>
    %cst_123 = arith.constant 1.000000e+00 : f32
    %419 = vector.broadcast %cst_123 : f32 to vector<8x128xf32>
    %420 = arith.addf %419, %418 : vector<8x128xf32>
    %421 = arith.divf %419, %420 : vector<8x128xf32>
    %422 = vector.extract_strided_slice %410 {offsets = [0, 128], sizes = [8, 128], strides = [1, 1]} : vector<8x384xf32> to vector<8x128xf32>
    %423 = vector.extract_strided_slice %413 {offsets = [0, 128], sizes = [8, 128], strides = [1, 1]} : vector<8x384xf32> to vector<8x128xf32>
    %424 = arith.addf %422, %423 : vector<8x128xf32>
    %425 = arith.negf %424 : vector<8x128xf32>
    %426 = math.exp %425 : vector<8x128xf32>
    %cst_124 = arith.constant 1.000000e+00 : f32
    %427 = vector.broadcast %cst_124 : f32 to vector<8x128xf32>
    %428 = arith.addf %427, %426 : vector<8x128xf32>
    %429 = arith.divf %427, %428 : vector<8x128xf32>
    %430 = vector.extract_strided_slice %410 {offsets = [0, 256], sizes = [8, 128], strides = [1, 1]} : vector<8x384xf32> to vector<8x128xf32>
    %431 = vector.extract_strided_slice %413 {offsets = [0, 256], sizes = [8, 128], strides = [1, 1]} : vector<8x384xf32> to vector<8x128xf32>
    %432 = arith.mulf %421, %431 : vector<8x128xf32>
    %433 = arith.addf %430, %432 : vector<8x128xf32>
    %434 = math.tanh %433 : vector<8x128xf32>
    %cst_125 = arith.constant 1.000000e+00 : f32
    %435 = vector.broadcast %cst_125 : f32 to vector<8x128xf32>
    %436 = arith.subf %435, %429 : vector<8x128xf32>
    %437 = arith.mulf %436, %434 : vector<8x128xf32>
    %438 = arith.mulf %429, %374 : vector<8x128xf32>
    %439 = arith.addf %437, %438 : vector<8x128xf32>
    %cst_126 = arith.constant dense<0.000000e+00> : vector<8x128xf32>
    %440 = tpu.matmul %439, %5, %cst_126 {dimension_numbers = #tpu.dot_dimension_numbers<[1], [0], [0], [1], [0, 0, 1, 1], [], []>} : vector<8x128xf32>, vector<128x128xf32>, vector<8x128xf32> -> vector<8x128xf32>
    %441 = vector.broadcast %6 : vector<1x128xf32> to vector<8x128xf32>
    %442 = arith.addf %440, %441 : vector<8x128xf32>
    %c6 = arith.constant 6 : index
    %c0_127 = arith.constant 0 : index
    %c0_128 = arith.constant 0 : index
    %443 = vector.load %arg9[%c6, %c0_127, %c0_128] : memref<7x8x128xf32, #tpu.memory_space<vmem>>, vector<1x8x128xf32>
    %444 = vector.shape_cast %443 : vector<1x8x128xf32> to vector<8x128xf32>
    %445 = vector.shape_cast %442 : vector<8x128xf32> to vector<1x8x128xf32>
    tpu.vector_store %arg9[%c6, %c0_127, %c0_128], %445 {strides = array<i32>} : memref<7x8x128xf32, #tpu.memory_space<vmem>>, vector<1x8x128xf32>,
    %cst_129 = arith.constant dense<0xFF800000> : vector<8xf32>
    %446 = vector.multi_reduction <maximumf>, %442, %cst_129 [1] : vector<8x128xf32> to vector<8xf32>
    %447 = vector.shape_cast %446 : vector<8xf32> to vector<8x1xf32>
    %448 = vector.broadcast %447 : vector<8x1xf32> to vector<8x128xf32>
    %449 = arith.subf %442, %448 : vector<8x128xf32>
    %450 = math.exp %449 : vector<8x128xf32>
    %cst_130 = arith.constant dense<0.000000e+00> : vector<8xf32>
    %451 = vector.multi_reduction <add>, %450, %cst_130 [1] : vector<8x128xf32> to vector<8xf32>
    %452 = vector.shape_cast %451 : vector<8xf32> to vector<8x1xf32>
    %453 = math.log %452 : vector<8x1xf32>
    %454 = arith.addf %447, %453 : vector<8x1xf32>
    %455 = vector.broadcast %454 : vector<8x1xf32> to vector<8x128xf32>
    %456 = arith.subf %442, %455 : vector<8x128xf32>
    %c6_131 = arith.constant 6 : index
    %c0_132 = arith.constant 0 : index
    %c0_133 = arith.constant 0 : index
    %457 = vector.load %arg10[%c6_131, %c0_132, %c0_133] : memref<7x8x128xf32, #tpu.memory_space<vmem>>, vector<1x8x128xf32>
    %458 = vector.shape_cast %457 : vector<1x8x128xf32> to vector<8x128xf32>
    %459 = vector.shape_cast %456 : vector<8x128xf32> to vector<1x8x128xf32>
    tpu.vector_store %arg10[%c6_131, %c0_132, %c0_133], %459 {strides = array<i32>} : memref<7x8x128xf32, #tpu.memory_space<vmem>>, vector<1x8x128xf32>,
    return
  }
}

</mosaic_0001>

<bundles_post_ra>
// kernel: decoder_rnn_forward.1
= control target key start
LH: loop header
LB: loop body
LE: loop exit
PB: predicated region body
PF: predicated region fallthrough
CT: control target
= control target key end

     0   :  { %v6241_v0 = vmov 0   ;;  %v7836_v2 = vmov 0.0|0.0   ;;  %vm6243_vm0 = vmmov 0   ;;  %v7808_v8 = vmov 0.0   ;;  %s7794_s0 = inlined_call_operand.vmem [shape: s32[8,1], index: 0, kind: input, shape index: {}]   ;;  %s7795_s2 = inlined_call_operand.vmem [shape: f32[128,128], index: 2, kind: input, shape index: {}]   ;;  %s7796_s3 = inlined_call_operand.vmem [shape: f32[128,384], index: 3, kind: input, shape index: {}]   ;;  %s7797_s4 = inlined_call_operand.vmem [shape: f32[128,384], index: 4, kind: input, shape index: {}]   ;;  %s7798_s1 = inlined_call_operand.vmem [shape: f32[8,128], index: 1, kind: input, shape index: {}]   ;;  %s7799_s7 = inlined_call_operand.vmem [shape: f32[128,128], index: 7, kind: input, shape index: {}]   ;;  %s7800_s6 = inlined_call_operand.vmem [shape: f32[1,384], index: 6, kind: input, shape index: {}]   ;;  %s7801_s5 = inlined_call_operand.vmem [shape: f32[1,384], index: 5, kind: input, shape index: {}]   ;;  %s7802_s8 = inlined_call_operand.vmem [shape: f32[1,128], index: 8, kind: input, shape index: {}]   ;;  %s7803_s9 = inlined_call_operand.vmem [shape: f32[7,8,128], index: 9, kind: output, shape index: {0}]   ;;  %s7804_s10 = inlined_call_operand.vmem [shape: f32[7,8,128], index: 10, kind: output, shape index: {1}]  }
   0x1   :  { %6139 = vset.pattern.permute.xlu0 %v6241_v0  ;;  %v169_v1 = vld [vmem:[%s7794_s0] sm:$0xff]  ;;  %4972 = vmatprep.subr.bf16.mxu0 %v7836_v2  ;;  %v35_v4 = vld [vmem:[%s7795_s2 + $0x8] sm:$0xff]  ;;  %v36_v6 = vld [vmem:[%s7795_s2 + $0x10] sm:$0xff] }
   0x2   :  { %v34_v3 = vld [vmem:[%s7795_s2] sm:$0xff]  ;;  %171 = vperm.xlu0 %6139, %v169_v1   ;;  %v37_v7 = vld [vmem:[%s7795_s2 + $0x18] sm:$0xff]  ;;  %4024 = vmatprep.mubr.msk.f32.mxu0 %vm6243_vm0, %v7808_v8  ;;  %v39_v11 = vld [vmem:[%s7795_s2 + $0x28] sm:$0xff] }
   0x3   :  { %v6311_v5 = vpack.c.bf16 %v35_v4, %v34_v3  ;;  %327 = vmatprep.mubr.f32.mxu1 %v7808_v8  ;;  %v6323_v9 = vpack.c.bf16 %v37_v7, %v36_v6  ;;  %v38_v10 = vld [vmem:[%s7795_s2 + $0x20] sm:$0xff]  ;;  %v51_v12 = vld [vmem:[%s7796_s3 + $0x8] sm:$0xff]  ;;  %v40_v15 = vld [vmem:[%s7795_s2 + $0x30] sm:$0xff] }
   0x4   :  { %v54_v13 = vld [vmem:[%s7796_s3 + $0x20] sm:$0xff]  ;;  %v6339_v14 = vpack.c.bf16 %v39_v11, %v38_v10  ;;  %v53_v18 = vld [vmem:[%s7796_s3 + $0x18] sm:$0xff]  ;;  %v60_v22 = vld [vmem:[%s7796_s3 + $0x50] sm:$0xff] }
   0x5   :  { %7883 = vst [vmem:[#allocation2_spill] sm:$0xff] %v6311_v5  ;;  %4974 = vmatpush3.bf16.msra.mxu0 %v6311_v5  ;;  %7884 = vst [vmem:[#allocation3_spill] sm:$0xff] %v6323_v9  ;;  %v6344_v16 = vpack.c.bf16 %v54_v13, %v51_v12  ;;  %v50_v17 = vld [vmem:[%s7796_s3] sm:$0xff]  ;;  %v41_v19 = vld [vmem:[%s7795_s2 + $0x38] sm:$0xff] }
   0x6   :  { %4975 = vmatprep.subr.bf16.mxu0 %v7836_v2  ;;  %7885 = vst [vmem:[#allocation4_spill] sm:$0xff] %v6339_v14  ;;  %v6356_v20 = vpack.c.bf16 %v53_v18, %v50_v17  ;;  %v57_v21 = vld [vmem:[%s7796_s3 + $0x38] sm:$0xff]  ;;  %v56_v24 = vld [vmem:[%s7796_s3 + $0x30] sm:$0xff]  ;;  %v59_v25 = vld [vmem:[%s7796_s3 + $0x48] sm:$0xff]  ;;  %v6383_v29 = vpack.c.bf16 %v41_v19, %v40_v15  ;;  %v7807_v18 = vlaneseq }
   0x7   :  { %7886 = vst [vmem:[#allocation5_spill] sm:$0xff] %v6344_v16  ;;  %4997 = vmatprep.subr.bf16.mxu1 %v6344_v16  ;;  %v6365_v23 = vpack.c.bf16 %v60_v22, %v57_v21  ;;  %v6374_v26 = vpack.c.bf16 %v59_v25, %v56_v24  ;;  %v63_v27 = vld [vmem:[%s7796_s3 + $0x68] sm:$0xff]  ;;  %v66_v28 = vld [vmem:[%s7796_s3 + $0x80] sm:$0xff]  ;;  %v65_v33 = vld [vmem:[%s7796_s3 + $0x78] sm:$0xff] }
   0x8   :  { %4999 = vmatpush1.bf16.msra.mxu1 %v6356_v20  ;;  %7887 = vst [vmem:[#allocation6_spill] sm:$0xff] %v6383_v29  ;;  %v42_v30 = vld [vmem:[%s7795_s2 + $0x40] sm:$0xff]  ;;  %v6389_v31 = vpack.c.bf16 %v66_v28, %v63_v27  ;;  %v43_v34 = vld [vmem:[%s7795_s2 + $0x48] sm:$0xff]  ;;  %v69_v35 = vld [vmem:[%s7796_s3 + $0x98] sm:$0xff]  ;;  %v6539_v22 = vand.u32 127, %v7807_v18 }
   0x9   :  { %4977 = vmatpush3.bf16.msra.mxu0 %v6323_v9  ;;  %5001 = vmatprep.subr.bf16.mxu1 %v6365_v23  ;;  %v62_v32 = vld [vmem:[%s7796_s3 + $0x60] sm:$0xff]  ;;  %v72_v36 = vld [vmem:[%s7796_s3 + $0xb0] sm:$0xff]  ;;  %v6411_v38 = vpack.c.bf16 %v43_v34, %v42_v30  ;;  %v71_v42 = vld [vmem:[%s7796_s3 + $0xa8] sm:$0xff]  ;;  %v7805_v30 = vmov 1.0  }
   0xa   :  { %4978 = vmatprep.subr.bf16.mxu0 %v7836_v2  ;;  %v6408_v37 = vpack.c.bf16 %v65_v33, %v62_v32  ;;  %v44_v39 = vld [vmem:[%s7795_s2 + $0x50] sm:$0xff]  ;;  %v6417_v40 = vpack.c.bf16 %v72_v36, %v69_v35  ;;  %v45_v43 = vld [vmem:[%s7795_s2 + $0x58] sm:$0xff]  ;;  %v75_v44 = vld [vmem:[%s7796_s3 + $0xc8] sm:$0xff] }
   0xb   :  { %7888 = vst [vmem:[#allocation7_spill] sm:$0xff] %v6411_v38  ;;  %v68_v41 = vld [vmem:[%s7796_s3 + $0x90] sm:$0xff]  ;;  %v78_v45 = vld [vmem:[%s7796_s3 + $0xe0] sm:$0xff]  ;;  %v6439_v47 = vpack.c.bf16 %v45_v43, %v44_v39  ;;  %v77_v51 = vld [vmem:[%s7796_s3 + $0xd8] sm:$0xff] }
   0xc   :  { %5003 = vmatpush1.bf16.msra.mxu1 %v6374_v26  ;;  %v6436_v46 = vpack.c.bf16 %v71_v42, %v68_v41  ;;  %v46_v48 = vld [vmem:[%s7795_s2 + $0x60] sm:$0xff]  ;;  %v6445_v49 = vpack.c.bf16 %v78_v45, %v75_v44  ;;  %v47_v52 = vld [vmem:[%s7795_s2 + $0x68] sm:$0xff]  ;;  %v81_v53 = vld [vmem:[%s7796_s3 + $0xf8] sm:$0xff] }
   0xd   :  { %4980 = vmatpush3.bf16.msra.mxu0 %v6339_v14  ;;  %5005 = vmatprep.subr.bf16.mxu1 %v6389_v31  ;;  %7889 = vst [vmem:[#allocation8_spill] sm:$0xff] %v6439_v47  ;;  %v74_v50 = vld [vmem:[%s7796_s3 + $0xc0] sm:$0xff]  ;;  %v84_v54 = vld [vmem:[%s7796_s3 + $0x110] sm:$0xff]  ;;  %v6467_v56 = vpack.c.bf16 %v47_v52, %v46_v48  ;;  %v83_v60 = vld [vmem:[%s7796_s3 + $0x108] sm:$0xff] }
   0xe   :  { %4981 = vmatprep.subr.bf16.mxu0 %v7836_v2  ;;  %v6464_v55 = vpack.c.bf16 %v77_v51, %v74_v50  ;;  %v48_v57 = vld [vmem:[%s7795_s2 + $0x70] sm:$0xff]  ;;  %v6473_v58 = vpack.c.bf16 %v84_v54, %v81_v53  ;;  %v49_v61 = vld [vmem:[%s7795_s2 + $0x78] sm:$0xff]  ;;  %v87_v62 = vld [vmem:[%s7796_s3 + $0x128] sm:$0xff] }
   0xf   :  { %7890 = vst [vmem:[#allocation9_spill] sm:$0xff] %v6467_v56  ;;  %v80_v59 = vld [vmem:[%s7796_s3 + $0xf0] sm:$0xff]  ;;  %v90_v63 = vld [vmem:[%s7796_s3 + $0x140] sm:$0xff]  ;;  %v6495_v1 = vpack.c.bf16 %v49_v61, %v48_v57  ;;  %v89_v6 = vld [vmem:[%s7796_s3 + $0x138] sm:$0xff] }
  0x10   :  { %5007 = vmatpush1.bf16.msra.mxu1 %v6408_v37  ;;  %v6492_v0 = vpack.c.bf16 %v83_v60, %v80_v59  ;;  %v6498_v3 = vpack.c.bf16 %v90_v63, %v87_v62  ;;  %v86_v4 = vld [vmem:[%s7796_s3 + $0x120] sm:$0xff]  ;;  %v93_v7 = vld [vmem:[%s7796_s3 + $0x158] sm:$0xff]  ;;  %v96_v10 = vld [vmem:[%s7796_s3 + $0x170] sm:$0xff] }
  0x11   :  { %4983 = vmatpush3.bf16.msra.mxu0 %v6383_v29  ;;  %5009 = vmatprep.subr.bf16.mxu1 %v6417_v40  ;;  %7891 = vst [vmem:[#allocation10_spill] sm:$0xff] %v6495_v1  ;;  %v6514_v11 = vpack.c.bf16 %v89_v6, %v86_v4  ;;  %v6518_v12 = vpack.c.bf16 %v96_v10, %v93_v7  ;;  %v92_v13 = vld [vmem:[%s7796_s3 + $0x150] sm:$0xff]  ;;  %v95_v15 = vld [vmem:[%s7796_s3 + $0x168] sm:$0xff]  ;;  %v58_v27 = vld [vmem:[%s7796_s3 + $0x40] sm:$0xff] }
  0x12   :  { %4984 = vmatprep.subr.bf16.mxu0 %v7836_v2  ;;  %v6528_v17 = vpack.c.bf16 %v95_v15, %v92_v13  ;;  %v52_v19 = vld [vmem:[%s7796_s3 + $0x10] sm:$0xff]  ;;  %v55_v21 = vld [vmem:[%s7796_s3 + $0x28] sm:$0xff]  ;;  %v61_v28 = vld [vmem:[%s7796_s3 + $0x58] sm:$0xff] }
  0x13   :  { %v6541_v24 = vpack.c.bf16 %v55_v21, %v52_v19  ;;  %v6552_v32 = vpack.c.bf16 %v61_v28, %v58_v27  ;;  %v64_v33 = vld [vmem:[%s7796_s3 + $0x70] sm:$0xff]  ;;  %v67_v34 = vld [vmem:[%s7796_s3 + $0x88] sm:$0xff]  ;;  %v70_v36 = vld [vmem:[%s7796_s3 + $0xa0] sm:$0xff] }
  0x14   :  { %5011 = vmatpush1.bf16.msra.mxu1 %v6436_v46  ;;  %v6564_v35 = vpack.c.bf16 %v67_v34, %v64_v33  ;;  %v73_v39 = vld [vmem:[%s7796_s3 + $0xb8] sm:$0xff]  ;;  %v76_v42 = vld [vmem:[%s7796_s3 + $0xd0] sm:$0xff]  ;;  %v79_v43 = vld [vmem:[%s7796_s3 + $0xe8] sm:$0xff] }
  0x15   :  { %4986 = vmatpush3.bf16.msra.mxu0 %v6411_v38  ;;  %5013 = vmatprep.subr.bf16.mxu1 %v6445_v49  ;;  %v6574_v41 = vpack.c.bf16 %v73_v39, %v70_v36  ;;  %v6584_v44 = vpack.c.bf16 %v79_v43, %v76_v42  ;;  %v82_v45 = vld [vmem:[%s7796_s3 + $0x100] sm:$0xff]  ;;  %v85_v48 = vld [vmem:[%s7796_s3 + $0x118] sm:$0xff]  ;;  %v88_v51 = vld [vmem:[%s7796_s3 + $0x130] sm:$0xff] }
  0x16   :  { %4987 = vmatprep.subr.bf16.mxu0 %v7836_v2  ;;  %v6594_v50 = vpack.c.bf16 %v85_v48, %v82_v45  ;;  %v91_v52 = vld [vmem:[%s7796_s3 + $0x148] sm:$0xff]  ;;  %v94_v54 = vld [vmem:[%s7796_s3 + $0x160] sm:$0xff]  ;;  %v97_v57 = vld [vmem:[%s7796_s3 + $0x178] sm:$0xff] }
  0x17   :  { %v6604_v53 = vpack.c.bf16 %v91_v52, %v88_v51  ;;  %v6615_v59 = vpack.c.bf16 %v97_v57, %v94_v54  ;;  %v99_v60 = vld [vmem:[%s7797_s4 + $0x8] sm:$0xff]  ;;  %v102_v61 = vld [vmem:[%s7797_s4 + $0x20] sm:$0xff]  ;;  %v101_v4 = vld [vmem:[%s7797_s4 + $0x18] sm:$0xff] }
  0x18   :  { %5015 = vmatpush1.bf16.msra.mxu1 %v6464_v55  ;;  %v6624_v62 = vpack.c.bf16 %v102_v61, %v99_v60  ;;  %v98_v63 = vld [vmem:[%s7797_s4] sm:$0xff]  ;;  %v100_v6 = vld [vmem:[%s7797_s4 + $0x10] sm:$0xff]  ;;  %v103_v7 = vld [vmem:[%s7797_s4 + $0x28] sm:$0xff] }
  0x19   :  { %4989 = vmatpush3.bf16.msra.mxu0 %v6439_v47  ;;  %5017 = vmatprep.subr.bf16.mxu1 %v6473_v58  ;;  %v105_v10 = vld [vmem:[%s7797_s4 + $0x38] sm:$0xff]  ;;  %v108_v13 = vld [vmem:[%s7797_s4 + $0x50] sm:$0xff]  ;;  %v6646_v19 = vpack.c.bf16 %v101_v4, %v98_v63  ;;  %v107_v34 = vld [vmem:[%s7797_s4 + $0x48] sm:$0xff] }
  0x1a   :  { %4990 = vmatprep.subr.bf16.mxu0 %v7836_v2  ;;  %v104_v21 = vld [vmem:[%s7797_s4 + $0x30] sm:$0xff]  ;;  %v6653_v33 = vpack.c.bf16 %v108_v13, %v105_v10  ;;  %v106_v36 = vld [vmem:[%s7797_s4 + $0x40] sm:$0xff]  ;;  %v109_v39 = vld [vmem:[%s7797_s4 + $0x58] sm:$0xff] }
  0x1b   :  { %v111_v42 = vld [vmem:[%s7797_s4 + $0x68] sm:$0xff]  ;;  %v114_v43 = vld [vmem:[%s7797_s4 + $0x80] sm:$0xff]  ;;  %v6671_v45 = vpack.c.bf16 %v107_v34, %v104_v21  ;;  %v6677_v51 = vpack.c.bf16 %v109_v39, %v106_v36  ;;  %v113_v54 = vld [vmem:[%s7797_s4 + $0x78] sm:$0xff] }
  0x1c   :  { %5019 = vmatpush1.bf16.msra.mxu1 %v6492_v0  ;;  %v110_v48 = vld [vmem:[%s7797_s4 + $0x60] sm:$0xff]  ;;  %v6680_v52 = vpack.c.bf16 %v114_v43, %v111_v42  ;;  %v112_v57 = vld [vmem:[%s7797_s4 + $0x70] sm:$0xff]  ;;  %v115_v60 = vld [vmem:[%s7797_s4 + $0x88] sm:$0xff] }
  0x1d   :  { %4992 = vmatpush3.bf16.msra.mxu0 %v6467_v56  ;;  %5021 = vmatprep.subr.bf16.mxu1 %v6498_v3  ;;  %v117_v61 = vld [vmem:[%s7797_s4 + $0x98] sm:$0xff]  ;;  %v120_v63 = vld [vmem:[%s7797_s4 + $0xb0] sm:$0xff]  ;;  %v6702_v4 = vpack.c.bf16 %v113_v54, %v110_v48  ;;  %v119_v13 = vld [vmem:[%s7797_s4 + $0xa8] sm:$0xff] }
  0x1e   :  { %4993 = vmatprep.subr.bf16.mxu0 %v7836_v2  ;;  %v6711_v10 = vpack.c.bf16 %v120_v63, %v117_v61  ;;  %v121_v21 = vld [vmem:[%s7797_s4 + $0xb8] sm:$0xff]  ;;  %v122_v36 = vld [vmem:[%s7797_s4 + $0xc0] sm:$0xff]  ;;  %v124_v48 = vld [vmem:[%s7797_s4 + $0xd0] sm:$0xff] }
  0x1f   :  { %v125_v43 = vld [vmem:[%s7797_s4 + $0xd8] sm:$0xff]  ;;  %v127_v54 = vld [vmem:[%s7797_s4 + $0xe8] sm:$0xff]  ;;  %v128_v63 = vld [vmem:[%s7797_s4 + $0xf0] sm:$0xff] }
  0x20   :  { %5023 = vmatpush1.bf16.msra.mxu1 %v6514_v11  ;;  %v6758_v61 = vpack.c.bf16 %v125_v43, %v122_v36  ;;  %v138_v36 = vld [vmem:[%s7797_s4 + $0x140] sm:$0xff] }
  0x21   :  { %4995 = vmatpush3.bf16.msra.mxu0 %v6495_v1  ;;  %5025 = vmatprep.subr.bf16.mxu1 %v6518_v12 }
  0x22   :  { %5028 = vmatprep.subr.bf16.mxu0 %v7836_v2  ;;  %7893 = vst [vmem:[#allocation12_spill] sm:$0xff] %v6758_v61 }
  0x24   :  { %5027 = vmatpush1.bf16.msra.mxu1 %v6528_v17 }
  0x25   :  { %5053 = vmatprep.subr.bf16.mxu1 %v6624_v62 }
  0x81   :  { %v172_v25 = vpop.permute.xlu0 %171 }
  0x82   :  { %vm173_vm1 = vcmp.eq.s32.totalorder %v6539_v22, %v172_v25  ;;  %v6651_v25 = vpack.c.bf16 %v103_v7, %v100_v6  ;;  %v116_v6 = vld [vmem:[%s7797_s4 + $0x90] sm:$0xff]  ;;  %v6708_v7 = vpack.c.bf16 %v115_v60, %v112_v57  ;;  %v129_v57 = vld [vmem:[%s7797_s4 + $0xf8] sm:$0xff] }
  0x83   :  { %4025 = vmatmul.mubr.msk.f32.vlgmr.msra.gmra.mrb[0].mxu0 %vm173_vm1, %v7805_v30  ;;  %v6730_v34 = vpack.c.bf16 %v119_v13, %v116_v6  ;;  %v132_v60 = vld [vmem:[%s7797_s4 + $0x110] sm:$0xff]  ;;  %v6764_v6 = vpack.c.bf16 %v127_v54, %v124_v48  ;;  %v134_v48 = vld [vmem:[%s7797_s4 + $0x120] sm:$0xff] }
  0x84   :  { %5030 = vmatpush3.bf16.msra.mxu0 %v6541_v24  ;;  %4059 = vmatprep.mubr.msk.f32.mxu0 %vm6243_vm0, %v7808_v8  ;;  %v6767_v13 = vpack.c.bf16 %v132_v60, %v129_v57  ;;  %v137_v60 = vld [vmem:[%s7797_s4 + $0x138] sm:$0xff] }
  0x85   :  { %5031 = vmatprep.subr.bf16.mxu0 %v7836_v2  ;;  %7894 = vst [vmem:[#allocation13_spill] sm:$0xff] %v6764_v6 }
  0x86   :  { %7895 = vst [vmem:[#allocation14_spill] sm:$0xff] %v6767_v13 }
  0x88   :  { %5033 = vmatpush3.bf16.msra.mxu0 %v6552_v32 }
  0x89   :  { %5034 = vmatprep.subr.bf16.mxu0 %v7836_v2 }
  0x8c   :  { %5036 = vmatpush3.bf16.msra.mxu0 %v6564_v35 }
  0x8d   :  { %5037 = vmatprep.subr.bf16.mxu0 %v7836_v2 }
  0x90   :  { %5039 = vmatpush3.bf16.msra.mxu0 %v6574_v41 }
  0x91   :  { %5040 = vmatprep.subr.bf16.mxu0 %v7836_v2 }
  0x94   :  { %5042 = vmatpush3.bf16.msra.mxu0 %v6584_v44 }
  0x95   :  { %5043 = vmatprep.subr.bf16.mxu0 %v7836_v2 }
  0x98   :  { %5045 = vmatpush3.bf16.msra.mxu0 %v6594_v50 }
  0x99   :  { %5046 = vmatprep.subr.bf16.mxu0 %v7836_v2 }
  0x9c   :  { %5048 = vmatpush3.bf16.msra.mxu0 %v6604_v53 }
  0x9d   :  { %5049 = vmatprep.subr.bf16.mxu0 %v7836_v2 }
  0xa0   :  { %5051 = vmatpush3.bf16.msra.mxu0 %v6615_v59 }
  0xa1   :  { %5084 = vmatprep.subr.bf16.mxu0 %v7836_v2 }
 0x156   :  { %v242_v15 = vpop.f32.mrb[0].mxu0 }
 0x157   :  { %v246_v27 = vmax.f32 %v242_v15, 0.0  ;;  %v4026_v28 = vpop.f32.mrb[1].mxu0  ;;  %v118_v15 = vld [vmem:[%s7797_s4 + $0xa0] sm:$0xff] }
 0x158   :  { %v126_v28 = vld [vmem:[%s7797_s4 + $0xe0] sm:$0xff]  ;;  %v6736_v39 = vpack.c.bf16 %v121_v21, %v118_v15  ;;  %v131_v15 = vld [vmem:[%s7797_s4 + $0x108] sm:$0xff] }
 0x159   :  { %328 = vmatmul.mubr.f32.vlgmr.msra.gmra.mrb[0].mxu1 %v246_v27  ;;  %4060 = vmatmul.mubr.f32.vlgmr.msra.gmra.mrb[2].mxu0 %v246_v27  ;;  %v123_v27 = vld [vmem:[%s7797_s4 + $0xc8] sm:$0xff]  ;;  %v130_v21 = vld [vmem:[%s7797_s4 + $0x100] sm:$0xff]  ;;  %v6786_v43 = vpack.c.bf16 %v131_v15, %v128_v63  ;;  %v136_v63 = vld [vmem:[%s7797_s4 + $0x130] sm:$0xff] }
 0x15a   :  { %5055 = vmatpush1.bf16.msra.mxu1 %v6646_v19  ;;  %5086 = vmatpush3.bf16.msra.mxu0 %v6651_v25  ;;  %v6739_v42 = vpack.c.bf16 %v126_v28, %v123_v27  ;;  %v133_v27 = vld [vmem:[%s7797_s4 + $0x118] sm:$0xff]  ;;  %v135_v28 = vld [vmem:[%s7797_s4 + $0x128] sm:$0xff] }
 0x15b   :  { %5057 = vmatprep.subr.bf16.mxu1 %v6653_v33  ;;  %5087 = vmatprep.subr.bf16.mxu0 %v7836_v2  ;;  %7896 = vst [vmem:[#allocation15_spill] sm:$0xff] %v6786_v43  ;;  %v6792_v54 = vpack.c.bf16 %v133_v27, %v130_v21  ;;  %v6795_v57 = vpack.c.bf16 %v138_v36, %v135_v28  ;;  %v139_v15 = vld [vmem:[%s7797_s4 + $0x148] sm:$0xff]  ;;  %v141_v21 = vld [vmem:[%s7797_s4 + $0x158] sm:$0xff]  ;;  %v144_v27 = vld [vmem:[%s7797_s4 + $0x170] sm:$0xff] }
 0x15c   :  { %484 = vmatprep.mubr.f32.mxu1 %v7808_v8  ;;  %4094 = vmatprep.mubr.msk.f32.mxu0 %vm6243_vm0, %v7808_v8  ;;  %7892 = vst [vmem:[#allocation11_spill] sm:$0xff] %v6739_v42  ;;  %v6814_v28 = vpack.c.bf16 %v137_v60, %v134_v48  ;;  %v140_v36 = vld [vmem:[%s7797_s4 + $0x150] sm:$0xff]  ;;  %v6820_v30 = vpack.c.bf16 %v139_v15, %v136_v63  ;;  %v143_v8 = vld [vmem:[%s7797_s4 + $0x168] sm:$0xff]  ;;  %v142_v48 = vld [vmem:[%s7797_s4 + $0x160] sm:$0xff] }
 0x15d   :  { %7897 = vst [vmem:[#allocation16_spill] sm:$0xff] %v6792_v54  ;;  %7898 = vst [vmem:[#allocation17_spill] sm:$0xff] %v6795_v57  ;;  %v6823_v18 = vpack.c.bf16 %v144_v27, %v141_v21  ;;  %v145_v60 = vld [vmem:[%s7797_s4 + $0x178] sm:$0xff]  ;;  %v6836_v63 = vpack.c.bf16 %v143_v8, %v140_v36  ;;  %v6847_v21 = vld [vmem:[%s7798_s1] sm:$0xff]  ;;  %v7904_v8 = vmov 0.0  }
 0x15e   :  { %5059 = vmatpush1.bf16.msra.mxu1 %v6671_v45  ;;  %5089 = vmatpush3.bf16.msra.mxu0 %v6677_v51  ;;  %7899 = vst [vmem:[#allocation18_spill] sm:$0xff] %v6814_v28  ;;  %7900 = vst [vmem:[#allocation19_spill] sm:$0xff] %v6820_v30  ;;  %v6839_v15 = vpack.c.bf16 %v145_v60, %v142_v48  ;;  %v148_v27 = vld [vmem:[%s7799_s7] sm:$0xff]  ;;  %v149_v36 = vld [vmem:[%s7799_s7 + $0x8] sm:$0xff] }
 0x15f   :  { %5061 = vmatprep.subr.bf16.mxu1 %v6680_v52  ;;  %5090 = vmatprep.subr.bf16.mxu0 %v7836_v2  ;;  %7901 = vst [vmem:[#allocation20_spill] sm:$0xff] %v6823_v18  ;;  %7902 = vst [vmem:[#allocation21_spill] sm:$0xff] %v6836_v63  ;;  %v6880_v48 = vpack.c.bf16 %v149_v36, %v148_v27  ;;  %v150_v60 = vld [vmem:[%s7799_s7 + $0x10] sm:$0xff]  ;;  %v152_v27 = vld [vmem:[%s7799_s7 + $0x20] sm:$0xff] }
 0x160   :  { %7903 = vst [vmem:[#allocation22_spill] sm:$0xff] %v6839_v15  ;;  %v153_v36 = vld [vmem:[%s7799_s7 + $0x28] sm:$0xff] }
 0x161   :  { %7905 = vst [vmem:[#allocation23_spill] sm:$0xff] %v6880_v48 }
 0x162   :  { %5063 = vmatpush1.bf16.msra.mxu1 %v6702_v4  ;;  %5092 = vmatpush3.bf16.msra.mxu0 %v6708_v7 }
 0x163   :  { %5065 = vmatprep.subr.bf16.mxu1 %v6711_v10  ;;  %5093 = vmatprep.subr.bf16.mxu0 %v7836_v2 }
 0x166   :  { %5067 = vmatpush1.bf16.msra.mxu1 %v6730_v34  ;;  %5095 = vmatpush3.bf16.msra.mxu0 %v6736_v39 }
 0x167   :  { %5069 = vmatprep.subr.bf16.mxu1 %v6739_v42  ;;  %5096 = vmatprep.subr.bf16.mxu0 %v7836_v2 }
 0x16a   :  { %5071 = vmatpush1.bf16.msra.mxu1 %v6758_v61  ;;  %5098 = vmatpush3.bf16.msra.mxu0 %v6764_v6 }
 0x16b   :  { %5073 = vmatprep.subr.bf16.mxu1 %v6767_v13  ;;  %5099 = vmatprep.subr.bf16.mxu0 %v7836_v2 }
 0x16e   :  { %5075 = vmatpush1.bf16.msra.mxu1 %v6786_v43  ;;  %5101 = vmatpush3.bf16.msra.mxu0 %v6792_v54 }
 0x16f   :  { %5077 = vmatprep.subr.bf16.mxu1 %v6795_v57  ;;  %5102 = vmatprep.subr.bf16.mxu0 %v7836_v2 }
 0x172   :  { %5079 = vmatpush1.bf16.msra.mxu1 %v6814_v28  ;;  %5104 = vmatpush3.bf16.msra.mxu0 %v6820_v30 }
 0x173   :  { %5081 = vmatprep.subr.bf16.mxu1 %v6823_v18  ;;  %5105 = vmatprep.subr.bf16.mxu0 %v7836_v2 }
 0x176   :  { %5083 = vmatpush1.bf16.msra.mxu1 %v6836_v63  ;;  %5107 = vmatpush3.bf16.msra.mxu0 %v6839_v15 }
 0x177   :  { %5108 = vmatprep.subr.bf16.mxu1 %v7836_v2  ;;  %5132 = vmatprep.subr.bf16.mxu0 %v7836_v2 }
 0x179   :  { %485 = vmatmul.mubr.f32.vlgmr.msra.gmra.mrb[0].mxu1 %v6847_v21  ;;  %4095 = vmatmul.mubr.f32.vlgmr.msra.gmra.mrb[4].mxu0 %v6847_v21 }
 0x17a   :  { %4129 = vmatprep.mubr.msk.f32.mxu1 %vm6243_vm0, %v7904_v8  ;;  %5134 = vmatpush3.bf16.msra.mxu0 %v6311_v5 }
 0x17b   :  { %5135 = vmatprep.subr.bf16.mxu0 %v7836_v2  ;;  %4164 = vmatprep.mubr.msk.f32.mxu0 %vm6243_vm0, %v7904_v8 }
 0x17c   :  { %5110 = vmatpush3.bf16.msra.mxu1 %v6880_v48 }
 0x17d   :  { %5111 = vmatprep.subr.bf16.mxu1 %v7836_v2 }
 0x17e   :  { %5137 = vmatpush3.bf16.msra.mxu0 %v6323_v9 }
 0x17f   :  { %5138 = vmatprep.subr.bf16.mxu0 %v7836_v2 }
 0x182   :  { %5140 = vmatpush3.bf16.msra.mxu0 %v6339_v14  ;;  %v160_v14 = vld [vmem:[%s7799_s7 + $0x60] sm:$0xff] }
 0x183   :  { %5141 = vmatprep.subr.bf16.mxu0 %v7836_v2 }
 0x186   :  { %5143 = vmatpush3.bf16.msra.mxu0 %v6383_v29 }
 0x187   :  { %5144 = vmatprep.subr.bf16.mxu0 %v7836_v2 }
 0x18a   :  { %5146 = vmatpush3.bf16.msra.mxu0 %v6411_v38 }
 0x18b   :  { %5147 = vmatprep.subr.bf16.mxu0 %v7836_v2 }
 0x18e   :  { %5149 = vmatpush3.bf16.msra.mxu0 %v6439_v47  ;;  %v6900_v47 = vpack.c.bf16 %v153_v36, %v152_v27  ;;  %v156_v27 = vld [vmem:[%s7799_s7 + $0x40] sm:$0xff]  ;;  %v157_v36 = vld [vmem:[%s7799_s7 + $0x48] sm:$0xff] }
 0x18f   :  { %5150 = vmatprep.subr.bf16.mxu0 %v7836_v2  ;;  %v6920_v29 = vpack.c.bf16 %v157_v36, %v156_v27  ;;  %v161_v27 = vld [vmem:[%s7799_s7 + $0x68] sm:$0xff] }
 0x190   :  { %7907 = vst [vmem:[#allocation25_spill] sm:$0xff] %v6900_v47  ;;  %v6939_v36 = vpack.c.bf16 %v161_v27, %v160_v14 }
 0x191   :  { %7909 = vst [vmem:[#allocation27_spill] sm:$0xff] %v6920_v29 }
 0x192   :  { %5152 = vmatpush3.bf16.msra.mxu0 %v6467_v56  ;;  %7911 = vst [vmem:[#allocation29_spill] sm:$0xff] %v6939_v36 }
 0x193   :  { %5153 = vmatprep.subr.bf16.mxu0 %v7836_v2 }
 0x196   :  { %5155 = vmatpush3.bf16.msra.mxu0 %v6495_v1  ;;  %v151_v1 = vld [vmem:[%s7799_s7 + $0x18] sm:$0xff] }
 0x197   :  { %5188 = vmatprep.subr.bf16.mxu0 %v7836_v2  ;;  %v6890_v56 = vpack.c.bf16 %v151_v1, %v150_v60  ;;  %v154_v1 = vld [vmem:[%s7799_s7 + $0x30] sm:$0xff]  ;;  %v155_v60 = vld [vmem:[%s7799_s7 + $0x38] sm:$0xff] }
 0x198   :  { %v6910_v38 = vpack.c.bf16 %v155_v60, %v154_v1  ;;  %v158_v1 = vld [vmem:[%s7799_s7 + $0x50] sm:$0xff]  ;;  %v159_v60 = vld [vmem:[%s7799_s7 + $0x58] sm:$0xff] }
 0x199   :  { %7906 = vst [vmem:[#allocation24_spill] sm:$0xff] %v6890_v56  ;;  %5113 = vmatpush3.bf16.msra.mxu1 %v6890_v56  ;;  %v147_v56 = vld [vmem:[%s7800_s6] sm:$0x7] }
 0x19a   :  { %5114 = vmatprep.subr.bf16.mxu1 %v7836_v2  ;;  %7908 = vst [vmem:[#allocation26_spill] sm:$0xff] %v6910_v38 }
 0x19d   :  { %5116 = vmatpush3.bf16.msra.mxu1 %v6900_v47 }
 0x19e   :  { %5117 = vmatprep.subr.bf16.mxu1 %v7836_v2 }
 0x1a1   :  { %5119 = vmatpush3.bf16.msra.mxu1 %v6910_v38  ;;  %v6930_v38 = vpack.c.bf16 %v159_v60, %v158_v1  ;;  %v163_v1 = vld [vmem:[%s7799_s7 + $0x78] sm:$0xff] }
 0x1a2   :  { %5120 = vmatprep.subr.bf16.mxu1 %v7836_v2 }
 0x1a3   :  { %7910 = vst [vmem:[#allocation28_spill] sm:$0xff] %v6930_v38 }
 0x1a5   :  { %5122 = vmatpush3.bf16.msra.mxu1 %v6920_v29  ;;  %v162_v29 = vld [vmem:[%s7799_s7 + $0x70] sm:$0xff] }
 0x1a6   :  { %5123 = vmatprep.subr.bf16.mxu1 %v7836_v2  ;;  %v6949_v60 = vpack.c.bf16 %v163_v1, %v162_v29  ;;  %v146_v29 = vld [vmem:[%s7801_s5] sm:$0x7] }
 0x1a8   :  { %7912 = vst [vmem:[#allocation30_spill] sm:$0xff] %v6949_v60 }
 0x1a9   :  { %5125 = vmatpush3.bf16.msra.mxu1 %v6930_v38  ;;  %v7913_v38 = vlaneseq }
 0x1aa   :  { %5126 = vmatprep.subr.bf16.mxu1 %v7836_v2 }
 0x1ab   :  { %v249_v47 = vshrl.u32 %v7913_v38, 7 }
 0x1ad   :  { %5128 = vmatpush3.bf16.msra.mxu1 %v6939_v36  ;;  %v250_v9 = vsub.s32 0, %v249_v47  ;;  %v254_v1 = vsub.s32 1, %v249_v47 }
 0x1ae   :  { %5129 = vmatprep.subr.bf16.mxu1 %v7836_v2 }
 0x1af   :  { %v251_v36 = vrot.slane %v146_v29, %v250_v9  ;;  %v408_v2 = vrot.slane %v147_v56, %v250_v9  ;;  %v255_v5 = vrot.slane %v146_v29, %v254_v1 }
 0x1b1   :  { %5131 = vmatpush3.bf16.msra.mxu1 %v6949_v60  ;;  %v412_v60 = vrot.slane %v147_v56, %v254_v1  ;;  %v6961_v48 = vadd.f32 %v408_v2, %v251_v36  ;;  %v258_v1 = vsub.s32 2, %v249_v47 }
 0x1b2   :  { %5157 = vmatprep.subr.bf16.mxu1 %v6344_v16 }
 0x1b3   :  { %7914 = vst [vmem:[#allocation31_spill] sm:$0xff] %v6961_v48  ;;  %v6963_v16 = vadd.f32 %v412_v60, %v255_v5  ;;  %v6967_v2 = vrot.slane %v147_v56, %v258_v1  ;;  %v6969_v36 = vrot.slane %v146_v29, %v258_v1 }
 0x22c   :  { %v400_v14 = vpop.f32.mrb[2].mxu0 }
 0x22d   :  { %v4061_v27 = vpop.f32.mrb[3].mxu0 }
 0x24c   :  { %v486_v27 = vpop.f32.mrb[0].mxu1  ;;  %v557_v38 = vpop.f32.mrb[4].mxu0 }
 0x24d   :  { %v6093_v15 = vadd.f32 %v6961_v48, %v486_v27  ;;  %v488_v63 = vpop.f32.mrb[1].mxu1  ;;  %v4096_v18 = vpop.f32.mrb[5].mxu0  ;;  %v558_v27 = vadd.f32 %v557_v38, %v6967_v2  ;;  %v7004_v38 = vcvt.s32.f32 %v6539_v22 }
 0x24e   :  { %v6095_v28 = vadd.f32 %v6963_v16, %v488_v63  ;;  %v401_v18 = vadd.f32 %v400_v14, %v6969_v36 }
 0x24f   :  { %v3477_v30 = vmul.f32 -1.442695, %v6093_v15 }
 0x250   :  { %v3478_v57 = vmul.f32 -1.442695, %v6095_v28 }
 0x251   :  { %6140 = vpow2.f32 %v3477_v30 }
 0x252   :  { %6142 = vpow2.f32 %v3478_v57 }
 0x25b   :  { %v6141_v54 = vpop.eup %6140 }
 0x25c   :  { %v565_v9 = vadd.f32 1.0, %v6141_v54  ;;  %v6143_v5 = vpop.eup %6142 }
 0x25d   :  { %v572_v60 = vadd.f32 1.0, %v6143_v5 }
 0x25e   :  { %6144 = vrcp.f32 %v565_v9 }
 0x25f   :  { %6146 = vrcp.f32 %v572_v60  ;;  %v7916_v60 = vmov 1.0  }
 0x268   :  { %v6145_v48 = vpop.eup %6144 }
 0x269   :  { %v575_v63 = vmul.f32 %v6145_v48, %v558_v27  ;;  %v6147_v57 = vpop.eup %6146  ;;  %v7917_v27 = vmov 0.0|0.0  }
 0x26a   :  { %v578_v28 = vsub.f32 1.0, %v6147_v57  ;;  %v580_v47 = vmul.f32 %v6147_v57, %v6847_v21  ;;  %v6997_v21 = vld [vmem:[%s7802_s8] ss:$0 sm:$0xff]  ;;  %v7919_v57 = vld [vmem:[#allocation17_spill] sm:$0xff] }
 0x26b   :  { %v576_v30 = vadd.f32 %v575_v63, %v401_v18 }
 0x26d   :  { %6148 = vtanh.f32 %v576_v30  ;;  %v7918_v30 = vld [vmem:[#allocation16_spill] sm:$0xff] }
 0x277   :  { %v6149_v54 = vpop.eup %6148 }
 0x278   :  { %v579_v15 = vmul.f32 %v6149_v54, %v578_v28  ;;  %v7920_v28 = vld [vmem:[#allocation18_spill] sm:$0xff]  ;;  %v7921_v54 = vld [vmem:[#allocation19_spill] sm:$0xff] }
 0x27a   :  { %v6974_v56 = vadd.f32 %v580_v47, %v579_v15  ;;  %v7922_v15 = vld [vmem:[#allocation20_spill] sm:$0xff]  ;;  %v7923_v47 = vld [vmem:[#allocation21_spill] sm:$0xff] }
 0x27c   :  { %4130 = vmatmul.mubr.f32.vlgmr.msra.gmra.mrb[2].mxu1 %v6974_v56 }
 0x27d   :  { %5159 = vmatpush1.bf16.msra.mxu1 %v6356_v20  ;;  %813 = vmatprep.mubr.f32.mxu1 %v7904_v8 }
 0x27e   :  { %5161 = vmatprep.subr.bf16.mxu1 %v6365_v23 }
 0x281   :  { %5163 = vmatpush1.bf16.msra.mxu1 %v6374_v26 }
 0x282   :  { %5165 = vmatprep.subr.bf16.mxu1 %v6389_v31 }
 0x285   :  { %5167 = vmatpush1.bf16.msra.mxu1 %v6408_v37 }
 0x286   :  { %5169 = vmatprep.subr.bf16.mxu1 %v6417_v40 }
 0x289   :  { %5171 = vmatpush1.bf16.msra.mxu1 %v6436_v46 }
 0x28a   :  { %5173 = vmatprep.subr.bf16.mxu1 %v6445_v49 }
 0x28d   :  { %5175 = vmatpush1.bf16.msra.mxu1 %v6464_v55 }
 0x28e   :  { %5177 = vmatprep.subr.bf16.mxu1 %v6473_v58 }
 0x291   :  { %5179 = vmatpush1.bf16.msra.mxu1 %v6492_v0 }
 0x292   :  { %5181 = vmatprep.subr.bf16.mxu1 %v6498_v3 }
 0x295   :  { %5183 = vmatpush1.bf16.msra.mxu1 %v6514_v11 }
 0x296   :  { %5185 = vmatprep.subr.bf16.mxu1 %v6518_v12 }
 0x299   :  { %5187 = vmatpush1.bf16.msra.mxu1 %v6528_v17 }
 0x29a   :  { %5213 = vmatprep.subr.bf16.mxu1 %v6624_v62 }
 0x34f   :  { %v654_v48 = vpop.f32.mrb[2].mxu1 }
 0x350   :  { %v655_v14 = vadd.f32 %v6997_v21, %v654_v48  ;;  %v4131_v29 = vpop.f32.mrb[3].mxu1  ;;  %v7924_v48 = vld [vmem:[#allocation22_spill] sm:$0xff] }
 0x351   :  { %v7926_v29 = vld [vmem:[#allocation2_spill] sm:$0xff] }
 0x352   :  { %658 = vst [vmem:[%s7803_s9] sm:$0xff] %v655_v14  ;;  %659 = vmax.xlane.f32.xlu0 %v655_v14 }
 0x3df   :  { %v7006_v9 = vpop.xlane.xlu0 %659 }
 0x3e0   :  { %7915 = vst [vmem:[#allocation32_spill] sm:$0xff] %v7006_v9  ;;  %vm671_vm2 = vcmp.eq.f32.partialorder %v655_v14, %v7006_v9  ;;  %v7925_v14 = vld [vmem:[#allocation23_spill] sm:$0xff]  ;;  %v7932_v9 = vld [vmem:[#allocation6_spill] sm:$0xff] }
 0x3e1   :  { %v672_v1 = vsel %vm671_vm2, %v7004_v38, 128.0 }
 0x3e2   :  { %673 = vmin.xlane.f32.xlu1 %v672_v1  ;;  %v7927_v1 = vld [vmem:[#allocation24_spill] sm:$0xff] }
 0x46f   :  { %v674_v5 = vpop.xlane.xlu1 %673 }
 0x470   :  { %vm675_vm3 = vcmp.eq.f32.partialorder %v7004_v38, %v674_v5  ;;  %v7928_v5 = vld [vmem:[#allocation3_spill] sm:$0xff] }
 0x471   :  { %4165 = vmatmul.mubr.msk.f32.vlgmr.msra.gmra.mrb[6].mxu0 %vm675_vm3, %v7916_v60 }
 0x472   :  { %5190 = vmatpush3.bf16.msra.mxu0 %v6541_v24  ;;  %4199 = vmatprep.mubr.msk.f32.mxu0 %vm6243_vm0, %v7904_v8 }
 0x473   :  { %5191 = vmatprep.subr.bf16.mxu0 %v7917_v27 }
 0x476   :  { %5193 = vmatpush3.bf16.msra.mxu0 %v6552_v32 }
 0x477   :  { %5194 = vmatprep.subr.bf16.mxu0 %v7917_v27 }
 0x47a   :  { %5196 = vmatpush3.bf16.msra.mxu0 %v6564_v35 }
 0x47b   :  { %5197 = vmatprep.subr.bf16.mxu0 %v7917_v27 }
 0x47e   :  { %5199 = vmatpush3.bf16.msra.mxu0 %v6574_v41 }
 0x47f   :  { %5200 = vmatprep.subr.bf16.mxu0 %v7917_v27 }
 0x482   :  { %5202 = vmatpush3.bf16.msra.mxu0 %v6584_v44 }
 0x483   :  { %5203 = vmatprep.subr.bf16.mxu0 %v7917_v27 }
 0x486   :  { %5205 = vmatpush3.bf16.msra.mxu0 %v6594_v50 }
 0x487   :  { %5206 = vmatprep.subr.bf16.mxu0 %v7917_v27 }
 0x48a   :  { %5208 = vmatpush3.bf16.msra.mxu0 %v6604_v53 }
 0x48b   :  { %5209 = vmatprep.subr.bf16.mxu0 %v7917_v27 }
 0x48e   :  { %5211 = vmatpush3.bf16.msra.mxu0 %v6615_v59 }
 0x48f   :  { %5244 = vmatprep.subr.bf16.mxu0 %v7917_v27 }
 0x544   :  { %v744_v22 = vpop.f32.mrb[6].mxu0 }
 0x545   :  { %v748_v18 = vmax.f32 %v744_v22, 0.0  ;;  %v4166_v63 = vpop.f32.mrb[7].mxu0  ;;  %v7929_v22 = vld [vmem:[#allocation25_spill] sm:$0xff] }
 0x546   :  { %v7931_v63 = vld [vmem:[#allocation26_spill] sm:$0xff] }
 0x547   :  { %814 = vmatmul.mubr.f32.vlgmr.msra.gmra.mrb[4].mxu1 %v748_v18  ;;  %4200 = vmatmul.mubr.f32.vlgmr.msra.gmra.mrb[8].mxu0 %v748_v18  ;;  %v7930_v18 = vld [vmem:[#allocation4_spill] sm:$0xff] }
 0x548   :  { %5215 = vmatpush1.bf16.msra.mxu1 %v6646_v19  ;;  %5246 = vmatpush3.bf16.msra.mxu0 %v6651_v25 }
 0x549   :  { %5217 = vmatprep.subr.bf16.mxu1 %v6653_v33  ;;  %5247 = vmatprep.subr.bf16.mxu0 %v7917_v27 }
 0x54a   :  { %954 = vmatprep.mubr.f32.mxu1 %v7904_v8  ;;  %4234 = vmatprep.mubr.msk.f32.mxu0 %vm6243_vm0, %v7904_v8 }
 0x54c   :  { %5219 = vmatpush1.bf16.msra.mxu1 %v6671_v45  ;;  %5249 = vmatpush3.bf16.msra.mxu0 %v6677_v51 }
 0x54d   :  { %5221 = vmatprep.subr.bf16.mxu1 %v6680_v52  ;;  %5250 = vmatprep.subr.bf16.mxu0 %v7917_v27 }
 0x550   :  { %5223 = vmatpush1.bf16.msra.mxu1 %v6702_v4  ;;  %5252 = vmatpush3.bf16.msra.mxu0 %v6708_v7 }
 0x551   :  { %5225 = vmatprep.subr.bf16.mxu1 %v6711_v10  ;;  %5253 = vmatprep.subr.bf16.mxu0 %v7917_v27 }
 0x554   :  { %5227 = vmatpush1.bf16.msra.mxu1 %v6730_v34  ;;  %5255 = vmatpush3.bf16.msra.mxu0 %v6736_v39 }
 0x555   :  { %5229 = vmatprep.subr.bf16.mxu1 %v6739_v42  ;;  %5256 = vmatprep.subr.bf16.mxu0 %v7917_v27 }
 0x558   :  { %5231 = vmatpush1.bf16.msra.mxu1 %v6758_v61  ;;  %5258 = vmatpush3.bf16.msra.mxu0 %v6764_v6 }
 0x559   :  { %5233 = vmatprep.subr.bf16.mxu1 %v6767_v13  ;;  %5259 = vmatprep.subr.bf16.mxu0 %v7917_v27 }
 0x55c   :  { %5235 = vmatpush1.bf16.msra.mxu1 %v6786_v43  ;;  %5261 = vmatpush3.bf16.msra.mxu0 %v7918_v30 }
 0x55d   :  { %5237 = vmatprep.subr.bf16.mxu1 %v7919_v57  ;;  %5262 = vmatprep.subr.bf16.mxu0 %v7917_v27 }
 0x560   :  { %5239 = vmatpush1.bf16.msra.mxu1 %v7920_v28  ;;  %5264 = vmatpush3.bf16.msra.mxu0 %v7921_v54 }
 0x561   :  { %5241 = vmatprep.subr.bf16.mxu1 %v7922_v15  ;;  %5265 = vmatprep.subr.bf16.mxu0 %v7917_v27 }
 0x564   :  { %5243 = vmatpush1.bf16.msra.mxu1 %v7923_v47  ;;  %5267 = vmatpush3.bf16.msra.mxu0 %v7924_v48  ;;  %v7942_v47 = vld [vmem:[#allocation31_spill] sm:$0xff] }
 0x565   :  { %5268 = vmatprep.subr.bf16.mxu1 %v7917_v27  ;;  %5292 = vmatprep.subr.bf16.mxu0 %v7917_v27 }
 0x567   :  { %955 = vmatmul.mubr.f32.vlgmr.msra.gmra.mrb[4].mxu1 %v6974_v56  ;;  %4235 = vmatmul.mubr.f32.vlgmr.msra.gmra.mrb[10].mxu0 %v6974_v56 }
 0x568   :  { %5270 = vmatpush3.bf16.msra.mxu1 %v7925_v14  ;;  %4269 = vmatprep.mubr.msk.f32.mxu1 %vm6243_vm0, %v7904_v8 }
 0x569   :  { %5271 = vmatprep.subr.bf16.mxu1 %v7917_v27  ;;  %5294 = vmatpush3.bf16.msra.mxu0 %v7926_v29  ;;  %v7941_v29 = vld [vmem:[#allocation5_spill] sm:$0xff] }
 0x56a   :  { %5295 = vmatprep.subr.bf16.mxu0 %v7917_v27  ;;  %4304 = vmatprep.mubr.msk.f32.mxu0 %vm6243_vm0, %v7904_v8 }
 0x56c   :  { %5273 = vmatpush3.bf16.msra.mxu1 %v7927_v1  ;;  %v7933_v1 = vld [vmem:[#allocation27_spill] sm:$0xff] }
 0x56d   :  { %5274 = vmatprep.subr.bf16.mxu1 %v7917_v27  ;;  %5297 = vmatpush3.bf16.msra.mxu0 %v7928_v5  ;;  %v7934_v5 = vld [vmem:[#allocation7_spill] sm:$0xff] }
 0x56e   :  { %5298 = vmatprep.subr.bf16.mxu0 %v7917_v27 }
 0x570   :  { %5276 = vmatpush3.bf16.msra.mxu1 %v7929_v22  ;;  %v7935_v22 = vld [vmem:[#allocation28_spill] sm:$0xff] }
 0x571   :  { %5277 = vmatprep.subr.bf16.mxu1 %v7917_v27  ;;  %5300 = vmatpush3.bf16.msra.mxu0 %v7930_v18  ;;  %v7936_v18 = vld [vmem:[#allocation8_spill] sm:$0xff] }
 0x572   :  { %5301 = vmatprep.subr.bf16.mxu0 %v7917_v27 }
 0x574   :  { %5279 = vmatpush3.bf16.msra.mxu1 %v7931_v63  ;;  %v7937_v63 = vld [vmem:[#allocation29_spill] sm:$0xff] }
 0x575   :  { %5280 = vmatprep.subr.bf16.mxu1 %v7917_v27  ;;  %5303 = vmatpush3.bf16.msra.mxu0 %v7932_v9  ;;  %v7938_v9 = vld [vmem:[#allocation9_spill] sm:$0xff] }
 0x576   :  { %5304 = vmatprep.subr.bf16.mxu0 %v7917_v27 }
 0x578   :  { %5282 = vmatpush3.bf16.msra.mxu1 %v7933_v1  ;;  %v7939_v1 = vld [vmem:[#allocation30_spill] sm:$0xff] }
 0x579   :  { %5283 = vmatprep.subr.bf16.mxu1 %v7917_v27  ;;  %5306 = vmatpush3.bf16.msra.mxu0 %v7934_v5  ;;  %v7940_v5 = vld [vmem:[#allocation10_spill] sm:$0xff] }
 0x57a   :  { %5307 = vmatprep.subr.bf16.mxu0 %v7917_v27 }
 0x57c   :  { %5285 = vmatpush3.bf16.msra.mxu1 %v7935_v22 }
 0x57d   :  { %5286 = vmatprep.subr.bf16.mxu1 %v7917_v27  ;;  %5309 = vmatpush3.bf16.msra.mxu0 %v7936_v18 }
 0x57e   :  { %5310 = vmatprep.subr.bf16.mxu0 %v7917_v27 }
 0x580   :  { %5288 = vmatpush3.bf16.msra.mxu1 %v7937_v63 }
 0x581   :  { %5289 = vmatprep.subr.bf16.mxu1 %v7917_v27  ;;  %5312 = vmatpush3.bf16.msra.mxu0 %v7938_v9 }
 0x582   :  { %5313 = vmatprep.subr.bf16.mxu0 %v7917_v27 }
 0x584   :  { %5291 = vmatpush3.bf16.msra.mxu1 %v7939_v1 }
 0x585   :  { %5315 = vmatpush3.bf16.msra.mxu0 %v7940_v5  ;;  %5317 = vmatprep.subr.bf16.mxu1 %v7941_v29 }
 0x586   :  { %5348 = vmatprep.subr.bf16.mxu0 %v7917_v27 }
 0x61a   :  { %v886_v22 = vpop.f32.mrb[8].mxu0 }
 0x61b   :  { %v4201_v18 = vpop.f32.mrb[9].mxu0  ;;  %v887_v13 = vadd.f32 %v886_v22, %v6969_v36  ;;  %v7944_v22 = vld [vmem:[#allocation13_spill] sm:$0xff] }
 0x63a   :  { %v956_v14 = vpop.f32.mrb[4].mxu1  ;;  %v1027_v48 = vpop.f32.mrb[10].mxu0 }
 0x63b   :  { %v6097_v63 = vadd.f32 %v7942_v47, %v956_v14  ;;  %v958_v15 = vpop.f32.mrb[5].mxu1  ;;  %v4236_v54 = vpop.f32.mrb[11].mxu0  ;;  %v1028_v43 = vadd.f32 %v1027_v48, %v6967_v2 }
 0x63c   :  { %v6099_v9 = vadd.f32 %v6963_v16, %v958_v15 }
 0x63d   :  { %v3482_v28 = vmul.f32 -1.442695, %v6097_v63 }
 0x63e   :  { %v3483_v57 = vmul.f32 -1.442695, %v6099_v9 }
 0x63f   :  { %6150 = vpow2.f32 %v3482_v28 }
 0x640   :  { %6152 = vpow2.f32 %v3483_v57 }
 0x649   :  { %v6151_v1 = vpop.eup %6150 }
 0x64a   :  { %v1035_v5 = vadd.f32 1.0, %v6151_v1  ;;  %v6153_v29 = vpop.eup %6152 }
 0x64b   :  { %v1042_v30 = vadd.f32 1.0, %v6153_v29 }
 0x64c   :  { %6154 = vrcp.f32 %v1035_v5 }
 0x64d   :  { %6156 = vrcp.f32 %v1042_v30 }
 0x656   :  { %v6155_v18 = vpop.eup %6154 }
 0x657   :  { %v1045_v6 = vmul.f32 %v6155_v18, %v1028_v43  ;;  %v6157_v54 = vpop.eup %6156  ;;  %v7945_v18 = vld [vmem:[#allocation14_spill] sm:$0xff] }
 0x658   :  { %v1048_v63 = vsub.f32 1.0, %v6157_v54  ;;  %v1050_v9 = vmul.f32 %v6157_v54, %v6974_v56  ;;  %v7947_v54 = vld [vmem:[#allocation16_spill] sm:$0xff] }
 0x659   :  { %v1046_v14 = vadd.f32 %v1045_v6, %v887_v13 }
 0x65b   :  { %6158 = vtanh.f32 %v1046_v14  ;;  %v7946_v14 = vld [vmem:[#allocation15_spill] sm:$0xff] }
 0x665   :  { %v6159_v15 = vpop.eup %6158 }
 0x666   :  { %v1049_v28 = vmul.f32 %v6159_v15, %v1048_v63  ;;  %v7948_v63 = vld [vmem:[#allocation17_spill] sm:$0xff]  ;;  %v7949_v15 = vld [vmem:[#allocation18_spill] sm:$0xff] }
 0x668   :  { %v7108_v57 = vadd.f32 %v1050_v9, %v1049_v28  ;;  %v7950_v28 = vld [vmem:[#allocation19_spill] sm:$0xff]  ;;  %v7951_v9 = vld [vmem:[#allocation20_spill] sm:$0xff] }
 0x66a   :  { %4270 = vmatmul.mubr.f32.vlgmr.msra.gmra.mrb[6].mxu1 %v7108_v57 }
 0x66b   :  { %5319 = vmatpush1.bf16.msra.mxu1 %v6356_v20  ;;  %1279 = vmatprep.mubr.f32.mxu1 %v7904_v8 }
 0x66c   :  { %5321 = vmatprep.subr.bf16.mxu1 %v6365_v23 }
 0x66f   :  { %5323 = vmatpush1.bf16.msra.mxu1 %v6374_v26 }
 0x670   :  { %5325 = vmatprep.subr.bf16.mxu1 %v6389_v31 }
 0x673   :  { %5327 = vmatpush1.bf16.msra.mxu1 %v6408_v37 }
 0x674   :  { %5329 = vmatprep.subr.bf16.mxu1 %v6417_v40 }
 0x677   :  { %5331 = vmatpush1.bf16.msra.mxu1 %v6436_v46 }
 0x678   :  { %5333 = vmatprep.subr.bf16.mxu1 %v6445_v49 }
 0x67b   :  { %5335 = vmatpush1.bf16.msra.mxu1 %v6464_v55 }
 0x67c   :  { %5337 = vmatprep.subr.bf16.mxu1 %v6473_v58 }
 0x67f   :  { %5339 = vmatpush1.bf16.msra.mxu1 %v6492_v0 }
 0x680   :  { %5341 = vmatprep.subr.bf16.mxu1 %v6498_v3 }
 0x683   :  { %5343 = vmatpush1.bf16.msra.mxu1 %v6514_v11 }
 0x684   :  { %5345 = vmatprep.subr.bf16.mxu1 %v6518_v12 }
 0x687   :  { %5347 = vmatpush1.bf16.msra.mxu1 %v6528_v17 }
 0x688   :  { %5373 = vmatprep.subr.bf16.mxu1 %v6624_v62 }
 0x73d   :  { %v1118_v6 = vpop.f32.mrb[6].mxu1 }
 0x73e   :  { %v1119_v13 = vadd.f32 %v6997_v21, %v1118_v6  ;;  %v4271_v43 = vpop.f32.mrb[7].mxu1  ;;  %v7952_v6 = vld [vmem:[#allocation21_spill] sm:$0xff] }
 0x73f   :  { %v7954_v43 = vld [vmem:[#allocation23_spill] sm:$0xff] }
 0x740   :  { %3484 = vst [vmem:[%s7803_s9 + $0x8] sm:$0xff] %v1119_v13  ;;  %1124 = vmax.xlane.f32.xlu1 %v1119_v13 }
 0x7cd   :  { %v7132_v56 = vpop.xlane.xlu1 %1124 }
 0x7ce   :  { %7943 = vst [vmem:[#allocation31_spill] sm:$0xff] %v7132_v56  ;;  %vm1137_vm4 = vcmp.eq.f32.partialorder %v1119_v13, %v7132_v56  ;;  %v7953_v13 = vld [vmem:[#allocation22_spill] sm:$0xff] }
 0x7cf   :  { %v1138_v30 = vsel %vm1137_vm4, %v7004_v38, 128.0  ;;  %v7960_v56 = vld [vmem:[#allocation26_spill] sm:$0xff] }
 0x7d0   :  { %1139 = vmin.xlane.f32.xlu1 %v1138_v30  ;;  %v7955_v30 = vld [vmem:[#allocation2_spill] sm:$0xff] }
 0x85d   :  { %v1140_v48 = vpop.xlane.xlu1 %1139 }
 0x85e   :  { %vm1141_vm5 = vcmp.eq.f32.partialorder %v7004_v38, %v1140_v48  ;;  %v7956_v48 = vld [vmem:[#allocation24_spill] sm:$0xff] }
 0x85f   :  { %4305 = vmatmul.mubr.msk.f32.vlgmr.msra.gmra.mrb[12].mxu0 %vm1141_vm5, %v7916_v60 }
 0x860   :  { %5350 = vmatpush3.bf16.msra.mxu0 %v6541_v24  ;;  %4339 = vmatprep.mubr.msk.f32.mxu0 %vm6243_vm0, %v7904_v8 }
 0x861   :  { %5351 = vmatprep.subr.bf16.mxu0 %v7917_v27 }
 0x864   :  { %5353 = vmatpush3.bf16.msra.mxu0 %v6552_v32 }
 0x865   :  { %5354 = vmatprep.subr.bf16.mxu0 %v7917_v27 }
 0x868   :  { %5356 = vmatpush3.bf16.msra.mxu0 %v6564_v35 }
 0x869   :  { %5357 = vmatprep.subr.bf16.mxu0 %v7917_v27 }
 0x86c   :  { %5359 = vmatpush3.bf16.msra.mxu0 %v6574_v41 }
 0x86d   :  { %5360 = vmatprep.subr.bf16.mxu0 %v7917_v27 }
 0x870   :  { %5362 = vmatpush3.bf16.msra.mxu0 %v6584_v44 }
 0x871   :  { %5363 = vmatprep.subr.bf16.mxu0 %v7917_v27 }
 0x874   :  { %5365 = vmatpush3.bf16.msra.mxu0 %v6594_v50 }
 0x875   :  { %5366 = vmatprep.subr.bf16.mxu0 %v7917_v27 }
 0x878   :  { %5368 = vmatpush3.bf16.msra.mxu0 %v6604_v53 }
 0x879   :  { %5369 = vmatprep.subr.bf16.mxu0 %v7917_v27 }
 0x87c   :  { %5371 = vmatpush3.bf16.msra.mxu0 %v6615_v59 }
 0x87d   :  { %5404 = vmatprep.subr.bf16.mxu0 %v7917_v27 }
 0x932   :  { %v1210_v29 = vpop.f32.mrb[12].mxu0 }
 0x933   :  { %v1214_v1 = vmax.f32 %v1210_v29, 0.0  ;;  %v4306_v5 = vpop.f32.mrb[13].mxu0  ;;  %v7957_v29 = vld [vmem:[#allocation3_spill] sm:$0xff] }
 0x934   :  { %v7959_v5 = vld [vmem:[#allocation4_spill] sm:$0xff] }
 0x935   :  { %1280 = vmatmul.mubr.f32.vlgmr.msra.gmra.mrb[8].mxu1 %v1214_v1  ;;  %4340 = vmatmul.mubr.f32.vlgmr.msra.gmra.mrb[14].mxu0 %v1214_v1  ;;  %v7958_v1 = vld [vmem:[#allocation25_spill] sm:$0xff] }
 0x936   :  { %5375 = vmatpush1.bf16.msra.mxu1 %v6646_v19  ;;  %5406 = vmatpush3.bf16.msra.mxu0 %v6651_v25 }
 0x937   :  { %5377 = vmatprep.subr.bf16.mxu1 %v6653_v33  ;;  %5407 = vmatprep.subr.bf16.mxu0 %v7917_v27 }
 0x938   :  { %1420 = vmatprep.mubr.f32.mxu1 %v7904_v8  ;;  %4374 = vmatprep.mubr.msk.f32.mxu0 %vm6243_vm0, %v7904_v8 }
 0x93a   :  { %5379 = vmatpush1.bf16.msra.mxu1 %v6671_v45  ;;  %5409 = vmatpush3.bf16.msra.mxu0 %v6677_v51 }
 0x93b   :  { %5381 = vmatprep.subr.bf16.mxu1 %v6680_v52  ;;  %5410 = vmatprep.subr.bf16.mxu0 %v7917_v27 }
 0x93e   :  { %5383 = vmatpush1.bf16.msra.mxu1 %v6702_v4  ;;  %5412 = vmatpush3.bf16.msra.mxu0 %v6708_v7 }
 0x93f   :  { %5385 = vmatprep.subr.bf16.mxu1 %v6711_v10  ;;  %5413 = vmatprep.subr.bf16.mxu0 %v7917_v27 }
 0x942   :  { %5387 = vmatpush1.bf16.msra.mxu1 %v6730_v34  ;;  %5415 = vmatpush3.bf16.msra.mxu0 %v6736_v39 }
 0x943   :  { %5389 = vmatprep.subr.bf16.mxu1 %v6739_v42  ;;  %5416 = vmatprep.subr.bf16.mxu0 %v7917_v27 }
 0x946   :  { %5391 = vmatpush1.bf16.msra.mxu1 %v6758_v61  ;;  %5418 = vmatpush3.bf16.msra.mxu0 %v7944_v22 }
 0x947   :  { %5393 = vmatprep.subr.bf16.mxu1 %v7945_v18  ;;  %5419 = vmatprep.subr.bf16.mxu0 %v7917_v27 }
 0x94a   :  { %5395 = vmatpush1.bf16.msra.mxu1 %v7946_v14  ;;  %5421 = vmatpush3.bf16.msra.mxu0 %v7947_v54 }
 0x94b   :  { %5397 = vmatprep.subr.bf16.mxu1 %v7948_v63  ;;  %5422 = vmatprep.subr.bf16.mxu0 %v7917_v27 }
 0x94e   :  { %5399 = vmatpush1.bf16.msra.mxu1 %v7949_v15  ;;  %5424 = vmatpush3.bf16.msra.mxu0 %v7950_v28 }
 0x94f   :  { %5401 = vmatprep.subr.bf16.mxu1 %v7951_v9  ;;  %5425 = vmatprep.subr.bf16.mxu0 %v7917_v27 }
 0x952   :  { %5403 = vmatpush1.bf16.msra.mxu1 %v7952_v6  ;;  %5427 = vmatpush3.bf16.msra.mxu0 %v7953_v13 }
 0x953   :  { %5428 = vmatprep.subr.bf16.mxu1 %v7917_v27  ;;  %5452 = vmatprep.subr.bf16.mxu0 %v7917_v27 }
 0x955   :  { %1421 = vmatmul.mubr.f32.vlgmr.msra.gmra.mrb[8].mxu1 %v7108_v57  ;;  %4375 = vmatmul.mubr.f32.vlgmr.msra.gmra.mrb[16].mxu0 %v7108_v57 }
 0x956   :  { %5430 = vmatpush3.bf16.msra.mxu1 %v7954_v43  ;;  %4409 = vmatprep.mubr.msk.f32.mxu1 %vm6243_vm0, %v7904_v8  ;;  %v7970_v43 = vld [vmem:[#allocation5_spill] sm:$0xff] }
 0x957   :  { %5431 = vmatprep.subr.bf16.mxu1 %v7917_v27  ;;  %5454 = vmatpush3.bf16.msra.mxu0 %v7955_v30  ;;  %v7961_v30 = vld [vmem:[#allocation6_spill] sm:$0xff] }
 0x958   :  { %5455 = vmatprep.subr.bf16.mxu0 %v7917_v27  ;;  %4444 = vmatprep.mubr.msk.f32.mxu0 %vm6243_vm0, %v7904_v8 }
 0x95a   :  { %5433 = vmatpush3.bf16.msra.mxu1 %v7956_v48  ;;  %v7962_v48 = vld [vmem:[#allocation27_spill] sm:$0xff] }
 0x95b   :  { %5434 = vmatprep.subr.bf16.mxu1 %v7917_v27  ;;  %5457 = vmatpush3.bf16.msra.mxu0 %v7957_v29  ;;  %v7963_v29 = vld [vmem:[#allocation7_spill] sm:$0xff] }
 0x95c   :  { %5458 = vmatprep.subr.bf16.mxu0 %v7917_v27 }
 0x95e   :  { %5436 = vmatpush3.bf16.msra.mxu1 %v7958_v1  ;;  %v7964_v1 = vld [vmem:[#allocation28_spill] sm:$0xff] }
 0x95f   :  { %5437 = vmatprep.subr.bf16.mxu1 %v7917_v27  ;;  %5460 = vmatpush3.bf16.msra.mxu0 %v7959_v5  ;;  %v7965_v5 = vld [vmem:[#allocation8_spill] sm:$0xff] }
 0x960   :  { %5461 = vmatprep.subr.bf16.mxu0 %v7917_v27 }
 0x962   :  { %5439 = vmatpush3.bf16.msra.mxu1 %v7960_v56  ;;  %v7966_v56 = vld [vmem:[#allocation29_spill] sm:$0xff] }
 0x963   :  { %5440 = vmatprep.subr.bf16.mxu1 %v7917_v27  ;;  %5463 = vmatpush3.bf16.msra.mxu0 %v7961_v30  ;;  %v7967_v30 = vld [vmem:[#allocation9_spill] sm:$0xff] }
 0x964   :  { %5464 = vmatprep.subr.bf16.mxu0 %v7917_v27 }
 0x966   :  { %5442 = vmatpush3.bf16.msra.mxu1 %v7962_v48  ;;  %v7968_v48 = vld [vmem:[#allocation30_spill] sm:$0xff] }
 0x967   :  { %5443 = vmatprep.subr.bf16.mxu1 %v7917_v27  ;;  %5466 = vmatpush3.bf16.msra.mxu0 %v7963_v29  ;;  %v7969_v29 = vld [vmem:[#allocation10_spill] sm:$0xff] }
 0x968   :  { %5467 = vmatprep.subr.bf16.mxu0 %v7917_v27 }
 0x96a   :  { %5445 = vmatpush3.bf16.msra.mxu1 %v7964_v1 }
 0x96b   :  { %5446 = vmatprep.subr.bf16.mxu1 %v7917_v27  ;;  %5469 = vmatpush3.bf16.msra.mxu0 %v7965_v5 }
 0x96c   :  { %5470 = vmatprep.subr.bf16.mxu0 %v7917_v27 }
 0x96e   :  { %5448 = vmatpush3.bf16.msra.mxu1 %v7966_v56 }
 0x96f   :  { %5449 = vmatprep.subr.bf16.mxu1 %v7917_v27  ;;  %5472 = vmatpush3.bf16.msra.mxu0 %v7967_v30 }
 0x970   :  { %5473 = vmatprep.subr.bf16.mxu0 %v7917_v27 }
 0x972   :  { %5451 = vmatpush3.bf16.msra.mxu1 %v7968_v48 }
 0x973   :  { %5475 = vmatpush3.bf16.msra.mxu0 %v7969_v29  ;;  %5477 = vmatprep.subr.bf16.mxu1 %v7970_v43 }
 0x974   :  { %5508 = vmatprep.subr.bf16.mxu0 %v7917_v27 }
 0xa08   :  { %v1352_v1 = vpop.f32.mrb[14].mxu0 }
 0xa09   :  { %v4341_v5 = vpop.f32.mrb[15].mxu0  ;;  %v1353_v18 = vadd.f32 %v1352_v1, %v6969_v36  ;;  %v7973_v1 = vld [vmem:[#allocation13_spill] sm:$0xff] }
 0xa28   :  { %v1422_v13 = vpop.f32.mrb[8].mxu1  ;;  %v1493_v6 = vpop.f32.mrb[16].mxu0 }
 0xa29   :  { %v6101_v56 = vadd.f32 %v7942_v47, %v1422_v13  ;;  %v1424_v9 = vpop.f32.mrb[9].mxu1  ;;  %v4376_v28 = vpop.f32.mrb[17].mxu0  ;;  %v1494_v14 = vadd.f32 %v1493_v6, %v6967_v2 }
 0xa2a   :  { %v6103_v30 = vadd.f32 %v6963_v16, %v1424_v9 }
 0xa2b   :  { %v3488_v15 = vmul.f32 -1.442695, %v6101_v56 }
 0xa2c   :  { %v3489_v63 = vmul.f32 -1.442695, %v6103_v30 }
 0xa2d   :  { %6160 = vpow2.f32 %v3488_v15 }
 0xa2e   :  { %6162 = vpow2.f32 %v3489_v63 }
 0xa37   :  { %v6161_v48 = vpop.eup %6160 }
 0xa38   :  { %v1501_v29 = vadd.f32 1.0, %v6161_v48  ;;  %v6163_v43 = vpop.eup %6162 }
 0xa39   :  { %v1508_v54 = vadd.f32 1.0, %v6163_v43 }
 0xa3a   :  { %6164 = vrcp.f32 %v1501_v29 }
 0xa3b   :  { %6166 = vrcp.f32 %v1508_v54 }
 0xa44   :  { %v6165_v5 = vpop.eup %6164 }
 0xa45   :  { %v1511_v22 = vmul.f32 %v6165_v5, %v1494_v14  ;;  %v6167_v56 = vpop.eup %6166  ;;  %v7974_v5 = vld [vmem:[#allocation14_spill] sm:$0xff] }
 0xa46   :  { %v1514_v28 = vsub.f32 1.0, %v6167_v56  ;;  %v1516_v63 = vmul.f32 %v6167_v56, %v7108_v57  ;;  %v7976_v56 = vld [vmem:[#allocation16_spill] sm:$0xff] }
 0xa47   :  { %v1512_v13 = vadd.f32 %v1511_v22, %v1353_v18 }
 0xa49   :  { %6168 = vtanh.f32 %v1512_v13  ;;  %v7975_v13 = vld [vmem:[#allocation15_spill] sm:$0xff] }
 0xa53   :  { %v6169_v9 = vpop.eup %6168 }
 0xa54   :  { %v1515_v15 = vmul.f32 %v6169_v9, %v1514_v28  ;;  %v7977_v28 = vld [vmem:[#allocation17_spill] sm:$0xff]  ;;  %v7978_v9 = vld [vmem:[#allocation18_spill] sm:$0xff] }
 0xa56   :  { %v7234_v30 = vadd.f32 %v1516_v63, %v1515_v15  ;;  %v7979_v15 = vld [vmem:[#allocation19_spill] sm:$0xff]  ;;  %v7980_v63 = vld [vmem:[#allocation20_spill] sm:$0xff] }
 0xa58   :  { %4410 = vmatmul.mubr.f32.vlgmr.msra.gmra.mrb[10].mxu1 %v7234_v30 }
 0xa59   :  { %5479 = vmatpush1.bf16.msra.mxu1 %v6356_v20  ;;  %1745 = vmatprep.mubr.f32.mxu1 %v7904_v8 }
 0xa5a   :  { %5481 = vmatprep.subr.bf16.mxu1 %v6365_v23 }
 0xa5d   :  { %5483 = vmatpush1.bf16.msra.mxu1 %v6374_v26 }
 0xa5e   :  { %5485 = vmatprep.subr.bf16.mxu1 %v6389_v31 }
 0xa61   :  { %5487 = vmatpush1.bf16.msra.mxu1 %v6408_v37 }
 0xa62   :  { %5489 = vmatprep.subr.bf16.mxu1 %v6417_v40 }
 0xa65   :  { %5491 = vmatpush1.bf16.msra.mxu1 %v6436_v46 }
 0xa66   :  { %5493 = vmatprep.subr.bf16.mxu1 %v6445_v49 }
 0xa69   :  { %5495 = vmatpush1.bf16.msra.mxu1 %v6464_v55 }
 0xa6a   :  { %5497 = vmatprep.subr.bf16.mxu1 %v6473_v58 }
 0xa6d   :  { %5499 = vmatpush1.bf16.msra.mxu1 %v6492_v0 }
 0xa6e   :  { %5501 = vmatprep.subr.bf16.mxu1 %v6498_v3 }
 0xa71   :  { %5503 = vmatpush1.bf16.msra.mxu1 %v6514_v11 }
 0xa72   :  { %5505 = vmatprep.subr.bf16.mxu1 %v6518_v12 }
 0xa75   :  { %5507 = vmatpush1.bf16.msra.mxu1 %v6528_v17 }
 0xa76   :  { %5533 = vmatprep.subr.bf16.mxu1 %v6624_v62 }
 0xb2b   :  { %v1584_v57 = vpop.f32.mrb[10].mxu1 }
 0xb2c   :  { %v7255_v22 = vadd.f32 %v6997_v21, %v1584_v57  ;;  %v4411_v18 = vpop.f32.mrb[11].mxu1  ;;  %v7981_v57 = vld [vmem:[#allocation21_spill] sm:$0xff] }
 0xb2d   :  { %v7982_v18 = vld [vmem:[#allocation22_spill] sm:$0xff] }
 0xb2e   :  { %7971 = vst [vmem:[#allocation33_spill] sm:$0xff] %v7255_v22  ;;  %3490 = vst [vmem:[%s7803_s9 + $0x10] sm:$0xff] %v7255_v22  ;;  %1590 = vmax.xlane.f32.xlu1 %v7255_v22 }
 0xbbb   :  { %v7262_v14 = vpop.xlane.xlu1 %1590 }
 0xbbc   :  { %7972 = vst [vmem:[#allocation34_spill] sm:$0xff] %v7262_v14  ;;  %vm1603_vm6 = vcmp.eq.f32.partialorder %v7255_v22, %v7262_v14  ;;  %v7988_v22 = vld [vmem:[#allocation4_spill] sm:$0xff]  ;;  %v7989_v14 = vld [vmem:[#allocation26_spill] sm:$0xff] }
 0xbbd   :  { %v1604_v54 = vsel %vm1603_vm6, %v7004_v38, 128.0 }
 0xbbe   :  { %1605 = vmin.xlane.f32.xlu1 %v1604_v54  ;;  %v7983_v54 = vld [vmem:[#allocation23_spill] sm:$0xff] }
 0xc4b   :  { %v1606_v6 = vpop.xlane.xlu1 %1605 }
 0xc4c   :  { %vm1607_vm7 = vcmp.eq.f32.partialorder %v7004_v38, %v1606_v6  ;;  %v7984_v6 = vld [vmem:[#allocation2_spill] sm:$0xff] }
 0xc4d   :  { %4445 = vmatmul.mubr.msk.f32.vlgmr.msra.gmra.mrb[18].mxu0 %vm1607_vm7, %v7916_v60 }
 0xc4e   :  { %5510 = vmatpush3.bf16.msra.mxu0 %v6541_v24  ;;  %4479 = vmatprep.mubr.msk.f32.mxu0 %vm6243_vm0, %v7904_v8 }
 0xc4f   :  { %5511 = vmatprep.subr.bf16.mxu0 %v7917_v27 }
 0xc52   :  { %5513 = vmatpush3.bf16.msra.mxu0 %v6552_v32 }
 0xc53   :  { %5514 = vmatprep.subr.bf16.mxu0 %v7917_v27 }
 0xc56   :  { %5516 = vmatpush3.bf16.msra.mxu0 %v6564_v35 }
 0xc57   :  { %5517 = vmatprep.subr.bf16.mxu0 %v7917_v27 }
 0xc5a   :  { %5519 = vmatpush3.bf16.msra.mxu0 %v6574_v41 }
 0xc5b   :  { %5520 = vmatprep.subr.bf16.mxu0 %v7917_v27 }
 0xc5e   :  { %5522 = vmatpush3.bf16.msra.mxu0 %v6584_v44 }
 0xc5f   :  { %5523 = vmatprep.subr.bf16.mxu0 %v7917_v27 }
 0xc62   :  { %5525 = vmatpush3.bf16.msra.mxu0 %v6594_v50 }
 0xc63   :  { %5526 = vmatprep.subr.bf16.mxu0 %v7917_v27 }
 0xc66   :  { %5528 = vmatpush3.bf16.msra.mxu0 %v6604_v53 }
 0xc67   :  { %5529 = vmatprep.subr.bf16.mxu0 %v7917_v27 }
 0xc6a   :  { %5531 = vmatpush3.bf16.msra.mxu0 %v6615_v59 }
 0xc6b   :  { %5564 = vmatprep.subr.bf16.mxu0 %v7917_v27 }
 0xd20   :  { %v1676_v43 = vpop.f32.mrb[18].mxu0 }
 0xd21   :  { %v1680_v48 = vmax.f32 %v1676_v43, 0.0  ;;  %v4446_v29 = vpop.f32.mrb[19].mxu0  ;;  %v7985_v43 = vld [vmem:[#allocation24_spill] sm:$0xff] }
 0xd22   :  { %v7987_v29 = vld [vmem:[#allocation25_spill] sm:$0xff] }
 0xd23   :  { %1746 = vmatmul.mubr.f32.vlgmr.msra.gmra.mrb[12].mxu1 %v1680_v48  ;;  %4480 = vmatmul.mubr.f32.vlgmr.msra.gmra.mrb[20].mxu0 %v1680_v48  ;;  %v7986_v48 = vld [vmem:[#allocation3_spill] sm:$0xff] }
 0xd24   :  { %5535 = vmatpush1.bf16.msra.mxu1 %v6646_v19  ;;  %5566 = vmatpush3.bf16.msra.mxu0 %v6651_v25 }
 0xd25   :  { %5537 = vmatprep.subr.bf16.mxu1 %v6653_v33  ;;  %5567 = vmatprep.subr.bf16.mxu0 %v7917_v27 }
 0xd26   :  { %1886 = vmatprep.mubr.f32.mxu1 %v7904_v8  ;;  %4514 = vmatprep.mubr.msk.f32.mxu0 %vm6243_vm0, %v7904_v8 }
 0xd28   :  { %5539 = vmatpush1.bf16.msra.mxu1 %v6671_v45  ;;  %5569 = vmatpush3.bf16.msra.mxu0 %v6677_v51 }
 0xd29   :  { %5541 = vmatprep.subr.bf16.mxu1 %v6680_v52  ;;  %5570 = vmatprep.subr.bf16.mxu0 %v7917_v27 }
 0xd2c   :  { %5543 = vmatpush1.bf16.msra.mxu1 %v6702_v4  ;;  %5572 = vmatpush3.bf16.msra.mxu0 %v6708_v7 }
 0xd2d   :  { %5545 = vmatprep.subr.bf16.mxu1 %v6711_v10  ;;  %5573 = vmatprep.subr.bf16.mxu0 %v7917_v27 }
 0xd30   :  { %5547 = vmatpush1.bf16.msra.mxu1 %v6730_v34  ;;  %5575 = vmatpush3.bf16.msra.mxu0 %v6736_v39 }
 0xd31   :  { %5549 = vmatprep.subr.bf16.mxu1 %v6739_v42  ;;  %5576 = vmatprep.subr.bf16.mxu0 %v7917_v27 }
 0xd34   :  { %5551 = vmatpush1.bf16.msra.mxu1 %v6758_v61  ;;  %5578 = vmatpush3.bf16.msra.mxu0 %v7973_v1 }
 0xd35   :  { %5553 = vmatprep.subr.bf16.mxu1 %v7974_v5  ;;  %5579 = vmatprep.subr.bf16.mxu0 %v7917_v27 }
 0xd38   :  { %5555 = vmatpush1.bf16.msra.mxu1 %v7975_v13  ;;  %5581 = vmatpush3.bf16.msra.mxu0 %v7976_v56 }
 0xd39   :  { %5557 = vmatprep.subr.bf16.mxu1 %v7977_v28  ;;  %5582 = vmatprep.subr.bf16.mxu0 %v7917_v27 }
 0xd3c   :  { %5559 = vmatpush1.bf16.msra.mxu1 %v7978_v9  ;;  %5584 = vmatpush3.bf16.msra.mxu0 %v7979_v15 }
 0xd3d   :  { %5561 = vmatprep.subr.bf16.mxu1 %v7980_v63  ;;  %5585 = vmatprep.subr.bf16.mxu0 %v7917_v27 }
 0xd40   :  { %5563 = vmatpush1.bf16.msra.mxu1 %v7981_v57  ;;  %5587 = vmatpush3.bf16.msra.mxu0 %v7982_v18 }
 0xd41   :  { %5588 = vmatprep.subr.bf16.mxu1 %v7917_v27  ;;  %5612 = vmatprep.subr.bf16.mxu0 %v7917_v27 }
 0xd43   :  { %1887 = vmatmul.mubr.f32.vlgmr.msra.gmra.mrb[12].mxu1 %v7234_v30  ;;  %4515 = vmatmul.mubr.f32.vlgmr.msra.gmra.mrb[22].mxu0 %v7234_v30 }
 0xd44   :  { %5590 = vmatpush3.bf16.msra.mxu1 %v7983_v54  ;;  %4549 = vmatprep.mubr.msk.f32.mxu1 %vm6243_vm0, %v7904_v8  ;;  %v7999_v54 = vld [vmem:[#allocation5_spill] sm:$0xff] }
 0xd45   :  { %5591 = vmatprep.subr.bf16.mxu1 %v7917_v27  ;;  %5614 = vmatpush3.bf16.msra.mxu0 %v7984_v6  ;;  %v7990_v6 = vld [vmem:[#allocation6_spill] sm:$0xff] }
 0xd46   :  { %5615 = vmatprep.subr.bf16.mxu0 %v7917_v27  ;;  %4584 = vmatprep.mubr.msk.f32.mxu0 %vm6243_vm0, %v7904_v8 }
 0xd48   :  { %5593 = vmatpush3.bf16.msra.mxu1 %v7985_v43  ;;  %v7991_v43 = vld [vmem:[#allocation27_spill] sm:$0xff] }
 0xd49   :  { %5594 = vmatprep.subr.bf16.mxu1 %v7917_v27  ;;  %5617 = vmatpush3.bf16.msra.mxu0 %v7986_v48  ;;  %v7992_v48 = vld [vmem:[#allocation7_spill] sm:$0xff] }
 0xd4a   :  { %5618 = vmatprep.subr.bf16.mxu0 %v7917_v27 }
 0xd4c   :  { %5596 = vmatpush3.bf16.msra.mxu1 %v7987_v29  ;;  %v7993_v29 = vld [vmem:[#allocation28_spill] sm:$0xff] }
 0xd4d   :  { %5597 = vmatprep.subr.bf16.mxu1 %v7917_v27  ;;  %5620 = vmatpush3.bf16.msra.mxu0 %v7988_v22  ;;  %v7994_v22 = vld [vmem:[#allocation8_spill] sm:$0xff] }
 0xd4e   :  { %5621 = vmatprep.subr.bf16.mxu0 %v7917_v27 }
 0xd50   :  { %5599 = vmatpush3.bf16.msra.mxu1 %v7989_v14  ;;  %v7995_v14 = vld [vmem:[#allocation29_spill] sm:$0xff] }
 0xd51   :  { %5600 = vmatprep.subr.bf16.mxu1 %v7917_v27  ;;  %5623 = vmatpush3.bf16.msra.mxu0 %v7990_v6  ;;  %v7996_v6 = vld [vmem:[#allocation9_spill] sm:$0xff] }
 0xd52   :  { %5624 = vmatprep.subr.bf16.mxu0 %v7917_v27 }
 0xd54   :  { %5602 = vmatpush3.bf16.msra.mxu1 %v7991_v43  ;;  %v7997_v43 = vld [vmem:[#allocation30_spill] sm:$0xff] }
 0xd55   :  { %5603 = vmatprep.subr.bf16.mxu1 %v7917_v27  ;;  %5626 = vmatpush3.bf16.msra.mxu0 %v7992_v48  ;;  %v7998_v48 = vld [vmem:[#allocation10_spill] sm:$0xff] }
 0xd56   :  { %5627 = vmatprep.subr.bf16.mxu0 %v7917_v27 }
 0xd58   :  { %5605 = vmatpush3.bf16.msra.mxu1 %v7993_v29 }
 0xd59   :  { %5606 = vmatprep.subr.bf16.mxu1 %v7917_v27  ;;  %5629 = vmatpush3.bf16.msra.mxu0 %v7994_v22 }
 0xd5a   :  { %5630 = vmatprep.subr.bf16.mxu0 %v7917_v27 }
 0xd5c   :  { %5608 = vmatpush3.bf16.msra.mxu1 %v7995_v14 }
 0xd5d   :  { %5609 = vmatprep.subr.bf16.mxu1 %v7917_v27  ;;  %5632 = vmatpush3.bf16.msra.mxu0 %v7996_v6 }
 0xd5e   :  { %5633 = vmatprep.subr.bf16.mxu0 %v7917_v27 }
 0xd60   :  { %5611 = vmatpush3.bf16.msra.mxu1 %v7997_v43 }
 0xd61   :  { %5635 = vmatpush3.bf16.msra.mxu0 %v7998_v48  ;;  %5637 = vmatprep.subr.bf16.mxu1 %v7999_v54 }
 0xd62   :  { %5668 = vmatprep.subr.bf16.mxu0 %v7917_v27 }
 0xdf6   :  { %v1818_v29 = vpop.f32.mrb[20].mxu0 }
 0xdf7   :  { %v4481_v22 = vpop.f32.mrb[21].mxu0  ;;  %v1819_v5 = vadd.f32 %v1818_v29, %v6969_v36  ;;  %v8003_v29 = vld [vmem:[#allocation14_spill] sm:$0xff] }
 0xe16   :  { %v1888_v18 = vpop.f32.mrb[12].mxu1  ;;  %v1959_v57 = vpop.f32.mrb[22].mxu0 }
 0xe17   :  { %v6105_v14 = vadd.f32 %v7942_v47, %v1888_v18  ;;  %v1890_v63 = vpop.f32.mrb[13].mxu1  ;;  %v4516_v15 = vpop.f32.mrb[23].mxu0  ;;  %v1960_v13 = vadd.f32 %v1959_v57, %v6967_v2 }
 0xe18   :  { %v6107_v6 = vadd.f32 %v6963_v16, %v1890_v63 }
 0xe19   :  { %v3494_v9 = vmul.f32 -1.442695, %v6105_v14 }
 0xe1a   :  { %v3495_v28 = vmul.f32 -1.442695, %v6107_v6 }
 0xe1b   :  { %6170 = vpow2.f32 %v3494_v9 }
 0xe1c   :  { %6172 = vpow2.f32 %v3495_v28 }
 0xe25   :  { %v6171_v43 = vpop.eup %6170 }
 0xe26   :  { %v1967_v48 = vadd.f32 1.0, %v6171_v43  ;;  %v6173_v54 = vpop.eup %6172 }
 0xe27   :  { %v1974_v56 = vadd.f32 1.0, %v6173_v54 }
 0xe28   :  { %6174 = vrcp.f32 %v1967_v48  ;;  %v8002_v48 = vld [vmem:[#allocation13_spill] sm:$0xff] }
 0xe29   :  { %6176 = vrcp.f32 %v1974_v56 }
 0xe32   :  { %v6175_v22 = vpop.eup %6174 }
 0xe33   :  { %v1977_v1 = vmul.f32 %v6175_v22, %v1960_v13  ;;  %v6177_v14 = vpop.eup %6176  ;;  %v8004_v22 = vld [vmem:[#allocation15_spill] sm:$0xff] }
 0xe34   :  { %v1980_v15 = vsub.f32 1.0, %v6177_v14  ;;  %v1982_v28 = vmul.f32 %v6177_v14, %v7234_v30  ;;  %v8006_v14 = vld [vmem:[#allocation17_spill] sm:$0xff] }
 0xe35   :  { %v1978_v18 = vadd.f32 %v1977_v1, %v1819_v5 }
 0xe37   :  { %6178 = vtanh.f32 %v1978_v18  ;;  %v8005_v18 = vld [vmem:[#allocation16_spill] sm:$0xff] }
 0xe41   :  { %v6179_v63 = vpop.eup %6178 }
 0xe42   :  { %v1981_v9 = vmul.f32 %v6179_v63, %v1980_v15  ;;  %v8007_v15 = vld [vmem:[#allocation18_spill] sm:$0xff]  ;;  %v8008_v63 = vld [vmem:[#allocation19_spill] sm:$0xff] }
 0xe44   :  { %v7365_v6 = vadd.f32 %v1982_v28, %v1981_v9  ;;  %v8009_v9 = vld [vmem:[#allocation20_spill] sm:$0xff]  ;;  %v8010_v28 = vld [vmem:[#allocation21_spill] sm:$0xff] }
 0xe46   :  { %4550 = vmatmul.mubr.f32.vlgmr.msra.gmra.mrb[14].mxu1 %v7365_v6 }
 0xe47   :  { %5639 = vmatpush1.bf16.msra.mxu1 %v6356_v20  ;;  %2211 = vmatprep.mubr.f32.mxu1 %v7904_v8 }
 0xe48   :  { %5641 = vmatprep.subr.bf16.mxu1 %v6365_v23 }
 0xe4b   :  { %5643 = vmatpush1.bf16.msra.mxu1 %v6374_v26 }
 0xe4c   :  { %5645 = vmatprep.subr.bf16.mxu1 %v6389_v31 }
 0xe4f   :  { %5647 = vmatpush1.bf16.msra.mxu1 %v6408_v37 }
 0xe50   :  { %5649 = vmatprep.subr.bf16.mxu1 %v6417_v40 }
 0xe53   :  { %5651 = vmatpush1.bf16.msra.mxu1 %v6436_v46 }
 0xe54   :  { %5653 = vmatprep.subr.bf16.mxu1 %v6445_v49 }
 0xe57   :  { %5655 = vmatpush1.bf16.msra.mxu1 %v6464_v55 }
 0xe58   :  { %5657 = vmatprep.subr.bf16.mxu1 %v6473_v58 }
 0xe5b   :  { %5659 = vmatpush1.bf16.msra.mxu1 %v6492_v0 }
 0xe5c   :  { %5661 = vmatprep.subr.bf16.mxu1 %v6498_v3 }
 0xe5f   :  { %5663 = vmatpush1.bf16.msra.mxu1 %v6514_v11 }
 0xe60   :  { %5665 = vmatprep.subr.bf16.mxu1 %v6518_v12 }
 0xe63   :  { %5667 = vmatpush1.bf16.msra.mxu1 %v6528_v17 }
 0xe64   :  { %5693 = vmatprep.subr.bf16.mxu1 %v6624_v62 }
 0xf19   :  { %v2050_v30 = vpop.f32.mrb[14].mxu1 }
 0xf1a   :  { %v7386_v1 = vadd.f32 %v6997_v21, %v2050_v30  ;;  %v4551_v5 = vpop.f32.mrb[15].mxu1  ;;  %v8011_v30 = vld [vmem:[#allocation22_spill] sm:$0xff] }
 0xf1b   :  { %v8012_v5 = vld [vmem:[#allocation23_spill] sm:$0xff] }
 0xf1c   :  { %8000 = vst [vmem:[#allocation35_spill] sm:$0xff] %v7386_v1  ;;  %3496 = vst [vmem:[%s7803_s9 + $0x18] sm:$0xff] %v7386_v1  ;;  %2056 = vmax.xlane.f32.xlu1 %v7386_v1 }
 0xfa9   :  { %v7393_v13 = vpop.xlane.xlu1 %2056 }
 0xfaa   :  { %8001 = vst [vmem:[#allocation36_spill] sm:$0xff] %v7393_v13  ;;  %vm2069_vm8 = vcmp.eq.f32.partialorder %v7386_v1, %v7393_v13  ;;  %v8018_v1 = vld [vmem:[#allocation26_spill] sm:$0xff] }
 0xfab   :  { %v2070_v56 = vsel %vm2069_vm8, %v7004_v38, 128.0  ;;  %v8019_v13 = vld [vmem:[#allocation6_spill] sm:$0xff] }
 0xfac   :  { %2071 = vmin.xlane.f32.xlu1 %v2070_v56  ;;  %v8013_v56 = vld [vmem:[#allocation2_spill] sm:$0xff] }
0x1039   :  { %v2072_v57 = vpop.xlane.xlu1 %2071 }
0x103a   :  { %vm2073_vm9 = vcmp.eq.f32.partialorder %v7004_v38, %v2072_v57  ;;  %v8014_v57 = vld [vmem:[#allocation24_spill] sm:$0xff] }
0x103b   :  { %4585 = vmatmul.mubr.msk.f32.vlgmr.msra.gmra.mrb[24].mxu0 %vm2073_vm9, %v7916_v60 }
0x103c   :  { %5670 = vmatpush3.bf16.msra.mxu0 %v6541_v24  ;;  %4619 = vmatprep.mubr.msk.f32.mxu0 %vm6243_vm0, %v7904_v8 }
0x103d   :  { %5671 = vmatprep.subr.bf16.mxu0 %v7917_v27 }
0x1040   :  { %5673 = vmatpush3.bf16.msra.mxu0 %v6552_v32 }
0x1041   :  { %5674 = vmatprep.subr.bf16.mxu0 %v7917_v27 }
0x1044   :  { %5676 = vmatpush3.bf16.msra.mxu0 %v6564_v35 }
0x1045   :  { %5677 = vmatprep.subr.bf16.mxu0 %v7917_v27 }
0x1048   :  { %5679 = vmatpush3.bf16.msra.mxu0 %v6574_v41 }
0x1049   :  { %5680 = vmatprep.subr.bf16.mxu0 %v7917_v27 }
0x104c   :  { %5682 = vmatpush3.bf16.msra.mxu0 %v6584_v44 }
0x104d   :  { %5683 = vmatprep.subr.bf16.mxu0 %v7917_v27 }
0x1050   :  { %5685 = vmatpush3.bf16.msra.mxu0 %v6594_v50 }
0x1051   :  { %5686 = vmatprep.subr.bf16.mxu0 %v7917_v27 }
0x1054   :  { %5688 = vmatpush3.bf16.msra.mxu0 %v6604_v53 }
0x1055   :  { %5689 = vmatprep.subr.bf16.mxu0 %v7917_v27 }
0x1058   :  { %5691 = vmatpush3.bf16.msra.mxu0 %v6615_v59 }
0x1059   :  { %5724 = vmatprep.subr.bf16.mxu0 %v7917_v27 }
0x110e   :  { %v2142_v21 = vpop.f32.mrb[24].mxu0 }
0x110f   :  { %v2146_v54 = vmax.f32 %v2142_v21, 0.0  ;;  %v4586_v43 = vpop.f32.mrb[25].mxu0  ;;  %v8015_v21 = vld [vmem:[#allocation3_spill] sm:$0xff] }
0x1110   :  { %v8017_v43 = vld [vmem:[#allocation4_spill] sm:$0xff] }
0x1111   :  { %2212 = vmatmul.mubr.f32.vlgmr.msra.gmra.mrb[16].mxu1 %v2146_v54  ;;  %4620 = vmatmul.mubr.f32.vlgmr.msra.gmra.mrb[26].mxu0 %v2146_v54  ;;  %v8016_v54 = vld [vmem:[#allocation25_spill] sm:$0xff] }
0x1112   :  { %5695 = vmatpush1.bf16.msra.mxu1 %v6646_v19  ;;  %5726 = vmatpush3.bf16.msra.mxu0 %v6651_v25 }
0x1113   :  { %5697 = vmatprep.subr.bf16.mxu1 %v6653_v33  ;;  %5727 = vmatprep.subr.bf16.mxu0 %v7917_v27 }
0x1114   :  { %2352 = vmatprep.mubr.f32.mxu1 %v7904_v8  ;;  %4654 = vmatprep.mubr.msk.f32.mxu0 %vm6243_vm0, %v7904_v8 }
0x1116   :  { %5699 = vmatpush1.bf16.msra.mxu1 %v6671_v45  ;;  %5729 = vmatpush3.bf16.msra.mxu0 %v6677_v51 }
0x1117   :  { %5701 = vmatprep.subr.bf16.mxu1 %v6680_v52  ;;  %5730 = vmatprep.subr.bf16.mxu0 %v7917_v27 }
0x111a   :  { %5703 = vmatpush1.bf16.msra.mxu1 %v6702_v4  ;;  %5732 = vmatpush3.bf16.msra.mxu0 %v6708_v7 }
0x111b   :  { %5705 = vmatprep.subr.bf16.mxu1 %v6711_v10  ;;  %5733 = vmatprep.subr.bf16.mxu0 %v7917_v27 }
0x111e   :  { %5707 = vmatpush1.bf16.msra.mxu1 %v6730_v34  ;;  %5735 = vmatpush3.bf16.msra.mxu0 %v6736_v39 }
0x111f   :  { %5709 = vmatprep.subr.bf16.mxu1 %v6739_v42  ;;  %5736 = vmatprep.subr.bf16.mxu0 %v7917_v27 }
0x1122   :  { %5711 = vmatpush1.bf16.msra.mxu1 %v6758_v61  ;;  %5738 = vmatpush3.bf16.msra.mxu0 %v8002_v48 }
0x1123   :  { %5713 = vmatprep.subr.bf16.mxu1 %v8003_v29  ;;  %5739 = vmatprep.subr.bf16.mxu0 %v7917_v27 }
0x1126   :  { %5715 = vmatpush1.bf16.msra.mxu1 %v8004_v22  ;;  %5741 = vmatpush3.bf16.msra.mxu0 %v8005_v18 }
0x1127   :  { %5717 = vmatprep.subr.bf16.mxu1 %v8006_v14  ;;  %5742 = vmatprep.subr.bf16.mxu0 %v7917_v27 }
0x112a   :  { %5719 = vmatpush1.bf16.msra.mxu1 %v8007_v15  ;;  %5744 = vmatpush3.bf16.msra.mxu0 %v8008_v63 }
0x112b   :  { %5721 = vmatprep.subr.bf16.mxu1 %v8009_v9  ;;  %5745 = vmatprep.subr.bf16.mxu0 %v7917_v27 }
0x112e   :  { %5723 = vmatpush1.bf16.msra.mxu1 %v8010_v28  ;;  %5747 = vmatpush3.bf16.msra.mxu0 %v8011_v30 }
0x112f   :  { %5748 = vmatprep.subr.bf16.mxu1 %v7917_v27  ;;  %5772 = vmatprep.subr.bf16.mxu0 %v7917_v27 }
0x1131   :  { %2353 = vmatmul.mubr.f32.vlgmr.msra.gmra.mrb[16].mxu1 %v7365_v6  ;;  %4655 = vmatmul.mubr.f32.vlgmr.msra.gmra.mrb[28].mxu0 %v7365_v6 }
0x1132   :  { %5750 = vmatpush3.bf16.msra.mxu1 %v8012_v5  ;;  %4689 = vmatprep.mubr.msk.f32.mxu1 %vm6243_vm0, %v7904_v8 }
0x1133   :  { %5751 = vmatprep.subr.bf16.mxu1 %v7917_v27  ;;  %5774 = vmatpush3.bf16.msra.mxu0 %v8013_v56  ;;  %v8028_v56 = vld [vmem:[#allocation5_spill] sm:$0xff] }
0x1134   :  { %5775 = vmatprep.subr.bf16.mxu0 %v7917_v27  ;;  %4724 = vmatprep.mubr.msk.f32.mxu0 %vm6243_vm0, %v7904_v8 }
0x1136   :  { %5753 = vmatpush3.bf16.msra.mxu1 %v8014_v57  ;;  %v8020_v57 = vld [vmem:[#allocation27_spill] sm:$0xff] }
0x1137   :  { %5754 = vmatprep.subr.bf16.mxu1 %v7917_v27  ;;  %5777 = vmatpush3.bf16.msra.mxu0 %v8015_v21  ;;  %v8021_v21 = vld [vmem:[#allocation7_spill] sm:$0xff] }
0x1138   :  { %5778 = vmatprep.subr.bf16.mxu0 %v7917_v27 }
0x113a   :  { %5756 = vmatpush3.bf16.msra.mxu1 %v8016_v54  ;;  %v8022_v54 = vld [vmem:[#allocation28_spill] sm:$0xff] }
0x113b   :  { %5757 = vmatprep.subr.bf16.mxu1 %v7917_v27  ;;  %5780 = vmatpush3.bf16.msra.mxu0 %v8017_v43  ;;  %v8023_v43 = vld [vmem:[#allocation8_spill] sm:$0xff] }
0x113c   :  { %5781 = vmatprep.subr.bf16.mxu0 %v7917_v27 }
0x113e   :  { %5759 = vmatpush3.bf16.msra.mxu1 %v8018_v1  ;;  %v8024_v1 = vld [vmem:[#allocation29_spill] sm:$0xff] }
0x113f   :  { %5760 = vmatprep.subr.bf16.mxu1 %v7917_v27  ;;  %5783 = vmatpush3.bf16.msra.mxu0 %v8019_v13  ;;  %v8025_v13 = vld [vmem:[#allocation9_spill] sm:$0xff] }
0x1140   :  { %5784 = vmatprep.subr.bf16.mxu0 %v7917_v27 }
0x1142   :  { %5762 = vmatpush3.bf16.msra.mxu1 %v8020_v57  ;;  %v8026_v57 = vld [vmem:[#allocation30_spill] sm:$0xff] }
0x1143   :  { %5763 = vmatprep.subr.bf16.mxu1 %v7917_v27  ;;  %5786 = vmatpush3.bf16.msra.mxu0 %v8021_v21  ;;  %v8027_v21 = vld [vmem:[#allocation10_spill] sm:$0xff] }
0x1144   :  { %5787 = vmatprep.subr.bf16.mxu0 %v7917_v27 }
0x1146   :  { %5765 = vmatpush3.bf16.msra.mxu1 %v8022_v54 }
0x1147   :  { %5766 = vmatprep.subr.bf16.mxu1 %v7917_v27  ;;  %5789 = vmatpush3.bf16.msra.mxu0 %v8023_v43 }
0x1148   :  { %5790 = vmatprep.subr.bf16.mxu0 %v7917_v27 }
0x114a   :  { %5768 = vmatpush3.bf16.msra.mxu1 %v8024_v1 }
0x114b   :  { %5769 = vmatprep.subr.bf16.mxu1 %v7917_v27  ;;  %5792 = vmatpush3.bf16.msra.mxu0 %v8025_v13 }
0x114c   :  { %5793 = vmatprep.subr.bf16.mxu0 %v7917_v27 }
0x114e   :  { %5771 = vmatpush3.bf16.msra.mxu1 %v8026_v57 }
0x114f   :  { %5795 = vmatpush3.bf16.msra.mxu0 %v8027_v21  ;;  %5797 = vmatprep.subr.bf16.mxu1 %v8028_v56 }
0x1150   :  { %5828 = vmatprep.subr.bf16.mxu0 %v7917_v27 }
0x11e4   :  { %v2284_v54 = vpop.f32.mrb[26].mxu0 }
0x11e5   :  { %v4621_v43 = vpop.f32.mrb[27].mxu0  ;;  %v2285_v22 = vadd.f32 %v2284_v54, %v6969_v36 }
0x1204   :  { %v2354_v5 = vpop.f32.mrb[16].mxu1  ;;  %v2425_v30 = vpop.f32.mrb[28].mxu0 }
0x1205   :  { %v6109_v1 = vadd.f32 %v7942_v47, %v2354_v5  ;;  %v2356_v28 = vpop.f32.mrb[17].mxu1  ;;  %v4656_v9 = vpop.f32.mrb[29].mxu0  ;;  %v2426_v18 = vadd.f32 %v2425_v30, %v6967_v2 }
0x1206   :  { %v6111_v13 = vadd.f32 %v6963_v16, %v2356_v28 }
0x1207   :  { %v3500_v63 = vmul.f32 -1.442695, %v6109_v1 }
0x1208   :  { %v3501_v15 = vmul.f32 -1.442695, %v6111_v13 }
0x1209   :  { %6180 = vpow2.f32 %v3500_v63 }
0x120a   :  { %6182 = vpow2.f32 %v3501_v15 }
0x1213   :  { %v6181_v57 = vpop.eup %6180 }
0x1214   :  { %v2433_v21 = vadd.f32 1.0, %v6181_v57  ;;  %v6183_v56 = vpop.eup %6182 }
0x1215   :  { %v2440_v14 = vadd.f32 1.0, %v6183_v56 }
0x1216   :  { %6184 = vrcp.f32 %v2433_v21 }
0x1217   :  { %6186 = vrcp.f32 %v2440_v14 }
0x1220   :  { %v6185_v43 = vpop.eup %6184 }
0x1221   :  { %v2443_v29 = vmul.f32 %v6185_v43, %v2426_v18  ;;  %v6187_v1 = vpop.eup %6186  ;;  %v8029_v43 = vld [vmem:[#allocation14_spill] sm:$0xff] }
0x1222   :  { %v2446_v9 = vsub.f32 1.0, %v6187_v1  ;;  %v2448_v13 = vmul.f32 %v6187_v1, %v7365_v6  ;;  %v8031_v1 = vld [vmem:[#allocation16_spill] sm:$0xff] }
0x1223   :  { %v2444_v5 = vadd.f32 %v2443_v29, %v2285_v22  ;;  %v7519_v29 = vld [vmem:[%s7802_s8] ss:$0 sm:$0xff] }
0x1225   :  { %6188 = vtanh.f32 %v2444_v5  ;;  %v8030_v5 = vld [vmem:[#allocation15_spill] sm:$0xff] }
0x122f   :  { %v6189_v28 = vpop.eup %6188 }
0x1230   :  { %v2447_v63 = vmul.f32 %v6189_v28, %v2446_v9  ;;  %v8032_v9 = vld [vmem:[#allocation17_spill] sm:$0xff]  ;;  %v8033_v28 = vld [vmem:[#allocation18_spill] sm:$0xff] }
0x1232   :  { %v7496_v15 = vadd.f32 %v2448_v13, %v2447_v63  ;;  %v8034_v63 = vld [vmem:[#allocation19_spill] sm:$0xff]  ;;  %v8035_v13 = vld [vmem:[#allocation20_spill] sm:$0xff] }
0x1234   :  { %4690 = vmatmul.mubr.f32.vlgmr.msra.gmra.mrb[18].mxu1 %v7496_v15 }
0x1235   :  { %5799 = vmatpush1.bf16.msra.mxu1 %v6356_v20  ;;  %2677 = vmatprep.mubr.f32.mxu1 %v7904_v8 }
0x1236   :  { %5801 = vmatprep.subr.bf16.mxu1 %v6365_v23 }
0x1239   :  { %5803 = vmatpush1.bf16.msra.mxu1 %v6374_v26 }
0x123a   :  { %5805 = vmatprep.subr.bf16.mxu1 %v6389_v31 }
0x123d   :  { %5807 = vmatpush1.bf16.msra.mxu1 %v6408_v37 }
0x123e   :  { %5809 = vmatprep.subr.bf16.mxu1 %v6417_v40 }
0x1241   :  { %5811 = vmatpush1.bf16.msra.mxu1 %v6436_v46 }
0x1242   :  { %5813 = vmatprep.subr.bf16.mxu1 %v6445_v49 }
0x1245   :  { %5815 = vmatpush1.bf16.msra.mxu1 %v6464_v55 }
0x1246   :  { %5817 = vmatprep.subr.bf16.mxu1 %v6473_v58 }
0x1249   :  { %5819 = vmatpush1.bf16.msra.mxu1 %v6492_v0 }
0x124a   :  { %5821 = vmatprep.subr.bf16.mxu1 %v6498_v3 }
0x124d   :  { %5823 = vmatpush1.bf16.msra.mxu1 %v6514_v11 }
0x124e   :  { %5825 = vmatprep.subr.bf16.mxu1 %v6518_v12 }
0x1251   :  { %5827 = vmatpush1.bf16.msra.mxu1 %v6528_v17 }
0x1252   :  { %5853 = vmatprep.subr.bf16.mxu1 %v6624_v62 }
0x1307   :  { %v2516_v6 = vpop.f32.mrb[18].mxu1 }
0x1308   :  { %v7522_v22 = vadd.f32 %v7519_v29, %v2516_v6  ;;  %v4691_v18 = vpop.f32.mrb[19].mxu1  ;;  %v8036_v6 = vld [vmem:[#allocation21_spill] sm:$0xff] }
0x1309   :  { %v8037_v18 = vld [vmem:[#allocation22_spill] sm:$0xff] }
0x130a   :  { %3502 = vst [vmem:[%s7803_s9 + $0x20] sm:$0xff] %v7522_v22  ;;  %2522 = vmax.xlane.f32.xlu1 %v7522_v22 }
0x1397   :  { %v7529_v14 = vpop.xlane.xlu1 %2522 }
0x1398   :  { %vm2535_vm10 = vcmp.eq.f32.partialorder %v7522_v22, %v7529_v14 }
0x1399   :  { %v2536_v30 = vsel %vm2535_vm10, %v7004_v38, 128.0 }
0x139a   :  { %2537 = vmin.xlane.f32.xlu1 %v2536_v30  ;;  %v8038_v30 = vld [vmem:[#allocation23_spill] sm:$0xff] }
0x1427   :  { %v2538_v56 = vpop.xlane.xlu1 %2537 }
0x1428   :  { %vm2539_vm11 = vcmp.eq.f32.partialorder %v7004_v38, %v2538_v56  ;;  %v8039_v56 = vld [vmem:[#allocation2_spill] sm:$0xff] }
0x1429   :  { %4725 = vmatmul.mubr.msk.f32.vlgmr.msra.gmra.mrb[30].mxu0 %vm2539_vm11, %v7916_v60 }
0x142a   :  { %5830 = vmatpush3.bf16.msra.mxu0 %v6541_v24  ;;  %4759 = vmatprep.mubr.msk.f32.mxu0 %vm6243_vm0, %v7904_v8 }
0x142b   :  { %5831 = vmatprep.subr.bf16.mxu0 %v7917_v27 }
0x142e   :  { %5833 = vmatpush3.bf16.msra.mxu0 %v6552_v32 }
0x142f   :  { %5834 = vmatprep.subr.bf16.mxu0 %v7917_v27 }
0x1432   :  { %5836 = vmatpush3.bf16.msra.mxu0 %v6564_v35 }
0x1433   :  { %5837 = vmatprep.subr.bf16.mxu0 %v7917_v27 }
0x1436   :  { %5839 = vmatpush3.bf16.msra.mxu0 %v6574_v41 }
0x1437   :  { %5840 = vmatprep.subr.bf16.mxu0 %v7917_v27 }
0x143a   :  { %5842 = vmatpush3.bf16.msra.mxu0 %v6584_v44 }
0x143b   :  { %5843 = vmatprep.subr.bf16.mxu0 %v7917_v27 }
0x143e   :  { %5845 = vmatpush3.bf16.msra.mxu0 %v6594_v50 }
0x143f   :  { %5846 = vmatprep.subr.bf16.mxu0 %v7917_v27 }
0x1442   :  { %5848 = vmatpush3.bf16.msra.mxu0 %v6604_v53 }
0x1443   :  { %5849 = vmatprep.subr.bf16.mxu0 %v7917_v27 }
0x1446   :  { %5851 = vmatpush3.bf16.msra.mxu0 %v6615_v59 }
0x1447   :  { %5884 = vmatprep.subr.bf16.mxu0 %v7917_v27 }
0x14fc   :  { %v2608_v57 = vpop.f32.mrb[30].mxu0 }
0x14fd   :  { %v2612_v21 = vmax.f32 %v2608_v57, 0.0  ;;  %v4726_v54 = vpop.f32.mrb[31].mxu0  ;;  %v8040_v57 = vld [vmem:[#allocation24_spill] sm:$0xff] }
0x14fe   :  { %v8042_v54 = vld [vmem:[#allocation25_spill] sm:$0xff] }
0x14ff   :  { %2678 = vmatmul.mubr.f32.vlgmr.msra.gmra.mrb[20].mxu1 %v2612_v21  ;;  %4760 = vmatmul.mubr.f32.vlgmr.msra.gmra.mrb[32].mxu0 %v2612_v21  ;;  %v8041_v21 = vld [vmem:[#allocation3_spill] sm:$0xff] }
0x1500   :  { %5855 = vmatpush1.bf16.msra.mxu1 %v6646_v19  ;;  %5886 = vmatpush3.bf16.msra.mxu0 %v6651_v25 }
0x1501   :  { %5857 = vmatprep.subr.bf16.mxu1 %v6653_v33  ;;  %5887 = vmatprep.subr.bf16.mxu0 %v7917_v27 }
0x1502   :  { %2818 = vmatprep.mubr.f32.mxu1 %v7904_v8  ;;  %4794 = vmatprep.mubr.msk.f32.mxu0 %vm6243_vm0, %v7904_v8 }
0x1504   :  { %5859 = vmatpush1.bf16.msra.mxu1 %v6671_v45  ;;  %5889 = vmatpush3.bf16.msra.mxu0 %v6677_v51 }
0x1505   :  { %5861 = vmatprep.subr.bf16.mxu1 %v6680_v52  ;;  %5890 = vmatprep.subr.bf16.mxu0 %v7917_v27 }
0x1508   :  { %5863 = vmatpush1.bf16.msra.mxu1 %v6702_v4  ;;  %5892 = vmatpush3.bf16.msra.mxu0 %v6708_v7 }
0x1509   :  { %5865 = vmatprep.subr.bf16.mxu1 %v6711_v10  ;;  %5893 = vmatprep.subr.bf16.mxu0 %v7917_v27 }
0x150c   :  { %5867 = vmatpush1.bf16.msra.mxu1 %v6730_v34  ;;  %5895 = vmatpush3.bf16.msra.mxu0 %v6736_v39 }
0x150d   :  { %5869 = vmatprep.subr.bf16.mxu1 %v6739_v42  ;;  %5896 = vmatprep.subr.bf16.mxu0 %v7917_v27 }
0x1510   :  { %5871 = vmatpush1.bf16.msra.mxu1 %v6758_v61  ;;  %5898 = vmatpush3.bf16.msra.mxu0 %v8002_v48 }
0x1511   :  { %5873 = vmatprep.subr.bf16.mxu1 %v8029_v43  ;;  %5899 = vmatprep.subr.bf16.mxu0 %v7917_v27 }
0x1514   :  { %5875 = vmatpush1.bf16.msra.mxu1 %v8030_v5  ;;  %5901 = vmatpush3.bf16.msra.mxu0 %v8031_v1 }
0x1515   :  { %5877 = vmatprep.subr.bf16.mxu1 %v8032_v9  ;;  %5902 = vmatprep.subr.bf16.mxu0 %v7917_v27 }
0x1518   :  { %5879 = vmatpush1.bf16.msra.mxu1 %v8033_v28  ;;  %5904 = vmatpush3.bf16.msra.mxu0 %v8034_v63 }
0x1519   :  { %5881 = vmatprep.subr.bf16.mxu1 %v8035_v13  ;;  %5905 = vmatprep.subr.bf16.mxu0 %v7917_v27 }
0x151c   :  { %5883 = vmatpush1.bf16.msra.mxu1 %v8036_v6  ;;  %5907 = vmatpush3.bf16.msra.mxu0 %v8037_v18  ;;  %v8045_v18 = vld [vmem:[#allocation6_spill] sm:$0xff]  ;;  %v8054_v6 = vld [vmem:[#allocation5_spill] sm:$0xff] }
0x151d   :  { %5908 = vmatprep.subr.bf16.mxu1 %v7917_v27  ;;  %5932 = vmatprep.subr.bf16.mxu0 %v7917_v27 }
0x151f   :  { %2819 = vmatmul.mubr.f32.vlgmr.msra.gmra.mrb[20].mxu1 %v7496_v15  ;;  %4795 = vmatmul.mubr.f32.vlgmr.msra.gmra.mrb[34].mxu0 %v7496_v15 }
0x1520   :  { %5910 = vmatpush3.bf16.msra.mxu1 %v8038_v30  ;;  %4829 = vmatprep.mubr.msk.f32.mxu1 %vm6243_vm0, %v7904_v8  ;;  %v8043_v30 = vld [vmem:[#allocation4_spill] sm:$0xff] }
0x1521   :  { %5911 = vmatprep.subr.bf16.mxu1 %v7917_v27  ;;  %5934 = vmatpush3.bf16.msra.mxu0 %v8039_v56  ;;  %v8044_v56 = vld [vmem:[#allocation26_spill] sm:$0xff] }
0x1522   :  { %5935 = vmatprep.subr.bf16.mxu0 %v7917_v27  ;;  %4864 = vmatprep.mubr.msk.f32.mxu0 %vm6243_vm0, %v7904_v8 }
0x1524   :  { %5913 = vmatpush3.bf16.msra.mxu1 %v8040_v57  ;;  %v8046_v57 = vld [vmem:[#allocation27_spill] sm:$0xff] }
0x1525   :  { %5914 = vmatprep.subr.bf16.mxu1 %v7917_v27  ;;  %5937 = vmatpush3.bf16.msra.mxu0 %v8041_v21  ;;  %v8047_v21 = vld [vmem:[#allocation7_spill] sm:$0xff] }
0x1526   :  { %5938 = vmatprep.subr.bf16.mxu0 %v7917_v27 }
0x1528   :  { %5916 = vmatpush3.bf16.msra.mxu1 %v8042_v54  ;;  %v8048_v54 = vld [vmem:[#allocation28_spill] sm:$0xff] }
0x1529   :  { %5917 = vmatprep.subr.bf16.mxu1 %v7917_v27  ;;  %5940 = vmatpush3.bf16.msra.mxu0 %v8043_v30  ;;  %v8049_v30 = vld [vmem:[#allocation8_spill] sm:$0xff] }
0x152a   :  { %5941 = vmatprep.subr.bf16.mxu0 %v7917_v27 }
0x152c   :  { %5919 = vmatpush3.bf16.msra.mxu1 %v8044_v56  ;;  %v8050_v56 = vld [vmem:[#allocation29_spill] sm:$0xff] }
0x152d   :  { %5920 = vmatprep.subr.bf16.mxu1 %v7917_v27  ;;  %5943 = vmatpush3.bf16.msra.mxu0 %v8045_v18  ;;  %v8051_v18 = vld [vmem:[#allocation9_spill] sm:$0xff] }
0x152e   :  { %5944 = vmatprep.subr.bf16.mxu0 %v7917_v27 }
0x1530   :  { %5922 = vmatpush3.bf16.msra.mxu1 %v8046_v57  ;;  %v8052_v57 = vld [vmem:[#allocation30_spill] sm:$0xff] }
0x1531   :  { %5923 = vmatprep.subr.bf16.mxu1 %v7917_v27  ;;  %5946 = vmatpush3.bf16.msra.mxu0 %v8047_v21  ;;  %v8053_v21 = vld [vmem:[#allocation10_spill] sm:$0xff] }
0x1532   :  { %5947 = vmatprep.subr.bf16.mxu0 %v7917_v27 }
0x1534   :  { %5925 = vmatpush3.bf16.msra.mxu1 %v8048_v54 }
0x1535   :  { %5926 = vmatprep.subr.bf16.mxu1 %v7917_v27  ;;  %5949 = vmatpush3.bf16.msra.mxu0 %v8049_v30 }
0x1536   :  { %5950 = vmatprep.subr.bf16.mxu0 %v7917_v27 }
0x1538   :  { %5928 = vmatpush3.bf16.msra.mxu1 %v8050_v56 }
0x1539   :  { %5929 = vmatprep.subr.bf16.mxu1 %v7917_v27  ;;  %5952 = vmatpush3.bf16.msra.mxu0 %v8051_v18 }
0x153a   :  { %5953 = vmatprep.subr.bf16.mxu0 %v7917_v27 }
0x153c   :  { %5931 = vmatpush3.bf16.msra.mxu1 %v8052_v57 }
0x153d   :  { %5955 = vmatpush3.bf16.msra.mxu0 %v8053_v21  ;;  %5957 = vmatprep.subr.bf16.mxu1 %v8054_v6 }
0x153e   :  { %5988 = vmatprep.subr.bf16.mxu0 %v7917_v27 }
0x15d2   :  { %v2750_v54 = vpop.f32.mrb[32].mxu0 }
0x15d3   :  { %v4761_v30 = vpop.f32.mrb[33].mxu0  ;;  %v2751_v61 = vadd.f32 %v2750_v54, %v6969_v36 }
0x15f2   :  { %v2820_v13 = vpop.f32.mrb[20].mxu1  ;;  %v2891_v63 = vpop.f32.mrb[34].mxu0 }
0x15f3   :  { %v6113_v56 = vadd.f32 %v7942_v47, %v2820_v13  ;;  %v2822_v28 = vpop.f32.mrb[21].mxu1  ;;  %v4796_v9 = vpop.f32.mrb[35].mxu0  ;;  %v2892_v48 = vadd.f32 %v2891_v63, %v6967_v2 }
0x15f4   :  { %v6115_v18 = vadd.f32 %v6963_v16, %v2822_v28 }
0x15f5   :  { %v3506_v1 = vmul.f32 -1.442695, %v6113_v56 }
0x15f6   :  { %v3507_v5 = vmul.f32 -1.442695, %v6115_v18 }
0x15f7   :  { %6190 = vpow2.f32 %v3506_v1 }
0x15f8   :  { %6192 = vpow2.f32 %v3507_v5 }
0x1601   :  { %v6191_v57 = vpop.eup %6190 }
0x1602   :  { %v2899_v21 = vadd.f32 1.0, %v6191_v57  ;;  %v6193_v6 = vpop.eup %6192 }
0x1603   :  { %v2906_v43 = vadd.f32 1.0, %v6193_v6 }
0x1604   :  { %6194 = vrcp.f32 %v2899_v21 }
0x1605   :  { %6196 = vrcp.f32 %v2906_v43 }
0x160e   :  { %v6195_v30 = vpop.eup %6194 }
0x160f   :  { %v2909_v42 = vmul.f32 %v6195_v30, %v2892_v48  ;;  %v6197_v9 = vpop.eup %6196 }
0x1610   :  { %v2912_v56 = vsub.f32 1.0, %v6197_v9  ;;  %v2914_v5 = vmul.f32 %v6197_v9, %v7496_v15 }
0x1611   :  { %v2910_v13 = vadd.f32 %v2909_v42, %v2751_v61 }
0x1613   :  { %6198 = vtanh.f32 %v2910_v13 }
0x161d   :  { %v6199_v28 = vpop.eup %6198 }
0x161e   :  { %v2913_v1 = vmul.f32 %v6199_v28, %v2912_v56  ;;  %v8073_v56 = vld [vmem:[#allocation26_spill] sm:$0xff]  ;;  %v8074_v28 = vld [vmem:[#allocation27_spill] sm:$0xff] }
0x1620   :  { %v7632_v18 = vadd.f32 %v2914_v5, %v2913_v1  ;;  %v8075_v1 = vld [vmem:[#allocation28_spill] sm:$0xff]  ;;  %v8077_v5 = vld [vmem:[#allocation30_spill] sm:$0xff] }
0x1622   :  { %4830 = vmatmul.mubr.f32.vlgmr.msra.gmra.mrb[22].mxu1 %v7632_v18 }
0x1623   :  { %5959 = vmatpush1.bf16.msra.mxu1 %v6356_v20  ;;  %3143 = vmatprep.mubr.f32.mxu1 %v7904_v8 }
0x1624   :  { %5961 = vmatprep.subr.bf16.mxu1 %v6365_v23 }
0x1627   :  { %5963 = vmatpush1.bf16.msra.mxu1 %v6374_v26 }
0x1628   :  { %5965 = vmatprep.subr.bf16.mxu1 %v6389_v31  ;;  %v6239_v31 = vld [vmem:[%s7803_s9] sm:$0xff] }
0x162b   :  { %5967 = vmatpush1.bf16.msra.mxu1 %v6408_v37  ;;  %v8055_v37 = vld [vmem:[#allocation32_spill] sm:$0xff] }
0x162c   :  { %5969 = vmatprep.subr.bf16.mxu1 %v6417_v40  ;;  %v661_v40 = vsub.f32 %v6239_v31, %v8055_v37 }
0x162f   :  { %5971 = vmatpush1.bf16.msra.mxu1 %v6436_v46  ;;  %v662_v46 = vmul.f32 1.442695, %v661_v40 }
0x1630   :  { %5973 = vmatprep.subr.bf16.mxu1 %v6445_v49  ;;  %v8056_v49 = vld [vmem:[#allocation34_spill] sm:$0xff] }
0x1631   :  { %6200 = vpow2.f32 %v662_v46 }
0x1633   :  { %5975 = vmatpush1.bf16.msra.mxu1 %v6464_v55  ;;  %v8057_v55 = vld [vmem:[#allocation33_spill] sm:$0xff] }
0x1634   :  { %5977 = vmatprep.subr.bf16.mxu1 %v6473_v58  ;;  %v1592_v58 = vsub.f32 %v8057_v55, %v8056_v49 }
0x1637   :  { %5979 = vmatpush1.bf16.msra.mxu1 %v6492_v0  ;;  %v1593_v0 = vmul.f32 1.442695, %v1592_v58 }
0x1638   :  { %5981 = vmatprep.subr.bf16.mxu1 %v6498_v3  ;;  %v2524_v3 = vsub.f32 %v7522_v22, %v7529_v14 }
0x1639   :  { %6202 = vpow2.f32 %v1593_v0 }
0x163b   :  { %5983 = vmatpush1.bf16.msra.mxu1 %v6514_v11  ;;  %v2525_v11 = vmul.f32 1.442695, %v2524_v3 }
0x163c   :  { %5985 = vmatprep.subr.bf16.mxu1 %v6518_v12 }
0x163d   :  { %6204 = vpow2.f32 %v2525_v11 }
0x163f   :  { %5987 = vmatpush1.bf16.msra.mxu1 %v6528_v17 }
0x1640   :  { %6013 = vmatprep.subr.bf16.mxu1 %v6624_v62  ;;  %v6201_v62 = vpop.eup %6200 }
0x1643   :  { %v6203_v42 = vpop.eup %6202 }
0x1647   :  { %v6205_v61 = vpop.eup %6204 }
0x16f5   :  { %v2982_v20 = vpop.f32.mrb[22].mxu1 }
0x16f6   :  { %v7653_v23 = vadd.f32 %v7519_v29, %v2982_v20  ;;  %v4831_v26 = vpop.f32.mrb[23].mxu1 }
0x16f8   :  { %3508 = vst [vmem:[%s7803_s9 + $0x28] sm:$0xff] %v7653_v23  ;;  %2988 = vmax.xlane.f32.xlu0 %v7653_v23 }
0x1785   :  { %v7668_v12 = vpop.xlane.xlu0 %2988 }
0x1786   :  { %vm3001_vm12 = vcmp.eq.f32.partialorder %v7653_v23, %v7668_v12 }
0x1787   :  { %v3002_v17 = vsel %vm3001_vm12, %v7004_v38, 128.0 }
0x1788   :  { %3003 = vmin.xlane.f32.xlu1 %v3002_v17 }
0x178c   :  { %664 = vadd.xlane.f32.xlu1 %v6201_v62 }
0x1790   :  { %1595 = vadd.xlane.f32.xlu1 %v6203_v42 }
0x1794   :  { %2527 = vadd.xlane.f32.xlu1 %v6205_v61 }
0x1815   :  { %v3004_v48 = vpop.xlane.xlu1 %3003 }
0x1816   :  { %vm3005_vm13 = vcmp.eq.f32.partialorder %v7004_v38, %v3004_v48 }
0x1817   :  { %4865 = vmatmul.mubr.msk.f32.vlgmr.msra.gmra.mrb[36].mxu0 %vm3005_vm13, %v7916_v60 }
0x1818   :  { %5990 = vmatpush3.bf16.msra.mxu0 %v6541_v24  ;;  %4899 = vmatprep.mubr.msk.f32.mxu0 %vm6243_vm0, %v7904_v8 }
0x1819   :  { %v665_v15 = vpop.xlane.xlu1 %664  ;;  %5991 = vmatprep.subr.bf16.mxu0 %v7917_v27 }
0x181a   :  { %6206 = vlog2.f32 %v665_v15 }
0x181c   :  { %5993 = vmatpush3.bf16.msra.mxu0 %v6552_v32 }
0x181d   :  { %v1596_v43 = vpop.xlane.xlu1 %1595  ;;  %5994 = vmatprep.subr.bf16.mxu0 %v7917_v27 }
0x181e   :  { %6208 = vlog2.f32 %v1596_v43 }
0x1820   :  { %5996 = vmatpush3.bf16.msra.mxu0 %v6564_v35 }
0x1821   :  { %v2528_v38 = vpop.xlane.xlu1 %2527  ;;  %5997 = vmatprep.subr.bf16.mxu0 %v7917_v27 }
0x1822   :  { %6210 = vlog2.f32 %v2528_v38 }
0x1824   :  { %v6207_v24 = vpop.eup %6206  ;;  %5999 = vmatpush3.bf16.msra.mxu0 %v6574_v41 }
0x1825   :  { %v667_v60 = vmul.f32 0.6931472, %v6207_v24  ;;  %6000 = vmatprep.subr.bf16.mxu0 %v7917_v27 }
0x1827   :  { %v668_v63 = vadd.f32 %v667_v60, %v8055_v37 }
0x1828   :  { %v6209_v57 = vpop.eup %6208  ;;  %6002 = vmatpush3.bf16.msra.mxu0 %v6584_v44 }
0x1829   :  { %v669_v32 = vsub.f32 %v6239_v31, %v668_v63  ;;  %v1598_v54 = vmul.f32 0.6931472, %v6209_v57  ;;  %6003 = vmatprep.subr.bf16.mxu0 %v7917_v27  ;;  %v6240_v63 = vld [vmem:[%s7803_s9 + $0x8] sm:$0xff] }
0x182b   :  { %670 = vst [vmem:[%s7804_s10] sm:$0xff] %v669_v32  ;;  %v1599_v35 = vadd.f32 %v1598_v54, %v8056_v49  ;;  %v8080_v54 = vld [vmem:[#allocation35_spill] sm:$0xff] }
0x182c   :  { %v6211_v21 = vpop.eup %6210  ;;  %6005 = vmatpush3.bf16.msra.mxu0 %v6594_v50 }
0x182d   :  { %v1600_v41 = vsub.f32 %v8057_v55, %v1599_v35  ;;  %v2530_v6 = vmul.f32 0.6931472, %v6211_v21  ;;  %6006 = vmatprep.subr.bf16.mxu0 %v7917_v27 }
0x182f   :  { %3491 = vst [vmem:[%s7804_s10 + $0x10] sm:$0xff] %v1600_v41  ;;  %v2531_v44 = vadd.f32 %v2530_v6, %v7529_v14  ;;  %v8072_v14 = vld [vmem:[#allocation25_spill] sm:$0xff]  ;;  %v2990_v41 = vsub.f32 %v7653_v23, %v7668_v12 }
0x1830   :  { %6008 = vmatpush3.bf16.msra.mxu0 %v6604_v53  ;;  %v8058_v53 = vld [vmem:[#allocation11_spill] sm:$0xff] }
0x1831   :  { %v2532_v30 = vsub.f32 %v7522_v22, %v2531_v44  ;;  %6009 = vmatprep.subr.bf16.mxu0 %v7917_v27  ;;  %v8071_v22 = vld [vmem:[#allocation24_spill] sm:$0xff]  ;;  %v2991_v6 = vmul.f32 1.442695, %v2990_v41 }
0x1833   :  { %3503 = vst [vmem:[%s7804_s10 + $0x20] sm:$0xff] %v2532_v30 }
0x1834   :  { %6011 = vmatpush3.bf16.msra.mxu0 %v6615_v59  ;;  %v8059_v59 = vld [vmem:[#allocation12_spill] sm:$0xff] }
0x1835   :  { %6044 = vmatprep.subr.bf16.mxu0 %v7917_v27 }
0x18ea   :  { %v3074_v50 = vpop.f32.mrb[36].mxu0 }
0x18eb   :  { %v3078_v13 = vmax.f32 %v3074_v50, 0.0  ;;  %v4866_v9 = vpop.f32.mrb[37].mxu0 }
0x18ed   :  { %3144 = vmatmul.mubr.f32.vlgmr.msra.gmra.mrb[24].mxu1 %v3078_v13  ;;  %4900 = vmatmul.mubr.f32.vlgmr.msra.gmra.mrb[38].mxu0 %v3078_v13 }
0x18ee   :  { %6015 = vmatpush1.bf16.msra.mxu1 %v6646_v19  ;;  %6046 = vmatpush3.bf16.msra.mxu0 %v6651_v25  ;;  %v8060_v19 = vld [vmem:[#allocation13_spill] sm:$0xff]  ;;  %v8061_v25 = vld [vmem:[#allocation14_spill] sm:$0xff] }
0x18ef   :  { %6017 = vmatprep.subr.bf16.mxu1 %v6653_v33  ;;  %6047 = vmatprep.subr.bf16.mxu0 %v7917_v27  ;;  %v8062_v33 = vld [vmem:[#allocation15_spill] sm:$0xff] }
0x18f0   :  { %3284 = vmatprep.mubr.f32.mxu1 %v7904_v8  ;;  %4934 = vmatprep.mubr.msk.f32.mxu0 %vm6243_vm0, %v7904_v8 }
0x18f2   :  { %6019 = vmatpush1.bf16.msra.mxu1 %v6671_v45  ;;  %6049 = vmatpush3.bf16.msra.mxu0 %v6677_v51  ;;  %v8063_v45 = vld [vmem:[#allocation16_spill] sm:$0xff]  ;;  %v8064_v51 = vld [vmem:[#allocation17_spill] sm:$0xff] }
0x18f3   :  { %6021 = vmatprep.subr.bf16.mxu1 %v6680_v52  ;;  %6050 = vmatprep.subr.bf16.mxu0 %v7917_v27  ;;  %v8065_v52 = vld [vmem:[#allocation18_spill] sm:$0xff] }
0x18f6   :  { %6023 = vmatpush1.bf16.msra.mxu1 %v6702_v4  ;;  %6052 = vmatpush3.bf16.msra.mxu0 %v6708_v7  ;;  %v8066_v4 = vld [vmem:[#allocation19_spill] sm:$0xff]  ;;  %v8067_v7 = vld [vmem:[#allocation20_spill] sm:$0xff] }
0x18f7   :  { %6025 = vmatprep.subr.bf16.mxu1 %v6711_v10  ;;  %6053 = vmatprep.subr.bf16.mxu0 %v7917_v27  ;;  %v8068_v10 = vld [vmem:[#allocation21_spill] sm:$0xff] }
0x18fa   :  { %6027 = vmatpush1.bf16.msra.mxu1 %v6730_v34  ;;  %6055 = vmatpush3.bf16.msra.mxu0 %v6736_v39  ;;  %v8069_v34 = vld [vmem:[#allocation22_spill] sm:$0xff]  ;;  %v8070_v39 = vld [vmem:[#allocation23_spill] sm:$0xff] }
0x18fb   :  { %6029 = vmatprep.subr.bf16.mxu1 %v8058_v53  ;;  %6056 = vmatprep.subr.bf16.mxu0 %v7917_v27 }
0x18fe   :  { %6031 = vmatpush1.bf16.msra.mxu1 %v8059_v59  ;;  %6058 = vmatpush3.bf16.msra.mxu0 %v8060_v19 }
0x18ff   :  { %6033 = vmatprep.subr.bf16.mxu1 %v8061_v25  ;;  %6059 = vmatprep.subr.bf16.mxu0 %v7917_v27 }
0x1902   :  { %6035 = vmatpush1.bf16.msra.mxu1 %v8062_v33  ;;  %6061 = vmatpush3.bf16.msra.mxu0 %v8063_v45 }
0x1903   :  { %6037 = vmatprep.subr.bf16.mxu1 %v8064_v51  ;;  %6062 = vmatprep.subr.bf16.mxu0 %v7917_v27 }
0x1906   :  { %6039 = vmatpush1.bf16.msra.mxu1 %v8065_v52  ;;  %6064 = vmatpush3.bf16.msra.mxu0 %v8066_v4 }
0x1907   :  { %6041 = vmatprep.subr.bf16.mxu1 %v8067_v7  ;;  %6065 = vmatprep.subr.bf16.mxu0 %v7917_v27 }
0x190a   :  { %6043 = vmatpush1.bf16.msra.mxu1 %v8068_v10  ;;  %6067 = vmatpush3.bf16.msra.mxu0 %v8069_v34 }
0x190b   :  { %6068 = vmatprep.subr.bf16.mxu1 %v7917_v27 }
0x190d   :  { %3285 = vmatmul.mubr.f32.vlgmr.msra.gmra.mrb[24].mxu1 %v7632_v18  ;;  %4935 = vmatmul.mubr.f32.vlgmr.msra.gmra.mrb[40].mxu0 %v7632_v18 }
0x190e   :  { %6070 = vmatpush3.bf16.msra.mxu1 %v8070_v39  ;;  %4969 = vmatprep.mubr.msk.f32.mxu1 %vm6243_vm0, %v7904_v8  ;;  %v8076_v8 = vld [vmem:[#allocation29_spill] sm:$0xff] }
0x190f   :  { %6071 = vmatprep.subr.bf16.mxu1 %v7917_v27 }
0x1912   :  { %6073 = vmatpush3.bf16.msra.mxu1 %v8071_v22 }
0x1913   :  { %6074 = vmatprep.subr.bf16.mxu1 %v7917_v27 }
0x1916   :  { %6076 = vmatpush3.bf16.msra.mxu1 %v8072_v14 }
0x1917   :  { %6077 = vmatprep.subr.bf16.mxu1 %v7917_v27 }
0x191a   :  { %6079 = vmatpush3.bf16.msra.mxu1 %v8073_v56 }
0x191b   :  { %6080 = vmatprep.subr.bf16.mxu1 %v7917_v27 }
0x191e   :  { %6082 = vmatpush3.bf16.msra.mxu1 %v8074_v28 }
0x191f   :  { %6083 = vmatprep.subr.bf16.mxu1 %v7917_v27 }
0x1922   :  { %6085 = vmatpush3.bf16.msra.mxu1 %v8075_v1 }
0x1923   :  { %6086 = vmatprep.subr.bf16.mxu1 %v7917_v27 }
0x1926   :  { %6088 = vmatpush3.bf16.msra.mxu1 %v8076_v8 }
0x1927   :  { %6089 = vmatprep.subr.bf16.mxu1 %v7917_v27 }
0x192a   :  { %6091 = vmatpush3.bf16.msra.mxu1 %v8077_v5 }
0x19c0   :  { %v3216_v20 = vpop.f32.mrb[38].mxu0 }
0x19c1   :  { %v4901_v26 = vpop.f32.mrb[39].mxu0  ;;  %v3217_v61 = vadd.f32 %v3216_v20, %v6969_v36  ;;  %v8079_v36 = vld [vmem:[#allocation36_spill] sm:$0xff] }
0x19c2   :  { %v2058_v35 = vsub.f32 %v8080_v54, %v8079_v36 }
0x19c4   :  { %v2059_v21 = vmul.f32 1.442695, %v2058_v35 }
0x19e0   :  { %v3286_v31 = vpop.f32.mrb[24].mxu1  ;;  %v3357_v37 = vpop.f32.mrb[40].mxu0 }
0x19e1   :  { %v6117_v40 = vadd.f32 %v7942_v47, %v3286_v31  ;;  %v3288_v46 = vpop.f32.mrb[25].mxu1  ;;  %v4936_v49 = vpop.f32.mrb[41].mxu0  ;;  %v3358_v62 = vadd.f32 %v3357_v37, %v6967_v2  ;;  %v8078_v2 = vld [vmem:[#allocation31_spill] sm:$0xff] }
0x19e2   :  { %v6119_v58 = vadd.f32 %v6963_v16, %v3288_v46  ;;  %v1126_v57 = vsub.f32 %v6240_v63, %v8078_v2 }
0x19e3   :  { %v3512_v55 = vmul.f32 -1.442695, %v6117_v40 }
0x19e4   :  { %v3513_v0 = vmul.f32 -1.442695, %v6119_v58  ;;  %v1127_v32 = vmul.f32 1.442695, %v1126_v57 }
0x19e5   :  { %6212 = vpow2.f32 %v3512_v55 }
0x19e6   :  { %6214 = vpow2.f32 %v3513_v0 }
0x19ef   :  { %v6213_v3 = vpop.eup %6212 }
0x19f0   :  { %v3365_v11 = vadd.f32 1.0, %v6213_v3  ;;  %v6215_v27 = vpop.eup %6214 }
0x19f1   :  { %v3372_v17 = vadd.f32 1.0, %v6215_v27 }
0x19f2   :  { %6216 = vrcp.f32 %v3365_v11 }
0x19f3   :  { %6218 = vrcp.f32 %v3372_v17 }
0x19fc   :  { %v6217_v42 = vpop.eup %6216 }
0x19fd   :  { %v3375_v48 = vmul.f32 %v6217_v42, %v3358_v62  ;;  %v6219_v15 = vpop.eup %6218 }
0x19fe   :  { %v3378_v43 = vsub.f32 1.0, %v6219_v15  ;;  %v3380_v24 = vmul.f32 %v6219_v15, %v7632_v18 }
0x19ff   :  { %v3376_v47 = vadd.f32 %v3375_v48, %v3217_v61 }
0x1a01   :  { %6220 = vtanh.f32 %v3376_v47 }
0x1a02   :  { %6222 = vpow2.f32 %v1127_v32 }
0x1a03   :  { %6224 = vpow2.f32 %v2059_v21 }
0x1a04   :  { %6226 = vpow2.f32 %v2991_v6 }
0x1a0b   :  { %v6221_v16 = vpop.eup %6220 }
0x1a0c   :  { %v3379_v38 = vmul.f32 %v6221_v16, %v3378_v43  ;;  %v6223_v50 = vpop.eup %6222 }
0x1a0d   :  { %v6225_v13 = vpop.eup %6224 }
0x1a0e   :  { %v3381_v60 = vadd.f32 %v3380_v24, %v3379_v38  ;;  %v6227_v9 = vpop.eup %6226 }
0x1a10   :  { %4970 = vmatmul.mubr.f32.vlgmr.msra.gmra.mrb[26].mxu1 %v3381_v60 }
0x1ae3   :  { %v3448_v18 = vpop.f32.mrb[26].mxu1 }
0x1ae4   :  { %v3449_v44 = vadd.f32 %v7519_v29, %v3448_v18  ;;  %v4971_v30 = vpop.f32.mrb[27].mxu1 }
0x1ae6   :  { %3514 = vst [vmem:[%s7803_s9 + $0x30] sm:$0xff] %v3449_v44  ;;  %3454 = vmax.xlane.f32.xlu0 %v3449_v44 }
0x1aea   :  { %1129 = vadd.xlane.f32.xlu0 %v6223_v50 }
0x1aee   :  { %2061 = vadd.xlane.f32.xlu0 %v6225_v13 }
0x1af2   :  { %2993 = vadd.xlane.f32.xlu0 %v6227_v9 }
0x1b73   :  { %v3455_v53 = vpop.xlane.xlu0 %3454 }
0x1b74   :  { %v3456_v59 = vsub.f32 %v3449_v44, %v3455_v53 }
0x1b76   :  { %v3457_v19 = vmul.f32 1.442695, %v3456_v59 }
0x1b77   :  { %v1130_v25 = vpop.xlane.xlu0 %1129 }
0x1b78   :  { %6228 = vpow2.f32 %v3457_v19 }
0x1b79   :  { %6230 = vlog2.f32 %v1130_v25 }
0x1b7b   :  { %v2062_v29 = vpop.xlane.xlu0 %2061 }
0x1b7c   :  { %6232 = vlog2.f32 %v2062_v29 }
0x1b7f   :  { %v2994_v33 = vpop.xlane.xlu0 %2993 }
0x1b80   :  { %6234 = vlog2.f32 %v2994_v33 }
0x1b82   :  { %v6229_v45 = vpop.eup %6228 }
0x1b83   :  { %v6231_v51 = vpop.eup %6230  ;;  %3459 = vadd.xlane.f32.xlu1 %v6229_v45 }
0x1b84   :  { %v1132_v52 = vmul.f32 0.6931472, %v6231_v51 }
0x1b86   :  { %v6233_v4 = vpop.eup %6232  ;;  %v1133_v7 = vadd.f32 %v1132_v52, %v8078_v2 }
0x1b87   :  { %v2064_v10 = vmul.f32 0.6931472, %v6233_v4 }
0x1b88   :  { %v1134_v34 = vsub.f32 %v6240_v63, %v1133_v7 }
0x1b89   :  { %v2065_v39 = vadd.f32 %v2064_v10, %v8079_v36 }
0x1b8a   :  { %v6235_v22 = vpop.eup %6234  ;;  %3485 = vst [vmem:[%s7804_s10 + $0x8] sm:$0xff] %v1134_v34 }
0x1b8b   :  { %v2066_v14 = vsub.f32 %v8080_v54, %v2065_v39  ;;  %v2996_v56 = vmul.f32 0.6931472, %v6235_v22 }
0x1b8d   :  { %3497 = vst [vmem:[%s7804_s10 + $0x18] sm:$0xff] %v2066_v14  ;;  %v2997_v28 = vadd.f32 %v2996_v56, %v7668_v12 }
0x1b8f   :  { %v2998_v1 = vsub.f32 %v7653_v23, %v2997_v28 }
0x1b91   :  { %3509 = vst [vmem:[%s7804_s10 + $0x28] sm:$0xff] %v2998_v1 }
0x1c10   :  { %v3460_v8 = vpop.xlane.xlu1 %3459 }
0x1c11   :  { %6236 = vlog2.f32 %v3460_v8 }
0x1c1b   :  { %v6237_v5 = vpop.eup %6236 }
0x1c1c   :  { %v3462_v20 = vmul.f32 0.6931472, %v6237_v5 }
0x1c1e   :  { %v3463_v26 = vadd.f32 %v3462_v20, %v3455_v53 }
0x1c20   :  { %v3464_v31 = vsub.f32 %v3449_v44, %v3463_v26 }
0x1c22   :  { %3515 = vst [vmem:[%s7804_s10 + $0x30] sm:$0xff] %v3464_v31 }

</bundles_post_ra>
